<compile_context>
chip_gen: v7x
topology: tpu7x:2x2x1
jax: 0.10.0
libtpu: 0.0.40
codegen_flags: <defaults>
</compile_context>

<pallas_src>
import math

import jax
import jax.numpy as jnp
from jax.experimental import pallas as pl
from jax.experimental.pallas import tpu as pltpu


def _cap_to_length_kernel(x_ref, s_ref, o_ref):
    # x_ref: (tile_rows, caps_per_row * num_atom)    lane-dense input slab
    # s_ref: (caps_per_row * num_atom, caps_per_row) 0/1 segment selector
    # o_ref: (tile_rows, caps_per_row)               lane-dense output slab
    x = x_ref[...].astype(jnp.float32)        # upcast in-register (bf16 inputs)
    sq = x * x                                # VPU
    ssq = jnp.dot(                            # MXU: segmented sum over num_atom
        sq, s_ref[...],
        precision=jax.lax.Precision.HIGHEST,
        preferred_element_type=jnp.float32,
    )
    o_ref[...] = jnp.sqrt(ssq).astype(o_ref.dtype)


def cap_to_length(x, keepdim=False, *, caps_per_row=128,
                  target_block_bytes=2 * 1024 * 1024):
    """x: (..., num_cap, num_atom) -> (..., num_cap[, 1]); L2 norm over num_atom."""
    *lead, num_cap, num_atom = x.shape
    lead = tuple(lead)
    G = math.prod(lead) * num_cap                 # total number of capsules
    width = caps_per_row * num_atom               # lane-dense row width (%128==0)
    itemsize = jnp.dtype(x.dtype).itemsize
    sublane = max(8, 32 // itemsize)              # f32: 8, bf16: 16, int8/fp8: 32

    # --- tiling: everything divides evenly; no whole-array fallback -----------
    rows0 = (G + caps_per_row - 1) // caps_per_row
    tile_rows = max(1, min(rows0, target_block_bytes // (width * itemsize)))
    tile_rows = max(sublane, (tile_rows // sublane) * sublane)
    rows = ((rows0 + tile_rows - 1) // tile_rows) * tile_rows
    G_pad = rows * caps_per_row
    grid = (rows // tile_rows,)

    # --- wrapper-side layout plumbing (reshapes are free; pad only if needed) -
    flat = x.reshape(G, num_atom)
    if G_pad != G:
        flat = jnp.pad(flat, ((0, G_pad - G), (0, 0)))   # zero capsules -> norm 0
    x2d = flat.reshape(rows, width)

    # 0/1 block-diagonal selector: S[i, c] = (i // num_atom == c)
    owner = jnp.arange(width, dtype=jnp.int32) // num_atom
    sel = (owner[:, None] == jnp.arange(caps_per_row, dtype=jnp.int32)[None, :]
           ).astype(jnp.float32)

    out2d = pl.pallas_call(
        _cap_to_length_kernel,
        out_shape=jax.ShapeDtypeStruct((rows, caps_per_row), x.dtype),
        grid_spec=pltpu.PrefetchScalarGridSpec(
            num_scalar_prefetch=0,
            grid=grid,
            in_specs=[
                pl.BlockSpec((tile_rows, width), lambda i: (i, 0)),
                # constant block index -> DMA'd into VMEM once, reused each step
                pl.BlockSpec((width, caps_per_row), lambda i: (0, 0)),
            ],
            out_specs=pl.BlockSpec((tile_rows, caps_per_row), lambda i: (i, 0)),
        ),
        compiler_params=pltpu.CompilerParams(
            dimension_semantics=("parallel",),
        ),
    )(x2d, sel)

    out = out2d.reshape(G_pad)[:G].reshape(*lead, num_cap)
    if keepdim:
        out = out[..., None]
    return out


if __name__ == "__main__":
    key = jax.random.PRNGKey(0)
    # small shapes consistent with the module's (B, d, h, w, num_cap, num_atom)
    B, D, H, W, num_cap, num_atom = 2, 4, 8, 8, 4, 16
    x = jax.random.normal(key, (B, D, H, W, num_cap, num_atom), dtype=jnp.float32)
    ref = jnp.sqrt(jnp.sum(x * x, axis=-1))

    # default tiling
    out = jax.block_until_ready(cap_to_length(x, keepdim=False))
    assert out.shape == (B, D, H, W, num_cap), out.shape
    assert jnp.allclose(out, ref, atol=1e-5, rtol=1e-5)

    # keepdim path
    out_k = jax.block_until_ready(cap_to_length(x, keepdim=True))
    assert out_k.shape == (B, D, H, W, num_cap, 1)
    assert jnp.allclose(out_k[..., 0], ref, atol=1e-5, rtol=1e-5)

    # multi-step grid (exercises DMA/compute pipelining with smaller blocks)
    out_mt = jax.block_until_ready(
        cap_to_length(x, target_block_bytes=64 * 1024))
    assert jnp.allclose(out_mt, ref, atol=1e-5, rtol=1e-5)

    # capsule count not a multiple of 128 (exercises the zero-padding path)
    x2 = jax.random.normal(jax.random.PRNGKey(1), (1, 3, 5, 7, 3, 16),
                           dtype=jnp.float32)
    ref2 = jnp.sqrt(jnp.sum(x2 * x2, axis=-1))
    out2 = jax.block_until_ready(cap_to_length(x2))
    assert out2.shape == ref2.shape
    assert jnp.allclose(out2, ref2, atol=1e-5, rtol=1e-5)

    # bf16 input: native-dtype load, in-kernel f32 accumulation, bf16 output
    xb = x.astype(jnp.bfloat16)
    refb = jnp.sqrt(jnp.sum(xb.astype(jnp.float32) ** 2, axis=-1))
    outb = jax.block_until_ready(cap_to_length(xb))
    assert outb.dtype == jnp.bfloat16
    assert jnp.allclose(outb.astype(jnp.float32), refb, atol=5e-2, rtol=5e-2)

    print("KERNEL_OK")
</pallas_src>

<mosaic_0001>
module attributes {stable_mosaic.version = 11 : i64} {
  func.func @_cap_to_length_kernel(%arg0: i32, %arg1: memref<16x2048xf32, #tpu.memory_space<vmem>>, %arg2: memref<2048x128xf32, #tpu.memory_space<vmem>>, %arg3: memref<16x128xf32, #tpu.memory_space<vmem>>) attributes {dimension_semantics = [#tpu.dimension_semantics<parallel>], iteration_bounds = array<i64: 1>, scalar_prefetch = 0 : i64, scratch_operands = 0 : i64, tpu.core_type = #tpu.core_type<tc>, window_params = [{transform_indices = @transform_0, window_bounds = array<i64: 16, 2048>}, {pipeline_mode = #tpu.pipeline_mode<synchronous>, transform_indices = @transform_1, window_bounds = array<i64: 2048, 128>}, {transform_indices = @transform_2, window_bounds = array<i64: 16, 128>}]} {
    %c0 = arith.constant 0 : index
    %c0_0 = arith.constant 0 : index
    %0 = vector.load %arg1[%c0, %c0_0] : memref<16x2048xf32, #tpu.memory_space<vmem>>, vector<16x2048xf32>
    %1 = arith.mulf %0, %0 : vector<16x2048xf32>
    %c0_1 = arith.constant 0 : index
    %c0_2 = arith.constant 0 : index
    %2 = vector.load %arg2[%c0_1, %c0_2] : memref<2048x128xf32, #tpu.memory_space<vmem>>, vector<2048x128xf32>
    %cst = arith.constant dense<0.000000e+00> : vector<16x128xf32>
    %3 = tpu.matmul %1, %2, %cst {dimension_numbers = #tpu.dot_dimension_numbers<[1], [0], [0], [1], [0, 0, 1, 1], [], []>, precision = #tpu.contract_precision<fp32>} : vector<16x2048xf32>, vector<2048x128xf32>, vector<16x128xf32> -> vector<16x128xf32>
    %4 = math.sqrt %3 : vector<16x128xf32>
    %c0_3 = arith.constant 0 : index
    %c0_4 = arith.constant 0 : index
    %5 = vector.load %arg3[%c0_3, %c0_4] : memref<16x128xf32, #tpu.memory_space<vmem>>, vector<16x128xf32>
    tpu.vector_store %arg3[%c0_3, %c0_4], %4 {strides = array<i32>} : memref<16x128xf32, #tpu.memory_space<vmem>>, vector<16x128xf32>,
    return
  }
  func.func @transform_0(%arg0: i32) -> (i32, i32) {
    %c0_i32 = arith.constant 0 : i32
    %c0_i32_0 = arith.constant 0 : i32
    return %arg0, %c0_i32 : i32, i32
  }
  func.func @transform_1(%arg0: i32) -> (i32, i32) {
    %c0_i32 = arith.constant 0 : i32
    %c0_i32_0 = arith.constant 0 : i32
    %c0_i32_1 = arith.constant 0 : i32
    return %c0_i32, %c0_i32_0 : i32, i32
  }
  func.func @transform_2(%arg0: i32) -> (i32, i32) {
    %c0_i32 = arith.constant 0 : i32
    %c0_i32_0 = arith.constant 0 : i32
    return %arg0, %c0_i32 : i32, i32
  }
}

</mosaic_0001>

<bundles_post_ra>
// kernel: tpu_custom_call.1
= control target key start
LH: loop header
LB: loop body
LE: loop exit
PB: predicated region body
PF: predicated region fallthrough
CT: control target
= control target key end

     0   :  { %7 = vsyncpa [#allocation3], 0  ;;  %s15459_s0 = inlined_call_operand.hbm [shape: f32[16,2048], index: 0, kind: input, shape index: {}]   ;;  %s15460_s1 = inlined_call_operand.hbm [shape: f32[2048,128], index: 1, kind: input, shape index: {}]   ;;  %s15461_s2 = inlined_call_operand.hbm [shape: f32[16,128], index: 2, kind: output, shape index: {}]  }
   0x1   :  { %8 = vsyncpa [#allocation6], 0 }
   0x2   :  { %9 = vsyncpa [#allocation4], 0  ;;  %s11180_s9 = smov [#allocation2]   ;;  %s11108_s13 = scalar_lea.hbm %s15459_s0, 4096 }
   0x3   :  { %s15_s10 = sshll.u32 %s11180_s9, 4  ;;  %p11109_p0 = scmp.ne.s32.totalorder %s15459_s0, %s11108_s13  ;;  %s16_s10 = int_to_ptr.vmem [resolvable:$true] %s15_s10 }
   0x4   :  { %p11112_p1 = scmp.lt.u32.totalorder %s11108_s13, %s15459_s0 }
   0x6   :  { %p11114_p2 = pnand %p11112_p1, %p11109_p0 }
   0x8   :  { %11117 = shalt.err (!%p11114_p2)
}
   0x9   :  { %s11118_s18 = scalar_lea.vmem %s16_s10, 4096  ;;  %p11123_p4 = scmp.lt.s32.totalorder %s16_s10, %s16_s10 }
   0xa   :  { %p11119_p3 = scmp.ne.s32.totalorder %s16_s10, %s11118_s18  ;;  %p11124_p5 = scmp.lt.s32.totalorder %s11118_s18, %s11118_s18 }
   0xc   :  { %p11125_p6 = por %p11124_p5, %p11123_p4 }
   0xe   :  { %p11126_p7 = pnand %p11125_p6, %p11119_p3 }
  0x10   :  { %11129 = shalt.err (!%p11126_p7)
}
  0x11   :  { %s11181_s19 = smov 2048   ;;  %s11182_s20 = smov 128  }
  0x12   :  { %21 = dma.hbm_to_vmem [thread:$0]  %s15459_s0, 4096, %s16_s10, [#allocation3], %s11181_s19, %s11181_s19, %s11182_s20  }
  0x13   :  { %s11183_s23 = smov [#allocation5]   ;;  %s11130_s27 = scalar_lea.hbm %s15460_s1, 32768 }
  0x14   :  { %s27_s24 = sshll.u32 %s11183_s23, 4  ;;  %p11131_p8 = scmp.ne.s32.totalorder %s15460_s1, %s11130_s27  ;;  %s28_s24 = int_to_ptr.vmem [resolvable:$true] %s27_s24 }
  0x15   :  { %p11134_p9 = scmp.lt.u32.totalorder %s11130_s27, %s15460_s1 }
  0x17   :  { %p11136_p10 = pnand %p11134_p9, %p11131_p8 }
  0x19   :  { %11139 = shalt.err (!%p11136_p10)
}
  0x1a   :  { %s11140_s4 = scalar_lea.vmem %s28_s24, 32768  ;;  %p11145_p12 = scmp.lt.s32.totalorder %s28_s24, %s28_s24 }
  0x1b   :  { %p11141_p11 = scmp.ne.s32.totalorder %s28_s24, %s11140_s4  ;;  %p11146_p13 = scmp.lt.s32.totalorder %s11140_s4, %s11140_s4 }
  0x1d   :  { %p11147_p0 = por %p11146_p13, %p11145_p12 }
  0x1f   :  { %p11148_p1 = pnand %p11147_p0, %p11141_p11 }
  0x21   :  { %11151 = shalt.err (!%p11148_p1)
}
  0x22   :  { %s11184_s0 = smov 8  }
  0x23   :  { %33 = dma.hbm_to_vmem [thread:$0]  %s15460_s1, 32768, %s28_s24, [#allocation6], %s11182_s20, %s11182_s20, %s11184_s0  }
  0x24   :  { %11174 = dma.done.wait [#allocation3], 4096  }
  0x25   :  { %11175 = vsyncadd [#allocation3], 4294963200 }
  0x26   :  { %11176 = dma.done.wait [#allocation6], 32768  }
  0x27   :  { %11177 = vsyncadd [#allocation6], 4294934528  ;;  %v120_v0 = vld [vmem:[#allocation5 + $0x80] sm:$0xff]  ;;  %v121_v1 = vld [vmem:[#allocation5 + $0x88] sm:$0xff]  ;;  %s11185_s1 = smov [#allocation7]  }
  0x28   :  { %v104_v2 = vld [vmem:[#allocation5] sm:$0xff]  ;;  %v409_v3 = vand.u32 4294901760, %v120_v0  ;;  %v412_v4 = vand.u32 4294901760, %v121_v1  ;;  %v105_v5 = vld [vmem:[#allocation5 + $0x8] sm:$0xff]  ;;  %v122_v7 = vld [vmem:[#allocation5 + $0x90] sm:$0xff]  ;;  %s7725_s7 = sshll.u32 %s11185_s1, 4  ;;  %s7726_s7 = int_to_ptr.vmem [resolvable:$true] %s7725_s7 }
  0x29   :  { %v361_v6 = vand.u32 4294901760, %v104_v2  ;;  %v123_v8 = vld [vmem:[#allocation5 + $0x98] sm:$0xff]  ;;  %v364_v9 = vand.u32 4294901760, %v105_v5  ;;  %v415_v10 = vand.u32 4294901760, %v122_v7  ;;  %v106_v12 = vld [vmem:[#allocation5 + $0x10] sm:$0xff]  ;;  %v124_v18 = vld [vmem:[#allocation5 + $0xa0] sm:$0xff]  ;;  %p11157_p3 = scmp.lt.s32.totalorder %s7726_s7, %s7726_s7 }
  0x2a   :  { %v418_v11 = vand.u32 4294901760, %v123_v8  ;;  %v107_v13 = vld [vmem:[#allocation5 + $0x18] sm:$0xff]  ;;  %v11229_v14 = vpack.c.bf16 %v412_v4, %v409_v3  ;;  %v367_v16 = vand.u32 4294901760, %v106_v12  ;;  %v125_v19 = vld [vmem:[#allocation5 + $0xa8] sm:$0xff]  ;;  %v108_v23 = vld [vmem:[#allocation5 + $0x20] sm:$0xff]  ;;  %v421_v29 = vand.u32 4294901760, %v124_v18 }
  0x2b   :  { %v11231_v15 = vsub.f32 %v104_v2, %v361_v6  ;;  %v370_v17 = vand.u32 4294901760, %v107_v13  ;;  %v11233_v20 = vpack.c.bf16 %v364_v9, %v361_v6  ;;  %v11235_v21 = vsub.f32 %v105_v5, %v364_v9  ;;  %v109_v24 = vld [vmem:[#allocation5 + $0x28] sm:$0xff]  ;;  %v126_v37 = vld [vmem:[#allocation5 + $0xb0] sm:$0xff]  ;;  %v127_v42 = vld [vmem:[#allocation5 + $0xb8] sm:$0xff]  ;;  %s11152_s8 = scalar_lea.vmem %s7726_s7, 256 }
  0x2c   :  { %v11237_v22 = vpack.c.bf16 %v418_v11, %v415_v10  ;;  %9563 = vmatprep.subr.bf16.mxu0 %v11229_v14  ;;  %v11240_v25 = vsub.f32 %v122_v7, %v415_v10  ;;  %v11242_v26 = vsub.f32 %v123_v8, %v418_v11  ;;  %v11246_v28 = vsub.f32 %v106_v12, %v367_v16  ;;  %v110_v55 = vld [vmem:[#allocation5 + $0x30] sm:$0xff]  ;;  %v111_v56 = vld [vmem:[#allocation5 + $0x38] sm:$0xff]  ;;  %v128_v5 = vld [vmem:[#allocation5 + $0xc0] sm:$0xff]  ;;  %p11153_p2 = scmp.ne.s32.totalorder %s7726_s7, %s11152_s8  ;;  %p11158_p4 = scmp.lt.s32.totalorder %s11152_s8, %s11152_s8 }
  0x2d   :  { %v11244_v27 = vpack.c.bf16 %v370_v17, %v367_v16  ;;  %9565 = vmatpush3.bf16.msra.mxu0 %v11233_v20  ;;  %v424_v30 = vand.u32 4294901760, %v125_v19  ;;  %v11249_v31 = vsub.f32 %v120_v0, %v409_v3  ;;  %v11251_v32 = vsub.f32 %v121_v1, %v412_v4  ;;  %v129_v6 = vld [vmem:[#allocation5 + $0xc8] sm:$0xff]  ;;  %v112_v11 = vld [vmem:[#allocation5 + $0x40] sm:$0xff] }
  0x2e   :  { %9567 = vmatprep.subr.bf16.mxu0 %v11237_v22  ;;  %v373_v33 = vand.u32 4294901760, %v108_v23  ;;  %v376_v34 = vand.u32 4294901760, %v109_v24  ;;  %v15477_v35 = vand.u32 4294901760, %v11231_v15  ;;  %v15476_v36 = vand.u32 4294901760, %v11235_v21  ;;  %p11159_p5 = por %p11158_p4, %p11157_p3 }
  0x2f   :  { %v11256_v38 = vsub.f32 %v107_v13, %v370_v17  ;;  %v11258_v39 = vpack.c.bf16 %v424_v30, %v421_v29  ;;  %v11260_v40 = vsub.f32 %v124_v18, %v421_v29  ;;  %v15481_v41 = vand.u32 4294901760, %v11249_v31  ;;  %v113_v29 = vld [vmem:[#allocation5 + $0x48] sm:$0xff] }
  0x30   :  { %v11263_v43 = vsub.f32 %v125_v19, %v424_v30  ;;  %v15479_v44 = vand.u32 4294901760, %v11251_v32  ;;  %v11266_v45 = vpack.c.bf16 %v376_v34, %v373_v33  ;;  %v11268_v46 = vsub.f32 %v108_v23, %v373_v33  ;;  %p11160_p6 = pnand %p11159_p5, %p11153_p2 }
  0x31   :  { %9569 = vmatpush3.bf16.msra.mxu0 %v11244_v27  ;;  %v603_v47 = vsub.f32 %v11249_v31, %v15481_v41  ;;  %v491_v48 = vsub.f32 %v11231_v15, %v15477_v35  ;;  %v498_v49 = vsub.f32 %v11235_v21, %v15476_v36  ;;  %v427_v50 = vand.u32 4294901760, %v126_v37  ;;  %v41_v41 = vld [vmem:[#allocation2 + $0x8] sm:$0xff] }
  0x32   :  { %9571 = vmatprep.subr.bf16.mxu0 %v11258_v39  ;;  %v610_v51 = vsub.f32 %v11251_v32, %v15479_v44  ;;  %v430_v52 = vand.u32 4294901760, %v127_v42  ;;  %v15474_v53 = vand.u32 4294901760, %v11240_v25  ;;  %v15472_v54 = vand.u32 4294901760, %v11242_v26 }
  0x33   :  { %v604_v57 = vand.u32 4294901760, %v603_v47  ;;  %v11286_v58 = vsub.f32 %v109_v24, %v376_v34  ;;  %v492_v59 = vand.u32 4294901760, %v491_v48  ;;  %v499_v60 = vand.u32 4294901760, %v498_v49 }
  0x34   :  { %v611_v61 = vand.u32 4294901760, %v610_v51  ;;  %v11288_v62 = vpack.c.bf16 %v430_v52, %v427_v50  ;;  %v11290_v63 = vsub.f32 %v126_v37, %v427_v50  ;;  %v617_v0 = vsub.f32 %v11240_v25, %v15474_v53 }
  0x35   :  { %9573 = vmatpush3.bf16.msra.mxu0 %v11266_v45  ;;  %v9596_v1 = vpack.c.bf16 %v499_v60, %v492_v59  ;;  %v624_v2 = vsub.f32 %v11242_v26, %v15472_v54  ;;  %v379_v3 = vand.u32 4294901760, %v110_v55  ;;  %v382_v4 = vand.u32 4294901760, %v111_v56  ;;  %v131_v59 = vld [vmem:[#allocation5 + $0xd8] sm:$0xff] }
  0x36   :  { %v9594_v7 = vpack.c.bf16 %v611_v61, %v604_v57  ;;  %9575 = vmatprep.subr.bf16.mxu0 %v11288_v62  ;;  %v618_v8 = vand.u32 4294901760, %v617_v0  ;;  %v15471_v9 = vand.u32 4294901760, %v11246_v28  ;;  %v15469_v10 = vand.u32 4294901760, %v11256_v38  ;;  %v130_v57 = vld [vmem:[#allocation5 + $0xd0] sm:$0xff]  ;;  %v135_v54 = vld [vmem:[#allocation5 + $0xf8] sm:$0xff] }
  0x37   :  { %v11302_v12 = vsub.f32 %v127_v42, %v430_v52  ;;  %v625_v13 = vand.u32 4294901760, %v624_v2  ;;  %v11304_v16 = vpack.c.bf16 %v382_v4, %v379_v3  ;;  %v11306_v17 = vsub.f32 %v110_v55, %v379_v3 }
  0x38   :  { %9595 = vmatprep.subr.bf16.mxu1 %v9594_v7  ;;  %v505_v18 = vsub.f32 %v11246_v28, %v15471_v9  ;;  %v512_v19 = vsub.f32 %v11256_v38, %v15469_v10  ;;  %v433_v23 = vand.u32 4294901760, %v128_v5  ;;  %v436_v24 = vand.u32 4294901760, %v129_v6  ;;  %v134_v9 = vld [vmem:[#allocation5 + $0xf0] sm:$0xff] }
  0x39   :  { %9597 = vmatpush3.bf16.msra.mxu1 %v9596_v1  ;;  %v9598_v30 = vpack.c.bf16 %v625_v13, %v618_v8  ;;  %9577 = vmatpush3.bf16.msra.mxu0 %v11304_v16  ;;  %v15467_v33 = vand.u32 4294901760, %v11260_v40  ;;  %v15466_v34 = vand.u32 4294901760, %v11263_v43  ;;  %v385_v37 = vand.u32 4294901760, %v112_v11  ;;  %v114_v1 = vld [vmem:[#allocation5 + $0x50] sm:$0xff] }
  0x3a   :  { %v11317_v42 = vsub.f32 %v111_v56, %v382_v4  ;;  %v506_v47 = vand.u32 4294901760, %v505_v18  ;;  %v513_v48 = vand.u32 4294901760, %v512_v19  ;;  %v11319_v49 = vpack.c.bf16 %v436_v24, %v433_v23  ;;  %v115_v18 = vld [vmem:[#allocation5 + $0x58] sm:$0xff] }
  0x3b   :  { %9599 = vmatprep.subr.bf16.mxu1 %v9598_v30  ;;  %v11321_v50 = vsub.f32 %v128_v5, %v433_v23  ;;  %v631_v51 = vsub.f32 %v11260_v40, %v15467_v33  ;;  %v638_v52 = vsub.f32 %v11263_v43, %v15466_v34  ;;  %v388_v55 = vand.u32 4294901760, %v113_v29 }
  0x3c   :  { %v9600_v56 = vpack.c.bf16 %v513_v48, %v506_v47  ;;  %9579 = vmatprep.subr.bf16.mxu0 %v11319_v49  ;;  %v11330_v60 = vsub.f32 %v129_v6, %v436_v24  ;;  %v15464_v61 = vand.u32 4294901760, %v11268_v46  ;;  %v15462_v0 = vand.u32 4294901760, %v11286_v58 }
  0x3d   :  { %v632_v2 = vand.u32 4294901760, %v631_v51  ;;  %v639_v3 = vand.u32 4294901760, %v638_v52  ;;  %v11334_v4 = vpack.c.bf16 %v388_v55, %v385_v37  ;;  %v11336_v5 = vsub.f32 %v112_v11, %v385_v37 }
  0x3e   :  { %9601 = vmatpush3.bf16.msra.mxu1 %v9600_v56  ;;  %v519_v7 = vsub.f32 %v11268_v46, %v15464_v61  ;;  %v526_v6 = vsub.f32 %v11286_v58, %v15462_v0  ;;  %v439_v8 = vand.u32 4294901760, %v130_v57  ;;  %v442_v13 = vand.u32 4294901760, %v131_v59  ;;  %v133_v0 = vld [vmem:[#allocation5 + $0xe8] sm:$0xff] }
  0x3f   :  { %v9602_v19 = vpack.c.bf16 %v639_v3, %v632_v2  ;;  %9581 = vmatpush3.bf16.msra.mxu0 %v11334_v4  ;;  %v15463_v23 = vand.u32 4294901760, %v11290_v63  ;;  %v15465_v11 = vand.u32 4294901760, %v11302_v12  ;;  %v391_v24 = vand.u32 4294901760, %v114_v1  ;;  %v132_v3 = vld [vmem:[#allocation5 + $0xe0] sm:$0xff] }
  0x40   :  { %v11347_v30 = vsub.f32 %v113_v29, %v388_v55  ;;  %v520_v37 = vand.u32 4294901760, %v519_v7  ;;  %v527_v47 = vand.u32 4294901760, %v526_v6  ;;  %v11349_v48 = vpack.c.bf16 %v442_v13, %v439_v8  ;;  %v116_v6 = vld [vmem:[#allocation5 + $0x60] sm:$0xff] }
  0x41   :  { %9603 = vmatprep.subr.bf16.mxu1 %v9602_v19  ;;  %v11351_v51 = vsub.f32 %v130_v57, %v439_v8  ;;  %v645_v52 = vsub.f32 %v11290_v63, %v15463_v23  ;;  %v652_v56 = vsub.f32 %v11302_v12, %v15465_v11  ;;  %v394_v2 = vand.u32 4294901760, %v115_v18  ;;  %v117_v11 = vld [vmem:[#allocation5 + $0x68] sm:$0xff] }
  0x42   :  { %v9604_v29 = vpack.c.bf16 %v527_v47, %v520_v37  ;;  %9583 = vmatprep.subr.bf16.mxu0 %v11349_v48  ;;  %v11360_v55 = vsub.f32 %v131_v59, %v442_v13  ;;  %v15468_v7 = vand.u32 4294901760, %v11306_v17  ;;  %v15470_v57 = vand.u32 4294901760, %v11317_v42 }
  0x43   :  { %v646_v8 = vand.u32 4294901760, %v645_v52  ;;  %v653_v19 = vand.u32 4294901760, %v652_v56  ;;  %v11364_v23 = vpack.c.bf16 %v394_v2, %v391_v24  ;;  %v11366_v61 = vsub.f32 %v114_v1, %v391_v24 }
  0x44   :  { %9605 = vmatpush3.bf16.msra.mxu1 %v9604_v29  ;;  %v533_v37 = vsub.f32 %v11306_v17, %v15468_v7  ;;  %v540_v59 = vsub.f32 %v11317_v42, %v15470_v57  ;;  %v445_v13 = vand.u32 4294901760, %v132_v3  ;;  %v448_v47 = vand.u32 4294901760, %v133_v0 }
  0x45   :  { %v9606_v34 = vpack.c.bf16 %v653_v19, %v646_v8  ;;  %9585 = vmatpush3.bf16.msra.mxu0 %v11364_v23  ;;  %v15473_v52 = vand.u32 4294901760, %v11321_v50  ;;  %v15475_v1 = vand.u32 4294901760, %v11330_v60  ;;  %v397_v24 = vand.u32 4294901760, %v116_v6 }
  0x46   :  { %v11377_v56 = vsub.f32 %v115_v18, %v394_v2  ;;  %v534_v29 = vand.u32 4294901760, %v533_v37  ;;  %v541_v33 = vand.u32 4294901760, %v540_v59  ;;  %v11379_v7 = vpack.c.bf16 %v448_v47, %v445_v13  ;;  %v118_v37 = vld [vmem:[#allocation5 + $0x70] sm:$0xff] }
  0x47   :  { %9607 = vmatprep.subr.bf16.mxu1 %v9606_v34  ;;  %v11381_v10 = vsub.f32 %v132_v3, %v445_v13  ;;  %v659_v8 = vsub.f32 %v11321_v50, %v15473_v52  ;;  %v666_v19 = vsub.f32 %v11330_v60, %v15475_v1  ;;  %v400_v57 = vand.u32 4294901760, %v117_v11  ;;  %v119_v1 = vld [vmem:[#allocation5 + $0x78] sm:$0xff] }
  0x48   :  { %15965 = vst [vmem:[#allocation11_spill] sm:$0xff] %v11379_v7  ;;  %v9608_v18 = vpack.c.bf16 %v541_v33, %v534_v29  ;;  %9587 = vmatprep.subr.bf16.mxu0 %v11379_v7  ;;  %v11390_v2 = vsub.f32 %v133_v0, %v448_v47  ;;  %v15478_v34 = vand.u32 4294901760, %v11336_v5  ;;  %v15480_v3 = vand.u32 4294901760, %v11347_v30 }
  0x49   :  { %v660_v59 = vand.u32 4294901760, %v659_v8  ;;  %v667_v13 = vand.u32 4294901760, %v666_v19  ;;  %v11394_v52 = vpack.c.bf16 %v400_v57, %v397_v24  ;;  %v11396_v53 = vsub.f32 %v116_v6, %v397_v24 }
  0x4a   :  { %9609 = vmatpush3.bf16.msra.mxu1 %v9608_v18  ;;  %v547_v33 = vsub.f32 %v11336_v5, %v15478_v34  ;;  %v554_v0 = vsub.f32 %v11347_v30, %v15480_v3  ;;  %v451_v47 = vand.u32 4294901760, %v134_v9  ;;  %v454_v29 = vand.u32 4294901760, %v135_v54 }
  0x4b   :  { %15966 = vst [vmem:[#allocation12_spill] sm:$0xff] %v11394_v52  ;;  %v9610_v36 = vpack.c.bf16 %v667_v13, %v660_v59  ;;  %9589 = vmatpush3.bf16.msra.mxu0 %v11394_v52  ;;  %v15484_v8 = vand.u32 4294901760, %v11351_v51  ;;  %v15485_v6 = vand.u32 4294901760, %v11360_v55  ;;  %v403_v24 = vand.u32 4294901760, %v118_v37 }
  0x4c   :  { %v11407_v19 = vsub.f32 %v117_v11, %v400_v57  ;;  %v548_v18 = vand.u32 4294901760, %v547_v33  ;;  %v555_v35 = vand.u32 4294901760, %v554_v0  ;;  %v11409_v34 = vpack.c.bf16 %v454_v29, %v451_v47 }
  0x4d   :  { %9611 = vmatprep.subr.bf16.mxu1 %v9610_v36  ;;  %v11411_v44 = vsub.f32 %v134_v9, %v451_v47  ;;  %v673_v59 = vsub.f32 %v11351_v51, %v15484_v8  ;;  %v680_v13 = vsub.f32 %v11360_v55, %v15485_v6  ;;  %v406_v3 = vand.u32 4294901760, %v119_v1  ;;  %v40_v9 = vld [vmem:[#allocation2] sm:$0xff] }
  0x4e   :  { %15967 = vst [vmem:[#allocation13_spill] sm:$0xff] %v11409_v34  ;;  %v9612_v52 = vpack.c.bf16 %v555_v35, %v548_v18  ;;  %9591 = vmatprep.subr.bf16.mxu0 %v11409_v34  ;;  %v11420_v11 = vsub.f32 %v135_v54, %v454_v29  ;;  %v15489_v57 = vand.u32 4294901760, %v11366_v61  ;;  %v15488_v36 = vand.u32 4294901760, %v11377_v56 }
  0x4f   :  { %v674_v33 = vand.u32 4294901760, %v673_v59  ;;  %v681_v0 = vand.u32 4294901760, %v680_v13  ;;  %v11424_v47 = vpack.c.bf16 %v406_v3, %v403_v24  ;;  %v11426_v8 = vsub.f32 %v118_v37, %v403_v24 }
  0x50   :  { %9613 = vmatpush3.bf16.msra.mxu1 %v9612_v52  ;;  %v561_v35 = vsub.f32 %v11366_v61, %v15489_v57  ;;  %v568_v54 = vsub.f32 %v11377_v56, %v15488_v36  ;;  %v73_v29 = vmul.f32 %v41_v41, %v41_v41  ;;  %v15492_v18 = vand.u32 4294901760, %v11381_v10 }
  0x51   :  { %15968 = vst [vmem:[#allocation14_spill] sm:$0xff] %v11424_v47  ;;  %v9614_v6 = vpack.c.bf16 %v681_v0, %v674_v33  ;;  %9593 = vmatpush3.bf16.msra.mxu0 %v11424_v47  ;;  %v15493_v59 = vand.u32 4294901760, %v11390_v2  ;;  %v9626_v37 = vpack.c.bf16 %v11251_v32, %v11249_v31  ;;  %v72_v52 = vmul.f32 %v40_v9, %v40_v9 }
  0x52   :  { %v562_v24 = vand.u32 4294901760, %v561_v35  ;;  %v569_v13 = vand.u32 4294901760, %v568_v54  ;;  %v11439_v34 = vand.u32 4294901760, %v73_v29  ;;  %v687_v36 = vsub.f32 %v11381_v10, %v15492_v18 }
  0x53   :  { %9615 = vmatprep.subr.bf16.mxu1 %v9614_v6  ;;  %v694_v41 = vsub.f32 %v11390_v2, %v15493_v59  ;;  %9627 = vmatprep.subr.bf16.mxu0 %v9626_v37  ;;  %v11447_v33 = vand.u32 4294901760, %v72_v52  ;;  %v15495_v0 = vand.u32 4294901760, %v11396_v53  ;;  %v15494_v9 = vand.u32 4294901760, %v11407_v19 }
  0x54   :  { %15969 = vst [vmem:[#allocation15_spill] sm:$0xff] %v11439_v34  ;;  %v11451_v35 = vsub.f32 %v119_v1, %v406_v3  ;;  %v9616_v54 = vpack.c.bf16 %v569_v13, %v562_v24  ;;  %v11454_v57 = vsub.f32 %v73_v29, %v11439_v34  ;;  %v688_v47 = vand.u32 4294901760, %v687_v36  ;;  %712 = vmatprep.mubr.f32.mxu1 %v11439_v34 }
  0x55   :  { %v695_v6 = vand.u32 4294901760, %v694_v41  ;;  %v11458_v18 = vsub.f32 %v72_v52, %v11447_v33  ;;  %v575_v37 = vsub.f32 %v11396_v53, %v15495_v0  ;;  %v582_v1 = vsub.f32 %v11407_v19, %v15494_v9 }
  0x56   :  { %9617 = vmatpush3.bf16.msra.mxu1 %v9616_v54  ;;  %v15496_v3 = vand.u32 4294901760, %v11454_v57  ;;  %v15499_v29 = vand.u32 4294901760, %v11411_v44  ;;  %v15500_v36 = vand.u32 4294901760, %v11420_v11  ;;  %v588_v0 = vand.u32 4294901760, %v11426_v8 }
  0x57   :  { %15970 = vst [vmem:[#allocation16_spill] sm:$0xff] %v11458_v18  ;;  %v9618_v24 = vpack.c.bf16 %v695_v6, %v688_v47  ;;  %v15503_v13 = vand.u32 4294901760, %v11458_v18  ;;  %v576_v52 = vand.u32 4294901760, %v575_v37  ;;  %v583_v41 = vand.u32 4294901760, %v582_v1 }
  0x58   :  { %v459_v59 = vsub.f32 %v11454_v57, %v15496_v3  ;;  %v701_v9 = vsub.f32 %v11411_v44, %v15499_v29  ;;  %v708_v54 = vsub.f32 %v11420_v11, %v15500_v36  ;;  %v9628_v37 = vpack.c.bf16 %v11235_v21, %v11231_v15 }
  0x59   :  { %9619 = vmatprep.subr.bf16.mxu1 %v9618_v24  ;;  %v465_v47 = vsub.f32 %v11458_v18, %v15503_v13  ;;  %v9620_v6 = vpack.c.bf16 %v583_v41, %v576_v52  ;;  %v15506_v1 = vand.u32 4294901760, %v11451_v35  ;;  %v589_v36 = vsub.f32 %v11426_v8, %v588_v0  ;;  %v57_v18 = vld [vmem:[#allocation2 + $0x88] sm:$0xff] }
  0x5a   :  { %v460_v3 = vand.u32 4294901760, %v459_v59  ;;  %v702_v34 = vand.u32 4294901760, %v701_v9  ;;  %v709_v29 = vand.u32 4294901760, %v708_v54  ;;  %v9630_v24 = vpack.c.bf16 %v11242_v26, %v11240_v25  ;;  %v56_v59 = vld [vmem:[#allocation2 + $0x80] sm:$0xff] }
  0x5b   :  { %v466_v7 = vand.u32 4294901760, %v465_v47  ;;  %9621 = vmatpush3.bf16.msra.mxu1 %v9620_v6  ;;  %v596_v52 = vsub.f32 %v11451_v35, %v15506_v1  ;;  %v590_v13 = vand.u32 4294901760, %v589_v36  ;;  %v9632_v54 = vpack.c.bf16 %v11256_v38, %v11246_v28 }
  0x5c   :  { %461 = vmatprep.mubr.f32.mxu0 %v460_v3  ;;  %v9622_v41 = vpack.c.bf16 %v709_v29, %v702_v34  ;;  %v9634_v47 = vpack.c.bf16 %v11263_v43, %v11260_v40  ;;  %v9636_v1 = vpack.c.bf16 %v11286_v58, %v11268_v46  ;;  %v89_v3 = vmul.f32 %v57_v18, %v57_v18 }
  0x5d   :  { %467 = vmatmul.mubr.f32.vlgmr.msra.gmra.mrb[0].mxu0 %v466_v7  ;;  %v597_v9 = vand.u32 4294901760, %v596_v52  ;;  %v88_v34 = vmul.f32 %v56_v59, %v56_v59  ;;  %v9638_v29 = vpack.c.bf16 %v11302_v12, %v11290_v63  ;;  %v15971_v7 = vand.u32 4294901760, %v11249_v31 }
  0x5e   :  { %9629 = vmatpush3.bf16.msra.mxu0 %v9628_v37  ;;  %9623 = vmatprep.subr.bf16.mxu1 %v9622_v41  ;;  %v15972_v36 = vand.u32 4294901760, %v11251_v32  ;;  %v15973_v52 = vand.u32 4294901760, %v11231_v15  ;;  %v15974_v41 = vand.u32 4294901760, %v11235_v21  ;;  %v15976_v18 = vand.u32 4294901760, %v11242_v26 }
  0x5f   :  { %9631 = vmatprep.subr.bf16.mxu0 %v9630_v24  ;;  %v9624_v6 = vpack.c.bf16 %v597_v9, %v590_v13  ;;  %v15975_v13 = vand.u32 4294901760, %v11240_v25  ;;  %v11520_v9 = vand.u32 4294901760, %v89_v3  ;;  %v11522_v31 = vand.u32 4294901760, %v88_v34 }
  0x60   :  { %v11506_v37 = vpack.c.bf16 %v15972_v36, %v15971_v7  ;;  %v11512_v24 = vpack.c.bf16 %v15974_v41, %v15973_v52  ;;  %v15977_v32 = vand.u32 4294901760, %v11246_v28  ;;  %v15978_v7 = vand.u32 4294901760, %v11256_v38 }
  0x61   :  { %v11518_v59 = vpack.c.bf16 %v15976_v18, %v15975_v13  ;;  %9625 = vmatpush3.bf16.msra.mxu1 %v9624_v6  ;;  %v15979_v21 = vand.u32 4294901760, %v11260_v40  ;;  %v15980_v36 = vand.u32 4294901760, %v11263_v43  ;;  %v15981_v26 = vand.u32 4294901760, %v11268_v46 }
  0x62   :  { %v11528_v15 = vpack.c.bf16 %v15978_v7, %v15977_v32  ;;  %9633 = vmatpush3.bf16.msra.mxu0 %v9632_v54  ;;  %9659 = vmatprep.subr.bf16.mxu1 %v11229_v14  ;;  %v15982_v6 = vand.u32 4294901760, %v11286_v58  ;;  %v15983_v28 = vand.u32 4294901760, %v11290_v63  ;;  %v15984_v38 = vand.u32 4294901760, %v11302_v12 }
  0x63   :  { %v11534_v25 = vpack.c.bf16 %v15980_v36, %v15979_v21  ;;  %v15985_v40 = vand.u32 4294901760, %v11306_v17  ;;  %v15986_v43 = vand.u32 4294901760, %v11317_v42  ;;  %9635 = vmatprep.subr.bf16.mxu0 %v9634_v47  ;;  %v11556_v54 = vsub.f32 %v89_v3, %v11520_v9 }
  0x64   :  { %v11541_v52 = vpack.c.bf16 %v15982_v6, %v15981_v26  ;;  %v11547_v41 = vpack.c.bf16 %v15984_v38, %v15983_v28  ;;  %v11559_v46 = vsub.f32 %v88_v34, %v11522_v31  ;;  %v15987_v58 = vand.u32 4294901760, %v11321_v50  ;;  %714 = vmatmul.mubr.f32.vlgmr.msra.gmra.mrb[0].mxu1 %v11447_v33 }
  0x65   :  { %v11553_v13 = vpack.c.bf16 %v15986_v43, %v15985_v40  ;;  %v15988_v63 = vand.u32 4294901760, %v11330_v60  ;;  %v15989_v18 = vand.u32 4294901760, %v11336_v5  ;;  %v15990_v32 = vand.u32 4294901760, %v11347_v30  ;;  %9661 = vmatpush3.bf16.msra.mxu1 %v11233_v20  ;;  %719 = vmatprep.mubr.f32.mxu1 %v11520_v9 }
  0x66   :  { %v15991_v47 = vand.u32 4294901760, %v11351_v51  ;;  %v15992_v3 = vand.u32 4294901760, %v11360_v55  ;;  %v15993_v21 = vand.u32 4294901760, %v11366_v61  ;;  %v15994_v36 = vand.u32 4294901760, %v11377_v56  ;;  %9637 = vmatpush3.bf16.msra.mxu0 %v9636_v1  ;;  %9663 = vmatprep.subr.bf16.mxu1 %v11237_v22 }
  0x67   :  { %v11565_v12 = vpack.c.bf16 %v15988_v63, %v15987_v58  ;;  %v11571_v7 = vpack.c.bf16 %v15990_v32, %v15989_v18  ;;  %v15995_v6 = vand.u32 4294901760, %v11396_v53  ;;  %v15996_v28 = vand.u32 4294901760, %v11407_v19  ;;  %9639 = vmatprep.subr.bf16.mxu0 %v9638_v29  ;;  %v15999_v29 = vld [vmem:[#allocation16_spill] sm:$0xff] }
  0x68   :  { %v11578_v34 = vpack.c.bf16 %v15992_v3, %v15991_v47  ;;  %v11584_v26 = vpack.c.bf16 %v15994_v36, %v15993_v21  ;;  %v473_v40 = vand.u32 4294901760, %v11556_v54  ;;  %v479_v43 = vand.u32 4294901760, %v11559_v46  ;;  %721 = vmatmul.mubr.f32.gmra.mrb[2].mxu1 %v11522_v31  ;;  %v16000_v3 = vld [vmem:[#allocation12_spill] sm:$0xff] }
  0x69   :  { %v11590_v38 = vpack.c.bf16 %v15996_v28, %v15995_v6  ;;  %v9640_v58 = vpack.c.bf16 %v11317_v42, %v11306_v17  ;;  %v9642_v63 = vpack.c.bf16 %v11330_v60, %v11321_v50  ;;  %9665 = vmatpush3.bf16.msra.mxu1 %v11244_v27  ;;  %v15997_v17 = vand.u32 4294901760, %v11454_v57 }
  0x6a   :  { %v474_v18 = vsub.f32 %v11556_v54, %v473_v40  ;;  %v480_v32 = vsub.f32 %v11559_v46, %v479_v43  ;;  %9667 = vmatprep.subr.bf16.mxu1 %v11258_v39  ;;  %v9644_v42 = vpack.c.bf16 %v11347_v30, %v11336_v5  ;;  %v9646_v50 = vpack.c.bf16 %v11360_v55, %v11351_v51  ;;  %v15998_v55 = vld [vmem:[#allocation11_spill] sm:$0xff] }
  0x6b   :  { %972 = vmatprep.mubr.f32.mxu1 %v15997_v17  ;;  %9641 = vmatpush3.bf16.msra.mxu0 %v9640_v58  ;;  %v9648_v60 = vpack.c.bf16 %v11377_v56, %v11366_v61  ;;  %v9650_v5 = vpack.c.bf16 %v11390_v2, %v11381_v10  ;;  %v9652_v30 = vpack.c.bf16 %v11407_v19, %v11396_v53  ;;  %v152_v56 = vld [vmem:[#allocation5 + $0x180] sm:$0xff]  ;;  %v153_v53 = vld [vmem:[#allocation5 + $0x188] sm:$0xff] }
  0x6c   :  { %v475_v1 = vand.u32 4294901760, %v474_v18  ;;  %v481_v47 = vand.u32 4294901760, %v480_v32  ;;  %9643 = vmatprep.subr.bf16.mxu0 %v9642_v63  ;;  %v9654_v51 = vpack.c.bf16 %v11420_v11, %v11411_v44  ;;  %v9656_v61 = vpack.c.bf16 %v11451_v35, %v11426_v8  ;;  %v136_v19 = vld [vmem:[#allocation5 + $0x100] sm:$0xff]  ;;  %v154_v63 = vld [vmem:[#allocation5 + $0x190] sm:$0xff]  ;;  %v16002_v18 = vld [vmem:[#allocation14_spill] sm:$0xff] }
  0x6d   :  { %9669 = vmatpush3.bf16.msra.mxu1 %v11266_v45  ;;  %v1327_v21 = vand.u32 4294901760, %v152_v56  ;;  %v1330_v36 = vand.u32 4294901760, %v153_v53  ;;  %v1279_v6 = vand.u32 4294901760, %v136_v19  ;;  %v16001_v58 = vld [vmem:[#allocation13_spill] sm:$0xff]  ;;  %v141_v8 = vld [vmem:[#allocation5 + $0x128] sm:$0xff] }
  0x6e   :  { %476 = vmatprep.mubr.f32.mxu0 %v475_v1  ;;  %9671 = vmatprep.subr.bf16.mxu1 %v11288_v62 }
  0x6f   :  { %482 = vmatmul.mubr.f32.gmra.mrb[2].mxu0 %v481_v47  ;;  %v11644_v32 = vsub.f32 %v152_v56, %v1327_v21  ;;  %v11646_v1 = vsub.f32 %v153_v53, %v1330_v36  ;;  %v138_v47 = vld [vmem:[#allocation5 + $0x110] sm:$0xff]  ;;  %v11650_v17 = vsub.f32 %v136_v19, %v1279_v6  ;;  %v157_v56 = vld [vmem:[#allocation5 + $0x1a8] sm:$0xff]  ;;  %v16007_v53 = vand.u32 4294901760, %v11411_v44  ;;  %v140_v44 = vld [vmem:[#allocation5 + $0x120] sm:$0xff] }
  0x70   :  { %856 = vmatprep.mubr.f32.mxu0 %v11454_v57  ;;  %9645 = vmatpush3.bf16.msra.mxu0 %v9644_v42  ;;  %v137_v57 = vld [vmem:[#allocation5 + $0x108] sm:$0xff]  ;;  %v16008_v19 = vand.u32 4294901760, %v11420_v11 }
  0x71   :  { %9647 = vmatprep.subr.bf16.mxu0 %v9646_v50  ;;  %9673 = vmatpush3.bf16.msra.mxu1 %v11304_v16  ;;  %v1282_v28 = vand.u32 4294901760, %v137_v57  ;;  %v16003_v50 = vld [vmem:[#allocation15_spill] sm:$0xff]  ;;  %v15508_v11 = vand.u32 4294901760, %v11650_v17 }
  0x72   :  { %9675 = vmatprep.subr.bf16.mxu1 %v11319_v49 }
  0x73   :  { %v11652_v42 = vsub.f32 %v137_v57, %v1282_v28  ;;  %v11671_v57 = vpack.c.bf16 %v16008_v19, %v16007_v53 }
  0x74   :  { %9649 = vmatpush3.bf16.msra.mxu0 %v9648_v60 }
  0x75   :  { %9651 = vmatprep.subr.bf16.mxu0 %v9650_v5  ;;  %9677 = vmatpush3.bf16.msra.mxu1 %v11334_v4  ;;  %v16004_v5 = vand.u32 4294901760, %v15999_v29 }
  0x76   :  { %9679 = vmatprep.subr.bf16.mxu1 %v11349_v48 }
  0x78   :  { %9653 = vmatpush3.bf16.msra.mxu0 %v9652_v30  ;;  %v1285_v30 = vand.u32 4294901760, %v138_v47 }
  0x79   :  { %9655 = vmatprep.subr.bf16.mxu0 %v9654_v51  ;;  %9681 = vmatpush3.bf16.msra.mxu1 %v11364_v23 }
  0x7a   :  { %9683 = vmatprep.subr.bf16.mxu1 %v15998_v55 }
  0x7c   :  { %9657 = vmatpush3.bf16.msra.mxu0 %v9656_v61  ;;  %v156_v61 = vld [vmem:[#allocation5 + $0x1a0] sm:$0xff] }
  0x7d   :  { %9691 = vmatprep.subr.bf16.mxu0 %v11506_v37  ;;  %9685 = vmatpush3.bf16.msra.mxu1 %v16000_v3  ;;  %v155_v37 = vld [vmem:[#allocation5 + $0x198] sm:$0xff] }
  0x7e   :  { %9687 = vmatprep.subr.bf16.mxu1 %v16001_v58  ;;  %v1336_v60 = vand.u32 4294901760, %v155_v37 }
  0x7f   :  { %859 = vmatmul.mubr.f32.vlgmr.msra.gmra.mrb[4].mxu0 %v15999_v29  ;;  %v15514_v29 = vand.u32 4294901760, %v11644_v32 }
  0x80   :  { %9693 = vmatpush3.bf16.msra.mxu0 %v11512_v24  ;;  %865 = vmatprep.mubr.f32.mxu0 %v11556_v54  ;;  %v139_v24 = vld [vmem:[#allocation5 + $0x118] sm:$0xff]  ;;  %v15507_v54 = vand.u32 4294901760, %v11652_v42 }
  0x81   :  { %9695 = vmatprep.subr.bf16.mxu0 %v11518_v59  ;;  %9689 = vmatpush3.bf16.msra.mxu1 %v16002_v18  ;;  %v1333_v59 = vand.u32 4294901760, %v154_v63  ;;  %v1288_v51 = vand.u32 4294901760, %v139_v24 }
  0x82   :  { %9723 = vmatprep.subr.bf16.mxu1 %v11229_v14  ;;  %v16005_v14 = vand.u32 4294901760, %v11381_v10 }
  0x83   :  { %868 = vmatmul.mubr.f32.gmra.mrb[6].mxu0 %v11559_v46 }
  0x84   :  { %9697 = vmatpush3.bf16.msra.mxu0 %v11528_v15  ;;  %1153 = vmatprep.mubr.f32.mxu0 %v16003_v50  ;;  %v16006_v15 = vand.u32 4294901760, %v11390_v2  ;;  %v11683_v2 = vsub.f32 %v154_v63, %v1333_v59  ;;  %v11698_v63 = vsub.f32 %v138_v47, %v1285_v30  ;;  %v159_v47 = vld [vmem:[#allocation5 + $0x1b8] sm:$0xff] }
  0x85   :  { %9699 = vmatprep.subr.bf16.mxu0 %v11534_v25  ;;  %976 = vmatmul.mubr.f32.vlgmr.msra.gmra.mrb[4].mxu1 %v16004_v5  ;;  %v15509_v5 = vand.u32 4294901760, %v11646_v1 }
  0x86   :  { %9725 = vmatpush3.bf16.msra.mxu1 %v11233_v20  ;;  %983 = vmatprep.mubr.f32.mxu1 %v473_v40  ;;  %v11665_v25 = vpack.c.bf16 %v16006_v15, %v16005_v14  ;;  %v16009_v20 = vand.u32 4294901760, %v11451_v35  ;;  %v11688_v40 = vpack.c.bf16 %v1330_v36, %v1327_v21  ;;  %v1342_v14 = vand.u32 4294901760, %v157_v56  ;;  %v158_v36 = vld [vmem:[#allocation5 + $0x1b0] sm:$0xff] }
  0x87   :  { %9727 = vmatprep.subr.bf16.mxu1 %v11237_v22  ;;  %v1339_v22 = vand.u32 4294901760, %v156_v61  ;;  %v11696_v35 = vpack.c.bf16 %v1336_v60, %v1333_v59  ;;  %v11700_v15 = vsub.f32 %v139_v24, %v1288_v51  ;;  %v1521_v21 = vsub.f32 %v11644_v32, %v15514_v29  ;;  %v145_v29 = vld [vmem:[#allocation5 + $0x148] sm:$0xff] }
  0x88   :  { %9701 = vmatpush3.bf16.msra.mxu0 %v11541_v52  ;;  %v11681_v10 = vpack.c.bf16 %v16009_v20, %v588_v0  ;;  %v11690_v52 = vsub.f32 %v155_v37, %v1336_v60  ;;  %v11694_v0 = vpack.c.bf16 %v1282_v28, %v1279_v6  ;;  %v1528_v46 = vsub.f32 %v11646_v1, %v15509_v5  ;;  %v43_v6 = vld [vmem:[#allocation2 + $0x18] sm:$0xff] }
  0x89   :  { %9703 = vmatprep.subr.bf16.mxu0 %v11547_v41  ;;  %987 = vmatmul.mubr.f32.gmra.mrb[6].mxu1 %v479_v43  ;;  %v11703_v41 = vpack.c.bf16 %v1288_v51, %v1285_v30  ;;  %v1291_v43 = vand.u32 4294901760, %v140_v44  ;;  %v1409_v28 = vsub.f32 %v11650_v17, %v15508_v11  ;;  %v1416_v37 = vsub.f32 %v11652_v42, %v15507_v54  ;;  %v142_v30 = vld [vmem:[#allocation5 + $0x130] sm:$0xff]  ;;  %v143_v51 = vld [vmem:[#allocation5 + $0x138] sm:$0xff] }
  0x8a   :  { %16010 = vst [vmem:[#allocation11_spill] sm:$0xff] %v11694_v0  ;;  %9729 = vmatpush3.bf16.msra.mxu1 %v11244_v27  ;;  %1264 = vmatprep.mubr.f32.mxu1 %v16003_v50  ;;  %v1294_v27 = vand.u32 4294901760, %v141_v8  ;;  %v15513_v24 = vand.u32 4294901760, %v11683_v2  ;;  %v11722_v59 = vpack.c.bf16 %v1342_v14, %v1339_v22  ;;  %v11724_v50 = vsub.f32 %v156_v61, %v1339_v22 }
  0x8b   :  { %9731 = vmatprep.subr.bf16.mxu1 %v11258_v39  ;;  %v15510_v39 = vand.u32 4294901760, %v11690_v52  ;;  %v1345_v60 = vand.u32 4294901760, %v158_v36  ;;  %v15511_v53 = vand.u32 4294901760, %v11698_v63  ;;  %v15512_v19 = vand.u32 4294901760, %v11700_v15 }
  0x8c   :  { %9705 = vmatpush3.bf16.msra.mxu0 %v11553_v13  ;;  %v11726_v13 = vsub.f32 %v157_v56, %v1342_v14  ;;  %v75_v20 = vmul.f32 %v43_v6, %v43_v6  ;;  %v1522_v54 = vand.u32 4294901760, %v1521_v21  ;;  %v11732_v11 = vsub.f32 %v140_v44, %v1291_v43 }
  0x8d   :  { %9707 = vmatprep.subr.bf16.mxu0 %v11565_v12  ;;  %v1529_v12 = vand.u32 4294901760, %v1528_v46  ;;  %v1348_v61 = vand.u32 4294901760, %v159_v47  ;;  %v11736_v56 = vpack.c.bf16 %v1294_v27, %v1291_v43  ;;  %v1410_v22 = vand.u32 4294901760, %v1409_v28  ;;  %v160_v46 = vld [vmem:[#allocation5 + $0x1c0] sm:$0xff]  ;;  %v161_v28 = vld [vmem:[#allocation5 + $0x1c8] sm:$0xff] }
  0x8e   :  { %9733 = vmatpush3.bf16.msra.mxu1 %v11266_v45  ;;  %v1417_v14 = vand.u32 4294901760, %v1416_v37  ;;  %v1535_v5 = vsub.f32 %v11683_v2, %v15513_v24  ;;  %v1542_v45 = vsub.f32 %v11690_v52, %v15510_v39  ;;  %v1297_v44 = vand.u32 4294901760, %v142_v30 }
  0x8f   :  { %9735 = vmatprep.subr.bf16.mxu1 %v11288_v62  ;;  %16011 = vst [vmem:[#allocation16_spill] sm:$0xff] %v11736_v56  ;;  %v1300_v21 = vand.u32 4294901760, %v143_v51  ;;  %v11747_v62 = vsub.f32 %v141_v8, %v1294_v27  ;;  %v11749_v43 = vsub.f32 %v158_v36, %v1345_v60  ;;  %v1423_v6 = vsub.f32 %v11698_v63, %v15511_v53 }
  0x90   :  { %9709 = vmatpush3.bf16.msra.mxu0 %v11571_v7  ;;  %v11745_v7 = vand.u32 4294901760, %v75_v20  ;;  %v11758_v37 = vpack.c.bf16 %v1529_v12, %v1522_v54  ;;  %v11760_v39 = vpack.c.bf16 %v1348_v61, %v1345_v60  ;;  %v11766_v27 = vpack.c.bf16 %v1417_v14, %v1410_v22  ;;  %v144_v12 = vld [vmem:[#allocation5 + $0x140] sm:$0xff] }
  0x91   :  { %9711 = vmatprep.subr.bf16.mxu0 %v11578_v34  ;;  %16013 = vst [vmem:[#allocation13_spill] sm:$0xff] %v11749_v43  ;;  %v1430_v34 = vsub.f32 %v11700_v15, %v15512_v19  ;;  %v11768_v53 = vsub.f32 %v159_v47, %v1348_v61  ;;  %v1536_v19 = vand.u32 4294901760, %v1535_v5  ;;  %v1351_v24 = vand.u32 4294901760, %v160_v46 }
  0x92   :  { %16012 = vst [vmem:[#allocation12_spill] sm:$0xff] %v11745_v7  ;;  %9737 = vmatpush3.bf16.msra.mxu1 %v11304_v16  ;;  %16014 = vst [vmem:[#allocation14_spill] sm:$0xff] %v11760_v39  ;;  %v1543_v16 = vand.u32 4294901760, %v1542_v45  ;;  %v11771_v54 = vpack.c.bf16 %v1300_v21, %v1297_v44  ;;  %v1354_v60 = vand.u32 4294901760, %v161_v28  ;;  %v11774_v36 = vsub.f32 %v75_v20, %v11745_v7 }
  0x93   :  { %9739 = vmatprep.subr.bf16.mxu1 %v11319_v49  ;;  %16015 = vst [vmem:[#allocation15_spill] sm:$0xff] %v11768_v53  ;;  %v1431_v8 = vand.u32 4294901760, %v1430_v34  ;;  %v15516_v49 = vand.u32 4294901760, %v11732_v11  ;;  %v15515_v47 = vand.u32 4294901760, %v11747_v62  ;;  %v11779_v5 = vsub.f32 %v142_v30, %v1297_v44  ;;  %v162_v34 = vld [vmem:[#allocation5 + $0x1d0] sm:$0xff] }
  0x94   :  { %9713 = vmatpush3.bf16.msra.mxu0 %v11584_v26  ;;  %16016 = vst [vmem:[#allocation17_spill] sm:$0xff] %v11771_v54  ;;  %16017 = vst [vmem:[#allocation18_spill] sm:$0xff] %v11774_v36  ;;  %v1424_v26 = vand.u32 4294901760, %v1423_v6  ;;  %v16020_v61 = vand.u32 4294901760, %v11724_v50  ;;  %v16021_v14 = vand.u32 4294901760, %v11726_v13  ;;  %v1303_v45 = vand.u32 4294901760, %v144_v12 }
  0x95   :  { %9715 = vmatprep.subr.bf16.mxu0 %v11665_v25  ;;  %16018 = vst [vmem:[#allocation19_spill] sm:$0xff] %v11779_v5  ;;  %v11781_v25 = vsub.f32 %v143_v51, %v1300_v21  ;;  %v1306_v6 = vand.u32 4294901760, %v145_v29  ;;  %v15520_v30 = vand.u32 4294901760, %v11768_v53  ;;  %v11794_v51 = vpack.c.bf16 %v1543_v16, %v1536_v19  ;;  %v163_v19 = vld [vmem:[#allocation5 + $0x1d8] sm:$0xff] }
  0x96   :  { %9741 = vmatpush3.bf16.msra.mxu1 %v11334_v4  ;;  %v1549_v22 = vsub.f32 %v11724_v50, %v16020_v61  ;;  %v1556_v20 = vsub.f32 %v11726_v13, %v16021_v14  ;;  %v15517_v4 = vand.u32 4294901760, %v11749_v43  ;;  %v11796_v44 = vpack.c.bf16 %v1354_v60, %v1351_v24 }
  0x97   :  { %16019 = vst [vmem:[#allocation20_spill] sm:$0xff] %v11781_v25  ;;  %9743 = vmatprep.subr.bf16.mxu1 %v11349_v48  ;;  %v11798_v21 = vsub.f32 %v160_v46, %v1351_v24  ;;  %v15523_v61 = vand.u32 4294901760, %v11774_v36  ;;  %v11803_v48 = vsub.f32 %v161_v28, %v1354_v60  ;;  %v1437_v14 = vsub.f32 %v11732_v11, %v15516_v49 }
  0x98   :  { %9717 = vmatpush3.bf16.msra.mxu0 %v11590_v38  ;;  %16022 = vst [vmem:[#allocation21_spill] sm:$0xff] %v11796_v44  ;;  %v11801_v38 = vpack.c.bf16 %v1431_v8, %v1424_v26  ;;  %v1550_v16 = vand.u32 4294901760, %v1549_v22  ;;  %v1357_v24 = vand.u32 4294901760, %v162_v34  ;;  %v1557_v28 = vand.u32 4294901760, %v1556_v20  ;;  %v146_v22 = vld [vmem:[#allocation5 + $0x150] sm:$0xff] }
  0x99   :  { %9719 = vmatprep.subr.bf16.mxu0 %v11671_v57  ;;  %16023 = vst [vmem:[#allocation22_spill] sm:$0xff] %v11803_v48  ;;  %v1444_v57 = vsub.f32 %v11747_v62, %v15515_v47  ;;  %v11816_v60 = vpack.c.bf16 %v1306_v6, %v1303_v45  ;;  %v1563_v26 = vsub.f32 %v11749_v43, %v15517_v4  ;;  %v147_v47 = vld [vmem:[#allocation5 + $0x158] sm:$0xff]  ;;  %v1438_v8 = vand.u32 4294901760, %v1437_v14  ;;  %v164_v4 = vld [vmem:[#allocation5 + $0x1e0] sm:$0xff] }
  0x9a   :  { %9745 = vmatpush3.bf16.msra.mxu1 %v11364_v23  ;;  %v1570_v23 = vsub.f32 %v11768_v53, %v15520_v30  ;;  %v11825_v49 = vsub.f32 %v144_v12, %v1303_v45  ;;  %v1377_v20 = vsub.f32 %v11774_v36, %v15523_v61  ;;  %v1309_v12 = vand.u32 4294901760, %v146_v22 }
  0x9b   :  { %9747 = vmatprep.subr.bf16.mxu1 %v15998_v55  ;;  %16024 = vst [vmem:[#allocation23_spill] sm:$0xff] %v11816_v60  ;;  %v1360_v55 = vand.u32 4294901760, %v163_v19  ;;  %v1445_v46 = vand.u32 4294901760, %v1444_v57  ;;  %v1312_v45 = vand.u32 4294901760, %v147_v47  ;;  %v16026_v53 = vand.u32 4294901760, %v11781_v25  ;;  %v165_v57 = vld [vmem:[#allocation5 + $0x1e8] sm:$0xff] }
  0x9c   :  { %9721 = vmatpush3.bf16.msra.mxu0 %v11681_v10  ;;  %v11827_v10 = vsub.f32 %v145_v29, %v1306_v6  ;;  %v16025_v29 = vand.u32 4294901760, %v11779_v5  ;;  %v11844_v61 = vpack.c.bf16 %v1557_v28, %v1550_v16  ;;  %v11846_v30 = vsub.f32 %v162_v34, %v1357_v24 }
  0x9d   :  { %9755 = vmatprep.subr.bf16.mxu0 %v11688_v40  ;;  %v1458_v14 = vsub.f32 %v11781_v25, %v16026_v53  ;;  %v1571_v43 = vand.u32 4294901760, %v1570_v23  ;;  %v1363_v53 = vand.u32 4294901760, %v164_v4  ;;  %v11854_v25 = vld [vmem:[#allocation5 + $0x160] sm:$0xff]  ;;  %v1378_v36 = vand.u32 4294901760, %v1377_v20 }
  0x9e   :  { %9749 = vmatpush3.bf16.msra.mxu1 %v16000_v3  ;;  %v1451_v6 = vsub.f32 %v11779_v5, %v16025_v29  ;;  %v1564_v3 = vand.u32 4294901760, %v1563_v26  ;;  %v11850_v29 = vpack.c.bf16 %v1360_v55, %v1357_v24  ;;  %v11852_v5 = vsub.f32 %v163_v19, %v1360_v55 }
  0x9f   :  { %1155 = vmatmul.mubr.f32.vlgmr.msra.gmra.mrb[8].mxu0 %v11447_v33  ;;  %9751 = vmatprep.subr.bf16.mxu1 %v16001_v58  ;;  %v11858_v16 = vpack.c.bf16 %v1445_v46, %v1438_v8  ;;  %v1366_v34 = vand.u32 4294901760, %v165_v57  ;;  %v16028_v28 = vand.u32 4294901760, %v11798_v21  ;;  %v16029_v58 = vand.u32 4294901760, %v11803_v48  ;;  %v11872_v8 = vld [vmem:[#allocation5 + $0x1f0] sm:$0xff] }
  0xa0   :  { %9757 = vmatpush3.bf16.msra.mxu0 %v11694_v0  ;;  %1160 = vmatprep.mubr.f32.mxu0 %v11520_v9  ;;  %16027 = vst [vmem:[#allocation24_spill] sm:$0xff] %v11850_v29  ;;  %v11856_v0 = vld [vmem:[#allocation5 + $0x168] sm:$0xff]  ;;  %v11868_v19 = vpack.c.bf16 %v1312_v45, %v1309_v12  ;;  %v11870_v23 = vsub.f32 %v146_v22, %v1309_v12  ;;  %v1452_v55 = vand.u32 4294901760, %v1451_v6  ;;  %v1459_v46 = vand.u32 4294901760, %v1458_v14 }
  0xa1   :  { %9759 = vmatprep.subr.bf16.mxu0 %v11696_v35  ;;  %v1577_v26 = vsub.f32 %v11798_v21, %v16028_v28  ;;  %v1584_v24 = vsub.f32 %v11803_v48, %v16029_v58  ;;  %v11876_v20 = vpack.c.bf16 %v1571_v43, %v1564_v3  ;;  %v11878_v28 = vsub.f32 %v147_v47, %v1312_v45  ;;  %v42_v48 = vld [vmem:[#allocation2 + $0x10] sm:$0xff]  ;;  %v59_v43 = vld [vmem:[#allocation2 + $0x98] sm:$0xff] }
  0xa2   :  { %9753 = vmatpush3.bf16.msra.mxu1 %v16002_v18  ;;  %v15534_v58 = vand.u32 4294901760, %v11854_v25  ;;  %v11883_v22 = vsub.f32 %v164_v4, %v1363_v53  ;;  %v15535_v12 = vand.u32 4294901760, %v11825_v49  ;;  %v15540_v14 = vand.u32 4294901760, %v11846_v30  ;;  %v11891_v3 = vld [vmem:[#allocation5 + $0x1f8] sm:$0xff] }
  0xa3   :  { %1162 = vmatmul.mubr.f32.gmra.mrb[10].mxu0 %v11522_v31  ;;  %9787 = vmatprep.subr.bf16.mxu1 %v11758_v37  ;;  %16030 = vst [vmem:[#allocation25_spill] sm:$0xff] %v11878_v28  ;;  %v11889_v37 = vpack.c.bf16 %v1366_v34, %v1363_v53  ;;  %v1578_v47 = vand.u32 4294901760, %v1577_v26  ;;  %v1585_v45 = vand.u32 4294901760, %v1584_v24  ;;  %v15541_v18 = vand.u32 4294901760, %v11872_v8  ;;  %v11913_v26 = vld [vmem:[#allocation5 + $0x170] sm:$0xff] }
  0xa4   :  { %9761 = vmatpush3.bf16.msra.mxu0 %v11703_v41  ;;  %16031 = vst [vmem:[#allocation26_spill] sm:$0xff] %v11883_v22  ;;  %1379 = vmatprep.mubr.f32.mxu0 %v1378_v36  ;;  %v11896_v4 = vpack.c.bf16 %v1459_v46, %v1452_v55  ;;  %v11898_v6 = vsub.f32 %v165_v57, %v1366_v34  ;;  %v16033_v53 = vand.u32 4294901760, %v11856_v0  ;;  %v11915_v57 = vld [vmem:[#allocation5 + $0x178] sm:$0xff]  ;;  %v58_v34 = vld [vmem:[#allocation2 + $0x90] sm:$0xff]  ;;  %v16034_v24 = vand.u32 4294901760, %v11827_v10 }
  0xa5   :  { %9763 = vmatprep.subr.bf16.mxu0 %v11722_v59  ;;  %1266 = vmatmul.mubr.f32.vlgmr.msra.gmra.mrb[8].mxu1 %v11447_v33  ;;  %v74_v36 = vmul.f32 %v42_v48, %v42_v48  ;;  %v11905_v33 = vsub.f32 %v11854_v25, %v15534_v58  ;;  %v91_v48 = vmul.f32 %v59_v43, %v59_v43  ;;  %v1372_v46 = vand.u32 4294901760, %v11891_v3 }
  0xa6   :  { %9789 = vmatpush3.bf16.msra.mxu1 %v11766_v27  ;;  %1271 = vmatprep.mubr.f32.mxu1 %v11520_v9  ;;  %16032 = vst [vmem:[#allocation27_spill] sm:$0xff] %v11898_v6  ;;  %v11910_v27 = vsub.f32 %v11856_v0, %v16033_v53  ;;  %v1472_v55 = vsub.f32 %v11827_v10, %v16034_v24 }
  0xa7   :  { %9791 = vmatprep.subr.bf16.mxu1 %v11794_v51  ;;  %v1465_v51 = vsub.f32 %v11825_v49, %v15535_v12  ;;  %v1591_v53 = vsub.f32 %v11846_v30, %v15540_v14  ;;  %v9802_v43 = vpack.c.bf16 %v1585_v45, %v1578_v47  ;;  %v11932_v58 = vsub.f32 %v11872_v8, %v15541_v18 }
  0xa8   :  { %9765 = vmatpush3.bf16.msra.mxu0 %v11736_v56  ;;  %v15544_v12 = vand.u32 4294901760, %v11870_v23  ;;  %v11939_v56 = vand.u32 4294901760, %v74_v36  ;;  %v90_v14 = vmul.f32 %v58_v34, %v58_v34  ;;  %v11949_v18 = vand.u32 4294901760, %v91_v48 }
  0xa9   :  { %9767 = vmatprep.subr.bf16.mxu0 %v11760_v39  ;;  %1273 = vmatmul.mubr.f32.gmra.mrb[10].mxu1 %v11522_v31  ;;  %v16035_v31 = vand.u32 4294901760, %v11852_v5  ;;  %v1466_v39 = vand.u32 4294901760, %v1465_v51  ;;  %v1473_v34 = vand.u32 4294901760, %v1472_v55  ;;  %v11953_v24 = vsub.f32 %v11891_v3, %v1372_v46 }
  0xaa   :  { %9793 = vmatpush3.bf16.msra.mxu1 %v11801_v38  ;;  %1630 = vmatprep.mubr.f32.mxu1 %v11745_v7  ;;  %16036 = vst [vmem:[#allocation28_spill] sm:$0xff] %v11949_v18  ;;  %v1592_v9 = vand.u32 4294901760, %v1591_v53  ;;  %v16038_v51 = vand.u32 4294901760, %v11913_v26  ;;  %v16039_v55 = vand.u32 4294901760, %v11915_v57  ;;  %v16041_v7 = vand.u32 4294901760, %v11883_v22 }
  0xab   :  { %9795 = vmatprep.subr.bf16.mxu1 %v11844_v61  ;;  %v1598_v47 = vsub.f32 %v11852_v5, %v16035_v31  ;;  %v1479_v61 = vsub.f32 %v11870_v23, %v15544_v12  ;;  %v16037_v31 = vand.u32 4294901760, %v11878_v28  ;;  %v11975_v12 = vsub.f32 %v74_v36, %v11939_v56 }
  0xac   :  { %9769 = vmatpush3.bf16.msra.mxu0 %v11771_v54  ;;  %v11967_v3 = vsub.f32 %v11913_v26, %v16038_v51  ;;  %v11972_v53 = vsub.f32 %v11915_v57, %v16039_v55  ;;  %v1605_v51 = vsub.f32 %v11883_v22, %v16041_v7  ;;  %v16042_v38 = vand.u32 4294901760, %v11898_v6 }
  0xad   :  { %9771 = vmatprep.subr.bf16.mxu0 %v11796_v44  ;;  %v1486_v45 = vsub.f32 %v11878_v28, %v16037_v31  ;;  %v11977_v31 = vand.u32 4294901760, %v90_v14  ;;  %v11988_v55 = vsub.f32 %v91_v48, %v11949_v18  ;;  %v16043_v36 = vand.u32 4294901760, %v11854_v25 }
  0xae   :  { %9797 = vmatpush3.bf16.msra.mxu1 %v11858_v16  ;;  %v1599_v16 = vand.u32 4294901760, %v1598_v47  ;;  %v1612_v44 = vsub.f32 %v11898_v6, %v16042_v38  ;;  %v15563_v47 = vand.u32 4294901760, %v11932_v58  ;;  %v15561_v7 = vand.u32 4294901760, %v11953_v24 }
  0xaf   :  { %16040 = vst [vmem:[#allocation29_spill] sm:$0xff] %v11977_v31  ;;  %9799 = vmatprep.subr.bf16.mxu1 %v11876_v20  ;;  %v9804_v20 = vpack.c.bf16 %v1473_v34, %v1466_v39  ;;  %v1480_v22 = vand.u32 4294901760, %v1479_v61  ;;  %v1487_v28 = vand.u32 4294901760, %v1486_v45  ;;  %v16045_v38 = vand.u32 4294901760, %v11905_v33 }
  0xb0   :  { %9773 = vmatpush3.bf16.msra.mxu0 %v11816_v60  ;;  %v16044_v60 = vand.u32 4294901760, %v11856_v0  ;;  %v16046_v6 = vand.u32 4294901760, %v11910_v27  ;;  %v15565_v0 = vand.u32 4294901760, %v11975_v12  ;;  %v12008_v39 = vsub.f32 %v90_v14, %v11977_v31 }
  0xb1   :  { %9775 = vmatprep.subr.bf16.mxu0 %v11850_v29  ;;  %v1493_v48 = vsub.f32 %v11905_v33, %v16045_v38  ;;  %v15560_v25 = vand.u32 4294901760, %v11967_v3  ;;  %v9806_v45 = vpack.c.bf16 %v1599_v16, %v1592_v9  ;;  %v1606_v34 = vand.u32 4294901760, %v1605_v51 }
  0xb2   :  { %v11995_v54 = vpack.c.bf16 %v16044_v60, %v16043_v36  ;;  %v1500_v29 = vsub.f32 %v11910_v27, %v16046_v6  ;;  %9801 = vmatpush3.bf16.msra.mxu1 %v11896_v4  ;;  %v15559_v60 = vand.u32 4294901760, %v11972_v53  ;;  %v1613_v61 = vand.u32 4294901760, %v1612_v44 }
  0xb3   :  { %9803 = vmatprep.subr.bf16.mxu1 %v9802_v43  ;;  %v15564_v36 = vand.u32 4294901760, %v11988_v55  ;;  %v16047_v6 = vand.u32 4294901760, %v11872_v8  ;;  %v1619_v14 = vsub.f32 %v11932_v58, %v15563_v47  ;;  %v1626_v38 = vsub.f32 %v11953_v24, %v15561_v7 }
  0xb4   :  { %9777 = vmatpush3.bf16.msra.mxu0 %v11868_v19  ;;  %v9808_v43 = vpack.c.bf16 %v1487_v28, %v1480_v22  ;;  %v1494_v9 = vand.u32 4294901760, %v1493_v48  ;;  %v1501_v16 = vand.u32 4294901760, %v1500_v29  ;;  %v1383_v44 = vsub.f32 %v11975_v12, %v15565_v0  ;;  %v185_v0 = vld [vmem:[#allocation5 + $0x288] sm:$0xff] }
  0xb5   :  { %9779 = vmatprep.subr.bf16.mxu0 %v11889_v37  ;;  %v12017_v4 = vpack.c.bf16 %v1372_v46, %v16047_v6  ;;  %v15562_v8 = vand.u32 4294901760, %v12008_v39  ;;  %v1507_v46 = vsub.f32 %v11967_v3, %v15560_v25  ;;  %v1514_v51 = vsub.f32 %v11972_v53, %v15559_v60 }
  0xb6   :  { %9805 = vmatpush3.bf16.msra.mxu1 %v9804_v20  ;;  %v16048_v29 = vand.u32 4294901760, %v11913_v26  ;;  %v16049_v28 = vand.u32 4294901760, %v11915_v57  ;;  %v9810_v20 = vpack.c.bf16 %v1613_v61, %v1606_v34  ;;  %v1392_v48 = vsub.f32 %v11988_v55, %v15564_v36 }
  0xb7   :  { %9807 = vmatprep.subr.bf16.mxu1 %v9806_v45  ;;  %v9818_v6 = vpack.c.bf16 %v11646_v1, %v11644_v32  ;;  %v1620_v60 = vand.u32 4294901760, %v1619_v14  ;;  %v1627_v25 = vand.u32 4294901760, %v1626_v38  ;;  %v9812_v7 = vpack.c.bf16 %v1501_v16, %v1494_v9 }
  0xb8   :  { %9781 = vmatpush3.bf16.msra.mxu0 %v11995_v54  ;;  %v12040_v22 = vpack.c.bf16 %v16049_v28, %v16048_v29  ;;  %v1384_v45 = vand.u32 4294901760, %v1383_v44  ;;  %v1398_v26 = vsub.f32 %v12008_v39, %v15562_v8  ;;  %v1508_v57 = vand.u32 4294901760, %v1507_v46  ;;  %v16052_v46 = vld [vmem:[#allocation18_spill] sm:$0xff] }
  0xb9   :  { %9783 = vmatprep.subr.bf16.mxu0 %v12017_v4  ;;  %v1515_v34 = vand.u32 4294901760, %v1514_v51  ;;  %v9820_v61 = vpack.c.bf16 %v11652_v42, %v11650_v17  ;;  %v1393_v29 = vand.u32 4294901760, %v1392_v48  ;;  %v9814_v28 = vpack.c.bf16 %v1627_v25, %v1620_v60  ;;  %v16050_v25 = vld [vmem:[#allocation13_spill] sm:$0xff]  ;;  %v16051_v60 = vld [vmem:[#allocation15_spill] sm:$0xff]  ;;  %v16055_v48 = vld [vmem:[#allocation20_spill] sm:$0xff] }
  0xba   :  { %9809 = vmatpush3.bf16.msra.mxu1 %v9808_v43  ;;  %v9822_v14 = vpack.c.bf16 %v11690_v52, %v11683_v2  ;;  %v1399_v38 = vand.u32 4294901760, %v1398_v26  ;;  %v9824_v9 = vpack.c.bf16 %v11700_v15, %v11698_v63  ;;  %v9826_v16 = vpack.c.bf16 %v11726_v13, %v11724_v50  ;;  %v16053_v51 = vld [vmem:[#allocation11_spill] sm:$0xff] }
  0xbb   :  { %9811 = vmatprep.subr.bf16.mxu1 %v9810_v20  ;;  %v9816_v43 = vpack.c.bf16 %v1515_v34, %v1508_v57  ;;  %v9830_v44 = vpack.c.bf16 %v16051_v60, %v16050_v25  ;;  %v16054_v20 = vld [vmem:[#allocation19_spill] sm:$0xff]  ;;  %v16057_v57 = vand.u32 4294901760, %v16052_v46  ;;  %v9836_v34 = vpack.c.bf16 %v11827_v10, %v11825_v49 }
  0xbc   :  { %9785 = vmatpush3.bf16.msra.mxu0 %v12040_v22  ;;  %v16070_v47 = vand.u32 4294901760, %v11652_v42 }
  0xbd   :  { %9819 = vmatprep.subr.bf16.mxu0 %v9818_v6  ;;  %v9832_v6 = vpack.c.bf16 %v16055_v48, %v16054_v20 }
  0xbe   :  { %9813 = vmatpush3.bf16.msra.mxu1 %v9812_v7  ;;  %v9828_v7 = vpack.c.bf16 %v11747_v62, %v11732_v11 }
  0xbf   :  { %1385 = vmatmul.mubr.f32.vlgmr.msra.gmra.mrb[12].mxu0 %v1384_v45  ;;  %9815 = vmatprep.subr.bf16.mxu1 %v9814_v28  ;;  %v16056_v45 = vld [vmem:[#allocation22_spill] sm:$0xff] }
  0xc0   :  { %9821 = vmatpush3.bf16.msra.mxu0 %v9820_v61  ;;  %1394 = vmatprep.mubr.f32.mxu0 %v1393_v29  ;;  %v9834_v26 = vpack.c.bf16 %v16056_v45, %v11798_v21  ;;  %v9838_v61 = vpack.c.bf16 %v11852_v5, %v11846_v30  ;;  %v16058_v29 = vld [vmem:[#allocation16_spill] sm:$0xff]  ;;  %v16059_v28 = vld [vmem:[#allocation14_spill] sm:$0xff] }
  0xc1   :  { %9823 = vmatprep.subr.bf16.mxu0 %v9822_v14  ;;  %v16060_v14 = vld [vmem:[#allocation25_spill] sm:$0xff] }
  0xc2   :  { %9817 = vmatpush3.bf16.msra.mxu1 %v9816_v43  ;;  %v16061_v43 = vld [vmem:[#allocation26_spill] sm:$0xff] }
  0xc3   :  { %1400 = vmatmul.mubr.f32.gmra.mrb[14].mxu0 %v1399_v38  ;;  %9851 = vmatprep.subr.bf16.mxu1 %v11688_v40  ;;  %v9840_v38 = vpack.c.bf16 %v16060_v14, %v11870_v23 }
  0xc4   :  { %9825 = vmatpush3.bf16.msra.mxu0 %v9824_v9  ;;  %1774 = vmatprep.mubr.f32.mxu0 %v16052_v46  ;;  %v16062_v9 = vld [vmem:[#allocation27_spill] sm:$0xff]  ;;  %v9844_v46 = vpack.c.bf16 %v11910_v27, %v11905_v33 }
  0xc5   :  { %9827 = vmatprep.subr.bf16.mxu0 %v9826_v16  ;;  %1632 = vmatmul.mubr.f32.vlgmr.msra.gmra.mrb[12].mxu1 %v11939_v56  ;;  %v9842_v16 = vpack.c.bf16 %v16062_v9, %v16061_v43 }
  0xc6   :  { %9853 = vmatpush3.bf16.msra.mxu1 %v16053_v51  ;;  %1637 = vmatprep.mubr.f32.mxu1 %v11949_v18 }
  0xc7   :  { %9855 = vmatprep.subr.bf16.mxu1 %v11696_v35 }
  0xc8   :  { %9829 = vmatpush3.bf16.msra.mxu0 %v9828_v7  ;;  %v16063_v7 = vld [vmem:[#allocation17_spill] sm:$0xff] }
  0xc9   :  { %9831 = vmatprep.subr.bf16.mxu0 %v9830_v44  ;;  %1639 = vmatmul.mubr.f32.gmra.mrb[14].mxu1 %v11977_v31  ;;  %v16064_v44 = vld [vmem:[#allocation21_spill] sm:$0xff] }
  0xca   :  { %9857 = vmatpush3.bf16.msra.mxu1 %v11703_v41  ;;  %1890 = vmatprep.mubr.f32.mxu1 %v16057_v57  ;;  %v16066_v57 = vld [vmem:[#allocation24_spill] sm:$0xff]  ;;  %v12111_v31 = vld [vmem:[#allocation5 + $0x200] sm:$0xff] }
  0xcb   :  { %9859 = vmatprep.subr.bf16.mxu1 %v11722_v59  ;;  %v2197_v42 = vand.u32 4294901760, %v12111_v31 }
  0xcc   :  { %9833 = vmatpush3.bf16.msra.mxu0 %v9832_v6  ;;  %v9846_v6 = vpack.c.bf16 %v11953_v24, %v11932_v58 }
  0xcd   :  { %9835 = vmatprep.subr.bf16.mxu0 %v9834_v26  ;;  %v16065_v26 = vld [vmem:[#allocation23_spill] sm:$0xff] }
  0xce   :  { %9861 = vmatpush3.bf16.msra.mxu1 %v16058_v29 }
  0xcf   :  { %9863 = vmatprep.subr.bf16.mxu1 %v16059_v28 }
  0xd0   :  { %9837 = vmatpush3.bf16.msra.mxu0 %v9836_v34  ;;  %v9848_v34 = vpack.c.bf16 %v11972_v53, %v11967_v3 }
  0xd1   :  { %9839 = vmatprep.subr.bf16.mxu0 %v9838_v61  ;;  %v16067_v61 = vand.u32 4294901760, %v11644_v32  ;;  %v16071_v32 = vand.u32 4294901760, %v11683_v2  ;;  %v16074_v2 = vand.u32 4294901760, %v11700_v15  ;;  %v16078_v15 = vand.u32 4294901760, %v11747_v62 }
  0xd2   :  { %9865 = vmatpush3.bf16.msra.mxu1 %v16063_v7 }
  0xd3   :  { %9867 = vmatprep.subr.bf16.mxu1 %v16064_v44 }
  0xd4   :  { %9841 = vmatpush3.bf16.msra.mxu0 %v9840_v38  ;;  %v16068_v38 = vand.u32 4294901760, %v11646_v1  ;;  %v16072_v1 = vand.u32 4294901760, %v11690_v52 }
  0xd5   :  { %9843 = vmatprep.subr.bf16.mxu0 %v9842_v16  ;;  %v12104_v16 = vld [vmem:[#allocation5 + $0x280] sm:$0xff] }
  0xd6   :  { %9869 = vmatpush3.bf16.msra.mxu1 %v16065_v26  ;;  %v9882_v8 = vpack.c.bf16 %v16068_v38, %v16067_v61  ;;  %v169_v61 = vld [vmem:[#allocation5 + $0x208] sm:$0xff]  ;;  %v2245_v38 = vand.u32 4294901760, %v12104_v16 }
  0xd7   :  { %9871 = vmatprep.subr.bf16.mxu1 %v16066_v57  ;;  %v2200_v52 = vand.u32 4294901760, %v169_v61 }
  0xd8   :  { %9845 = vmatpush3.bf16.msra.mxu0 %v9844_v46  ;;  %v16069_v46 = vand.u32 4294901760, %v11650_v17  ;;  %v2248_v17 = vand.u32 4294901760, %v185_v0  ;;  %v12132_v18 = vsub.f32 %v12104_v16, %v2245_v38  ;;  %v16080_v16 = vand.u32 4294901760, %v16051_v60 }
  0xd9   :  { %9847 = vmatprep.subr.bf16.mxu0 %v9846_v6  ;;  %v9886_v6 = vpack.c.bf16 %v16072_v1, %v16071_v32  ;;  %v186_v1 = vld [vmem:[#allocation5 + $0x290] sm:$0xff]  ;;  %v12154_v62 = vsub.f32 %v169_v61, %v2200_v52  ;;  %v16086_v60 = vand.u32 4294901760, %v11827_v10 }
  0xda   :  { %9873 = vmatpush3.bf16.msra.mxu1 %v11868_v19  ;;  %v9884_v36 = vpack.c.bf16 %v16070_v47, %v16069_v46  ;;  %v16073_v47 = vand.u32 4294901760, %v11698_v63  ;;  %v16076_v46 = vand.u32 4294901760, %v11726_v13  ;;  %v16077_v63 = vand.u32 4294901760, %v11732_v11 }
  0xdb   :  { %9875 = vmatprep.subr.bf16.mxu1 %v11889_v37  ;;  %v16079_v13 = vand.u32 4294901760, %v16050_v25  ;;  %v16082_v11 = vand.u32 4294901760, %v16055_v48  ;;  %v16085_v25 = vand.u32 4294901760, %v11825_v49  ;;  %v16088_v48 = vand.u32 4294901760, %v11852_v5 }
  0xdc   :  { %9849 = vmatpush3.bf16.msra.mxu0 %v9848_v34  ;;  %v16075_v34 = vand.u32 4294901760, %v11724_v50  ;;  %v12143_v50 = vsub.f32 %v12111_v31, %v2197_v42  ;;  %v16083_v31 = vand.u32 4294901760, %v11798_v21  ;;  %v16090_v21 = vand.u32 4294901760, %v11975_v12 }
  0xdd   :  { %9883 = vmatprep.subr.bf16.mxu0 %v9882_v8  ;;  %v9888_v8 = vpack.c.bf16 %v16074_v2, %v16073_v47  ;;  %v9892_v47 = vpack.c.bf16 %v16078_v15, %v16077_v63  ;;  %v9894_v2 = vpack.c.bf16 %v16080_v16, %v16079_v13  ;;  %v170_v63 = vld [vmem:[#allocation5 + $0x210] sm:$0xff]  ;;  %v12164_v15 = vpack.c.bf16 %v16086_v60, %v16085_v25  ;;  %v16089_v13 = vld [vmem:[#allocation12_spill] sm:$0xff]  ;;  %v189_v25 = vld [vmem:[#allocation5 + $0x2a8] sm:$0xff] }
  0xde   :  { %9877 = vmatpush3.bf16.msra.mxu1 %v11995_v54  ;;  %v9890_v32 = vpack.c.bf16 %v16076_v46, %v16075_v34  ;;  %v16081_v34 = vand.u32 4294901760, %v16054_v20  ;;  %v16087_v20 = vand.u32 4294901760, %v11846_v30  ;;  %v171_v16 = vld [vmem:[#allocation5 + $0x218] sm:$0xff]  ;;  %v16092_v49 = vand.u32 4294901760, %v16060_v14 }
  0xdf   :  { %1777 = vmatmul.mubr.f32.vlgmr.msra.gmra.mrb[16].mxu0 %v11975_v12  ;;  %9879 = vmatprep.subr.bf16.mxu1 %v12017_v4  ;;  %v16094_v30 = vand.u32 4294901760, %v16062_v9  ;;  %v188_v12 = vld [vmem:[#allocation5 + $0x2a0] sm:$0xff]  ;;  %v16097_v14 = vand.u32 4294901760, %v11988_v55  ;;  %v16099_v9 = vand.u32 4294901760, %v11953_v24  ;;  %v2206_v24 = vand.u32 4294901760, %v171_v16 }
  0xe0   :  { %9885 = vmatpush3.bf16.msra.mxu0 %v9884_v36  ;;  %1783 = vmatprep.mubr.f32.mxu0 %v11988_v55  ;;  %v187_v36 = vld [vmem:[#allocation5 + $0x298] sm:$0xff]  ;;  %v9896_v46 = vpack.c.bf16 %v16082_v11, %v16081_v34  ;;  %v12170_v61 = vpack.c.bf16 %v16088_v48, %v16087_v20  ;;  %v16093_v34 = vand.u32 4294901760, %v16061_v43  ;;  %v16095_v11 = vand.u32 4294901760, %v11905_v33  ;;  %v172_v20 = vld [vmem:[#allocation5 + $0x220] sm:$0xff] }
  0xe1   :  { %9887 = vmatprep.subr.bf16.mxu0 %v9886_v6  ;;  %v12140_v6 = vsub.f32 %v185_v0, %v2248_v17  ;;  %v2251_v0 = vand.u32 4294901760, %v186_v1  ;;  %v16098_v43 = vand.u32 4294901760, %v11932_v58  ;;  %v2203_v33 = vand.u32 4294901760, %v170_v63 }
  0xe2   :  { %9881 = vmatpush3.bf16.msra.mxu1 %v12040_v22  ;;  %v12185_v5 = vpack.c.bf16 %v16094_v30, %v16093_v34  ;;  %v15573_v48 = vand.u32 4294901760, %v12143_v50  ;;  %v16101_v55 = vand.u32 4294901760, %v11972_v53  ;;  %v2257_v30 = vand.u32 4294901760, %v188_v12 }
  0xe3   :  { %1786 = vmatmul.mubr.f32.gmra.mrb[18].mxu0 %v12008_v39  ;;  %9915 = vmatprep.subr.bf16.mxu1 %v11688_v40  ;;  %v12201_v60 = vpack.c.bf16 %v16099_v9, %v16098_v43  ;;  %v12212_v58 = vsub.f32 %v186_v1, %v2251_v0 }
  0xe4   :  { %9889 = vmatpush3.bf16.msra.mxu0 %v9888_v8  ;;  %v16084_v8 = vand.u32 4294901760, %v16056_v45  ;;  %2071 = vmatprep.mubr.f32.mxu0 %v16089_v13  ;;  %v16091_v45 = vand.u32 4294901760, %v11870_v23  ;;  %v15582_v23 = vand.u32 4294901760, %v12132_v18 }
  0xe5   :  { %9891 = vmatprep.subr.bf16.mxu0 %v9890_v32  ;;  %v2254_v32 = vand.u32 4294901760, %v187_v36  ;;  %1894 = vmatmul.mubr.f32.vlgmr.msra.gmra.mrb[16].mxu1 %v16090_v21 }
  0xe6   :  { %v9898_v40 = vpack.c.bf16 %v16084_v8, %v16083_v31  ;;  %v12179_v10 = vpack.c.bf16 %v16092_v49, %v16091_v45  ;;  %v16096_v31 = vand.u32 4294901760, %v11910_v27  ;;  %9917 = vmatpush3.bf16.msra.mxu1 %v16053_v51  ;;  %1901 = vmatprep.mubr.f32.mxu1 %v16097_v14  ;;  %v15578_v27 = vand.u32 4294901760, %v12140_v6 }
  0xe7   :  { %9919 = vmatprep.subr.bf16.mxu1 %v11696_v35  ;;  %v16100_v51 = vand.u32 4294901760, %v11967_v3  ;;  %v15571_v45 = vand.u32 4294901760, %v12154_v62  ;;  %v12215_v49 = vpack.c.bf16 %v2248_v17, %v2245_v38  ;;  %v12217_v34 = vsub.f32 %v187_v36, %v2254_v32  ;;  %v173_v17 = vld [vmem:[#allocation5 + $0x228] sm:$0xff] }
  0xe8   :  { %v12191_v8 = vpack.c.bf16 %v16096_v31, %v16095_v11  ;;  %9893 = vmatpush3.bf16.msra.mxu0 %v9892_v47  ;;  %v2260_v47 = vand.u32 4294901760, %v189_v25  ;;  %v16102_v35 = vand.u32 4294901760, %v12008_v39  ;;  %v12221_v3 = vpack.c.bf16 %v2200_v52, %v2197_v42  ;;  %v45_v31 = vld [vmem:[#allocation2 + $0x28] sm:$0xff] }
  0xe9   :  { %v12210_v21 = vpack.c.bf16 %v16101_v55, %v16100_v51  ;;  %9895 = vmatprep.subr.bf16.mxu0 %v9894_v2  ;;  %v12223_v53 = vpack.c.bf16 %v2254_v32, %v2251_v0  ;;  %v2439_v1 = vsub.f32 %v12132_v18, %v15582_v23  ;;  %v2209_v11 = vand.u32 4294901760, %v172_v20  ;;  %v190_v2 = vld [vmem:[#allocation5 + $0x2b0] sm:$0xff]  ;;  %v191_v0 = vld [vmem:[#allocation5 + $0x2b8] sm:$0xff]  ;;  %v197_v23 = vld [vmem:[#allocation5 + $0x2e8] sm:$0xff] }
  0xea   :  { %1905 = vmatmul.mubr.f32.gmra.mrb[18].mxu1 %v16102_v35  ;;  %16103 = vst [vmem:[#allocation13_spill] sm:$0xff] %v12221_v3  ;;  %v12229_v38 = vsub.f32 %v170_v63, %v2203_v33  ;;  %v2446_v39 = vsub.f32 %v12140_v6, %v15578_v27  ;;  %v2327_v42 = vsub.f32 %v12143_v50, %v15573_v48  ;;  %v15570_v63 = vand.u32 4294901760, %v12212_v58  ;;  %v175_v51 = vld [vmem:[#allocation5 + $0x238] sm:$0xff] }
  0xeb   :  { %16104 = vst [vmem:[#allocation15_spill] sm:$0xff] %v12223_v53  ;;  %9921 = vmatpush3.bf16.msra.mxu1 %v11703_v41  ;;  %2182 = vmatprep.mubr.f32.mxu1 %v16089_v13  ;;  %v12239_v52 = vpack.c.bf16 %v2206_v24, %v2203_v33  ;;  %v12241_v36 = vsub.f32 %v171_v16, %v2206_v24  ;;  %v2440_v16 = vand.u32 4294901760, %v2439_v1  ;;  %v2212_v43 = vand.u32 4294901760, %v173_v17  ;;  %v174_v33 = vld [vmem:[#allocation5 + $0x230] sm:$0xff] }
  0xec   :  { %9897 = vmatpush3.bf16.msra.mxu0 %v9896_v46  ;;  %9923 = vmatprep.subr.bf16.mxu1 %v11722_v59  ;;  %v2334_v41 = vsub.f32 %v12154_v62, %v15571_v45  ;;  %v12247_v13 = vpack.c.bf16 %v2260_v47, %v2257_v30  ;;  %v12249_v32 = vsub.f32 %v188_v12, %v2257_v30  ;;  %v15572_v46 = vand.u32 4294901760, %v12217_v34 }
  0xed   :  { %9899 = vmatprep.subr.bf16.mxu0 %v9898_v40  ;;  %v77_v59 = vmul.f32 %v45_v31, %v45_v31  ;;  %v12252_v14 = vsub.f32 %v189_v25, %v2260_v47  ;;  %v12254_v9 = vsub.f32 %v172_v20, %v2209_v11  ;;  %v2447_v55 = vand.u32 4294901760, %v2446_v39  ;;  %v192_v47 = vld [vmem:[#allocation5 + $0x2c0] sm:$0xff] }
  0xee   :  { %v2328_v24 = vand.u32 4294901760, %v2327_v42  ;;  %v2263_v40 = vand.u32 4294901760, %v190_v2  ;;  %v2266_v35 = vand.u32 4294901760, %v191_v0  ;;  %v2335_v12 = vand.u32 4294901760, %v2334_v41 }
  0xef   :  { %9925 = vmatpush3.bf16.msra.mxu1 %v16058_v29  ;;  %v2453_v25 = vsub.f32 %v12212_v58, %v15570_v63  ;;  %v15577_v20 = vand.u32 4294901760, %v12229_v38  ;;  %v15576_v30 = vand.u32 4294901760, %v12241_v36  ;;  %v2460_v29 = vsub.f32 %v12217_v34, %v15572_v46  ;;  %v193_v46 = vld [vmem:[#allocation5 + $0x2c8] sm:$0xff] }
  0xf0   :  { %9901 = vmatpush3.bf16.msra.mxu0 %v12164_v15  ;;  %9927 = vmatprep.subr.bf16.mxu1 %v16059_v28  ;;  %v2215_v1 = vand.u32 4294901760, %v174_v33  ;;  %v2218_v15 = vand.u32 4294901760, %v175_v51  ;;  %v12268_v31 = vand.u32 4294901760, %v77_v59  ;;  %v12270_v28 = vpack.c.bf16 %v2212_v43, %v2209_v11 }
  0xf1   :  { %9903 = vmatprep.subr.bf16.mxu0 %v12170_v61  ;;  %v12272_v39 = vsub.f32 %v173_v17, %v2212_v43  ;;  %v15574_v42 = vand.u32 4294901760, %v12249_v32  ;;  %v15575_v41 = vand.u32 4294901760, %v12252_v14  ;;  %v12277_v63 = vpack.c.bf16 %v2447_v55, %v2440_v16 }
  0xf2   :  { %16105 = vst [vmem:[#allocation18_spill] sm:$0xff] %v12268_v31  ;;  %v12279_v61 = vpack.c.bf16 %v2266_v35, %v2263_v40  ;;  %v12281_v45 = vsub.f32 %v190_v2, %v2263_v40  ;;  %v2269_v48 = vand.u32 4294901760, %v192_v47  ;;  %v12285_v11 = vsub.f32 %v191_v0, %v2266_v35 }
  0xf3   :  { %16106 = vst [vmem:[#allocation11_spill] sm:$0xff] %v12272_v39  ;;  %9929 = vmatpush3.bf16.msra.mxu1 %v16063_v7  ;;  %v2454_v17 = vand.u32 4294901760, %v2453_v25  ;;  %v2341_v43 = vsub.f32 %v12229_v38, %v15577_v20  ;;  %v2348_v7 = vsub.f32 %v12241_v36, %v15576_v30  ;;  %v12294_v2 = vpack.c.bf16 %v2335_v12, %v2328_v24  ;;  %v177_v24 = vld [vmem:[#allocation5 + $0x248] sm:$0xff] }
  0xf4   :  { %16107 = vst [vmem:[#allocation19_spill] sm:$0xff] %v12281_v45  ;;  %9905 = vmatpush3.bf16.msra.mxu0 %v12179_v10  ;;  %9931 = vmatprep.subr.bf16.mxu1 %v16064_v44  ;;  %16108 = vst [vmem:[#allocation20_spill] sm:$0xff] %v12285_v11  ;;  %v2461_v16 = vand.u32 4294901760, %v2460_v29  ;;  %v12296_v55 = vpack.c.bf16 %v2218_v15, %v2215_v1  ;;  %v176_v10 = vld [vmem:[#allocation5 + $0x240] sm:$0xff]  ;;  %v12299_v44 = vsub.f32 %v77_v59, %v12268_v31 }
  0xf5   :  { %9907 = vmatprep.subr.bf16.mxu0 %v12185_v5  ;;  %v12301_v0 = vsub.f32 %v174_v33, %v2215_v1  ;;  %v2272_v40 = vand.u32 4294901760, %v193_v46  ;;  %v2467_v35 = vsub.f32 %v12249_v32, %v15574_v42  ;;  %v2474_v5 = vsub.f32 %v12252_v14, %v15575_v41 }
  0xf6   :  { %16109 = vst [vmem:[#allocation22_spill] sm:$0xff] %v12296_v55  ;;  %16110 = vst [vmem:[#allocation16_spill] sm:$0xff] %v12299_v44  ;;  %v12310_v12 = vsub.f32 %v175_v51, %v2218_v15  ;;  %v12312_v25 = vsub.f32 %v192_v47, %v2269_v48  ;;  %v15580_v59 = vand.u32 4294901760, %v12254_v9  ;;  %v15579_v33 = vand.u32 4294901760, %v12272_v39  ;;  %v194_v47 = vld [vmem:[#allocation5 + $0x2d0] sm:$0xff]  ;;  %v195_v15 = vld [vmem:[#allocation5 + $0x2d8] sm:$0xff] }
  0xf7   :  { %16111 = vst [vmem:[#allocation14_spill] sm:$0xff] %v12301_v0  ;;  %9933 = vmatpush3.bf16.msra.mxu1 %v16065_v26  ;;  %v2342_v29 = vand.u32 4294901760, %v2341_v43  ;;  %v2349_v1 = vand.u32 4294901760, %v2348_v7  ;;  %v2221_v42 = vand.u32 4294901760, %v176_v10  ;;  %v15581_v41 = vand.u32 4294901760, %v12281_v45 }
  0xf8   :  { %16112 = vst [vmem:[#allocation25_spill] sm:$0xff] %v12310_v12  ;;  %9909 = vmatpush3.bf16.msra.mxu0 %v12191_v8  ;;  %9935 = vmatprep.subr.bf16.mxu1 %v16066_v57  ;;  %v12320_v26 = vpack.c.bf16 %v2461_v16, %v2454_v17  ;;  %v2224_v51 = vand.u32 4294901760, %v177_v24  ;;  %v15583_v30 = vand.u32 4294901760, %v12285_v11  ;;  %v15584_v20 = vand.u32 4294901760, %v12299_v44 }
  0xf9   :  { %9911 = vmatprep.subr.bf16.mxu0 %v12201_v60  ;;  %v12324_v27 = vpack.c.bf16 %v2272_v40, %v2269_v48  ;;  %v12326_v8 = vsub.f32 %v193_v46, %v2272_v40  ;;  %v2468_v57 = vand.u32 4294901760, %v2467_v35  ;;  %v2475_v43 = vand.u32 4294901760, %v2474_v5 }
  0xfa   :  { %v2355_v60 = vsub.f32 %v12254_v9, %v15580_v59  ;;  %v2362_v17 = vsub.f32 %v12272_v39, %v15579_v33  ;;  %v15587_v7 = vand.u32 4294901760, %v12301_v0  ;;  %v12339_v48 = vpack.c.bf16 %v2349_v1, %v2342_v29  ;;  %v178_v33 = vld [vmem:[#allocation5 + $0x250] sm:$0xff] }
  0xfb   :  { %16113 = vst [vmem:[#allocation26_spill] sm:$0xff] %v12324_v27  ;;  %16114 = vst [vmem:[#allocation27_spill] sm:$0xff] %v12326_v8  ;;  %9937 = vmatpush3.bf16.msra.mxu1 %v11868_v19  ;;  %v2275_v46 = vand.u32 4294901760, %v194_v47  ;;  %v2278_v19 = vand.u32 4294901760, %v195_v15  ;;  %v2481_v40 = vsub.f32 %v12281_v45, %v15581_v41  ;;  %v12345_v35 = vpack.c.bf16 %v2224_v51, %v2221_v42  ;;  %v196_v41 = vld [vmem:[#allocation5 + $0x2e0] sm:$0xff] }
  0xfc   :  { %9913 = vmatpush3.bf16.msra.mxu0 %v12210_v21  ;;  %9939 = vmatprep.subr.bf16.mxu1 %v11889_v37  ;;  %v12347_v5 = vsub.f32 %v176_v10, %v2221_v42  ;;  %v2488_v21 = vsub.f32 %v12285_v11, %v15583_v30  ;;  %v179_v37 = vld [vmem:[#allocation5 + $0x258] sm:$0xff]  ;;  %v2295_v29 = vsub.f32 %v12299_v44, %v15584_v20  ;;  %v2356_v10 = vand.u32 4294901760, %v2355_v60 }
  0xfd   :  { %9947 = vmatprep.subr.bf16.mxu0 %v12215_v49  ;;  %16115 = vst [vmem:[#allocation17_spill] sm:$0xff] %v12345_v35  ;;  %v12355_v1 = vpack.c.bf16 %v2475_v43, %v2468_v57  ;;  %v12357_v59 = vsub.f32 %v177_v24, %v2224_v51  ;;  %v2363_v30 = vand.u32 4294901760, %v2362_v17  ;;  %v2369_v20 = vsub.f32 %v12301_v0, %v15587_v7  ;;  %v16117_v51 = vld [vmem:[#allocation28_spill] sm:$0xff]  ;;  %v12375_v7 = vld [vmem:[#allocation5 + $0x260] sm:$0xff]  ;;  %v12377_v0 = vld [vmem:[#allocation5 + $0x268] sm:$0xff] }
  0xfe   :  { %v16116_v57 = vand.u32 4294901760, %v12310_v12  ;;  %v12371_v43 = vpack.c.bf16 %v2278_v19, %v2275_v46  ;;  %v2482_v42 = vand.u32 4294901760, %v2481_v40  ;;  %v2227_v16 = vand.u32 4294901760, %v178_v33 }
  0xff   :  { %2073 = vmatmul.mubr.f32.vlgmr.msra.gmra.mrb[20].mxu0 %v11939_v56  ;;  %9941 = vmatpush3.bf16.msra.mxu1 %v11995_v54  ;;  %v2230_v44 = vand.u32 4294901760, %v179_v37  ;;  %v2489_v54 = vand.u32 4294901760, %v2488_v21  ;;  %v2281_v60 = vand.u32 4294901760, %v196_v41  ;;  %v2284_v17 = vand.u32 4294901760, %v197_v23  ;;  %v16121_v21 = vld [vmem:[#allocation29_spill] sm:$0xff] }
 0x100   :  { %v2376_v24 = vsub.f32 %v12310_v12, %v16116_v57  ;;  %9949 = vmatpush3.bf16.msra.mxu0 %v12221_v3  ;;  %2078 = vmatprep.mubr.f32.mxu0 %v16117_v51  ;;  %16118 = vst [vmem:[#allocation21_spill] sm:$0xff] %v12371_v43  ;;  %v2296_v57 = vand.u32 4294901760, %v2295_v29  ;;  %v12379_v12 = vsub.f32 %v194_v47, %v2275_v46  ;;  %v16119_v3 = vand.u32 4294901760, %v12312_v25 }
 0x101   :  { %9943 = vmatprep.subr.bf16.mxu1 %v12017_v4  ;;  %9951 = vmatprep.subr.bf16.mxu0 %v12223_v53  ;;  %v16120_v11 = vand.u32 4294901760, %v12326_v8  ;;  %v12390_v45 = vpack.c.bf16 %v2363_v30, %v2356_v10  ;;  %v12392_v39 = vsub.f32 %v195_v15, %v2278_v19  ;;  %v2370_v47 = vand.u32 4294901760, %v2369_v20 }
 0x102   :  { %v2495_v40 = vsub.f32 %v12312_v25, %v16119_v3  ;;  %v2377_v46 = vand.u32 4294901760, %v2376_v24  ;;  %v12396_v3 = vpack.c.bf16 %v2230_v44, %v2227_v16  ;;  %v12398_v29 = vsub.f32 %v178_v33, %v2227_v16 }
 0x103   :  { %v2502_v4 = vsub.f32 %v12326_v8, %v16120_v11  ;;  %2080 = vmatmul.mubr.f32.gmra.mrb[22].mxu0 %v16121_v21  ;;  %9945 = vmatpush3.bf16.msra.mxu1 %v12040_v22  ;;  %v15606_v11 = vand.u32 4294901760, %v12375_v7  ;;  %v15604_v53 = vand.u32 4294901760, %v12377_v0  ;;  %v44_v8 = vld [vmem:[#allocation2 + $0x20] sm:$0xff]  ;;  %v12403_v22 = vpack.c.bf16 %v2489_v54, %v2482_v42  ;;  %v12418_v42 = vld [vmem:[#allocation5 + $0x2f0] sm:$0xff] }
 0x104   :  { %9953 = vmatpush3.bf16.msra.mxu0 %v12239_v52  ;;  %9979 = vmatprep.subr.bf16.mxu1 %v12277_v63  ;;  %16122 = vst [vmem:[#allocation23_spill] sm:$0xff] %v12396_v3  ;;  %v12405_v30 = vsub.f32 %v179_v37, %v2230_v44  ;;  %v12407_v20 = vpack.c.bf16 %v2284_v17, %v2281_v60  ;;  %v15605_v15 = vand.u32 4294901760, %v12357_v59  ;;  %v61_v63 = vld [vmem:[#allocation2 + $0xa8] sm:$0xff]  ;;  %v2496_v16 = vand.u32 4294901760, %v2495_v40  ;;  %v12420_v44 = vld [vmem:[#allocation5 + $0x2f8] sm:$0xff]  ;;  %v12422_v37 = vld [vmem:[#allocation5 + $0x270] sm:$0xff] }
 0x105   :  { %9955 = vmatprep.subr.bf16.mxu0 %v12247_v13  ;;  %2297 = vmatprep.mubr.f32.mxu0 %v2296_v57  ;;  %v12411_v33 = vsub.f32 %v196_v41, %v2281_v60  ;;  %v2503_v19 = vand.u32 4294901760, %v2502_v4  ;;  %v16126_v10 = vand.u32 4294901760, %v12347_v5  ;;  %v12428_v41 = vsub.f32 %v197_v23, %v2284_v17 }
 0x106   :  { %16123 = vst [vmem:[#allocation24_spill] sm:$0xff] %v12405_v30  ;;  %16124 = vst [vmem:[#allocation12_spill] sm:$0xff] %v12407_v20  ;;  %2184 = vmatmul.mubr.f32.vlgmr.msra.gmra.mrb[20].mxu1 %v11939_v56  ;;  %v12426_v56 = vpack.c.bf16 %v2377_v46, %v2370_v47  ;;  %v15607_v54 = vand.u32 4294901760, %v12379_v12  ;;  %v76_v60 = vmul.f32 %v44_v8, %v44_v8  ;;  %v60_v8 = vld [vmem:[#allocation2 + $0xa0] sm:$0xff]  ;;  %v2287_v40 = vand.u32 4294901760, %v12418_v42 }
 0x107   :  { %16125 = vst [vmem:[#allocation28_spill] sm:$0xff] %v12411_v33  ;;  %v12416_v24 = vsub.f32 %v12347_v5, %v16126_v10  ;;  %9981 = vmatpush3.bf16.msra.mxu1 %v12294_v2  ;;  %2189 = vmatprep.mubr.f32.mxu1 %v16117_v51  ;;  %16127 = vst [vmem:[#allocation29_spill] sm:$0xff] %v12428_v41  ;;  %v12436_v57 = vsub.f32 %v12375_v7, %v15606_v11  ;;  %v12444_v51 = vld [vmem:[#allocation5 + $0x278] sm:$0xff]  ;;  %v2290_v4 = vand.u32 4294901760, %v12420_v44 }
 0x108   :  { %9957 = vmatpush3.bf16.msra.mxu0 %v12270_v28  ;;  %9983 = vmatprep.subr.bf16.mxu1 %v12320_v26  ;;  %v12441_v2 = vsub.f32 %v12377_v0, %v15604_v53  ;;  %v93_v17 = vmul.f32 %v61_v63, %v61_v63  ;;  %v2390_v26 = vsub.f32 %v12357_v59, %v15605_v15  ;;  %v15612_v63 = vand.u32 4294901760, %v12398_v29 }
 0x109   :  { %9959 = vmatprep.subr.bf16.mxu0 %v12279_v61  ;;  %v9994_v46 = vpack.c.bf16 %v2503_v19, %v2496_v16  ;;  %v2384_v10 = vand.u32 4294901760, %v12416_v24  ;;  %v2509_v15 = vsub.f32 %v12379_v12, %v15607_v54  ;;  %v12462_v23 = vand.u32 4294901760, %v76_v60 }
 0x10a   :  { %2191 = vmatmul.mubr.f32.gmra.mrb[22].mxu1 %v16121_v21  ;;  %v92_v47 = vmul.f32 %v60_v8, %v60_v8  ;;  %v16129_v21 = vand.u32 4294901760, %v12392_v39  ;;  %v12472_v24 = vand.u32 4294901760, %v93_v17  ;;  %v2391_v54 = vand.u32 4294901760, %v2390_v26 }
 0x10b   :  { %9985 = vmatpush3.bf16.msra.mxu1 %v12339_v48  ;;  %16128 = vst [vmem:[#allocation30_spill] sm:$0xff] %v12462_v23  ;;  %2548 = vmatprep.mubr.f32.mxu1 %v12268_v31  ;;  %v12476_v8 = vsub.f32 %v12418_v42, %v2287_v40  ;;  %v12479_v11 = vsub.f32 %v12420_v44, %v2290_v4  ;;  %v16132_v19 = vand.u32 4294901760, %v12405_v30  ;;  %v2510_v44 = vand.u32 4294901760, %v2509_v15 }
 0x10c   :  { %9961 = vmatpush3.bf16.msra.mxu0 %v12296_v55  ;;  %9987 = vmatprep.subr.bf16.mxu1 %v12355_v1  ;;  %v2516_v16 = vsub.f32 %v12392_v39, %v16129_v21  ;;  %16130 = vst [vmem:[#allocation31_spill] sm:$0xff] %v12472_v24  ;;  %v16131_v1 = vand.u32 4294901760, %v12422_v37  ;;  %v2397_v21 = vsub.f32 %v12398_v29, %v15612_v63  ;;  %v16133_v31 = vand.u32 4294901760, %v12444_v51 }
 0x10d   :  { %9963 = vmatprep.subr.bf16.mxu0 %v12324_v27  ;;  %v2404_v48 = vsub.f32 %v12405_v30, %v16132_v19  ;;  %v12501_v27 = vsub.f32 %v76_v60, %v12462_v23  ;;  %v12503_v63 = vand.u32 4294901760, %v92_v47  ;;  %v16135_v42 = vand.u32 4294901760, %v12411_v33 }
 0x10e   :  { %v12484_v53 = vsub.f32 %v12422_v37, %v16131_v1  ;;  %v12498_v1 = vsub.f32 %v12444_v51, %v16133_v31  ;;  %v2517_v19 = vand.u32 4294901760, %v2516_v16  ;;  %v16136_v15 = vand.u32 4294901760, %v12428_v41 }
 0x10f   :  { %9989 = vmatpush3.bf16.msra.mxu1 %v12390_v45  ;;  %16134 = vst [vmem:[#allocation32_spill] sm:$0xff] %v12503_v63  ;;  %v2523_v45 = vsub.f32 %v12411_v33, %v16135_v42  ;;  %v12514_v31 = vsub.f32 %v93_v17, %v12472_v24  ;;  %v16137_v60 = vand.u32 4294901760, %v12375_v7  ;;  %v15630_v16 = vand.u32 4294901760, %v12476_v8 }
 0x110   :  { %9965 = vmatpush3.bf16.msra.mxu0 %v12345_v35  ;;  %9991 = vmatprep.subr.bf16.mxu1 %v12403_v22  ;;  %v2530_v26 = vsub.f32 %v12428_v41, %v16136_v15  ;;  %v16138_v35 = vand.u32 4294901760, %v12377_v0  ;;  %v9996_v22 = vpack.c.bf16 %v2391_v54, %v2384_v10  ;;  %v15629_v42 = vand.u32 4294901760, %v12479_v11 }
 0x111   :  { %9967 = vmatprep.subr.bf16.mxu0 %v12371_v43  ;;  %v2398_v33 = vand.u32 4294901760, %v2397_v21  ;;  %v2405_v30 = vand.u32 4294901760, %v2404_v48  ;;  %v16139_v15 = vand.u32 4294901760, %v12436_v57  ;;  %v16140_v41 = vand.u32 4294901760, %v12441_v2 }
 0x112   :  { %v12521_v55 = vpack.c.bf16 %v16138_v35, %v16137_v60  ;;  %v15626_v0 = vand.u32 4294901760, %v12501_v27  ;;  %v12534_v7 = vsub.f32 %v92_v47, %v12503_v63  ;;  %v15625_v35 = vand.u32 4294901760, %v12484_v53 }
 0x113   :  { %v2411_v17 = vsub.f32 %v12436_v57, %v16139_v15  ;;  %v2418_v43 = vsub.f32 %v12441_v2, %v16140_v41  ;;  %9993 = vmatpush3.bf16.msra.mxu1 %v12426_v56  ;;  %v9998_v10 = vpack.c.bf16 %v2517_v19, %v2510_v44  ;;  %v2524_v48 = vand.u32 4294901760, %v2523_v45 }
 0x114   :  { %9969 = vmatpush3.bf16.msra.mxu0 %v12396_v3  ;;  %9995 = vmatprep.subr.bf16.mxu1 %v9994_v46  ;;  %v2531_v21 = vand.u32 4294901760, %v2530_v26  ;;  %v15628_v60 = vand.u32 4294901760, %v12514_v31  ;;  %v12541_v56 = vpack.c.bf16 %v2290_v4, %v2287_v40  ;;  %v2537_v41 = vsub.f32 %v12476_v8, %v15630_v16 }
 0x115   :  { %9971 = vmatprep.subr.bf16.mxu0 %v12407_v20  ;;  %v2544_v47 = vsub.f32 %v12479_v11, %v15629_v42  ;;  %v10000_v15 = vpack.c.bf16 %v2405_v30, %v2398_v33  ;;  %v2412_v54 = vand.u32 4294901760, %v2411_v17  ;;  %v2419_v46 = vand.u32 4294901760, %v2418_v43  ;;  %v12623_v42 = vld [vmem:[#allocation5 + $0x380] sm:$0xff] }
 0x116   :  { %v2301_v26 = vsub.f32 %v12501_v27, %v15626_v0  ;;  %v15627_v44 = vand.u32 4294901760, %v12534_v7  ;;  %v2425_v40 = vsub.f32 %v12484_v53, %v15625_v35  ;;  %v16141_v4 = vand.u32 4294901760, %v12498_v1 }
 0x117   :  { %9997 = vmatpush3.bf16.msra.mxu1 %v9996_v22  ;;  %v16142_v43 = vand.u32 4294901760, %v12422_v37  ;;  %v16143_v30 = vand.u32 4294901760, %v12444_v51  ;;  %v10002_v45 = vpack.c.bf16 %v2531_v21, %v2524_v48  ;;  %v2310_v22 = vsub.f32 %v12514_v31, %v15628_v60 }
 0x118   :  { %v2432_v19 = vsub.f32 %v12498_v1, %v16141_v4  ;;  %9973 = vmatpush3.bf16.msra.mxu0 %v12521_v55  ;;  %9999 = vmatprep.subr.bf16.mxu1 %v9998_v10  ;;  %v10010_v17 = vpack.c.bf16 %v12140_v6, %v12132_v18  ;;  %v2538_v4 = vand.u32 4294901760, %v2537_v41  ;;  %v2545_v35 = vand.u32 4294901760, %v2544_v47 }
 0x119   :  { %v12564_v33 = vpack.c.bf16 %v16143_v30, %v16142_v43  ;;  %9975 = vmatprep.subr.bf16.mxu0 %v12541_v56  ;;  %v10004_v0 = vpack.c.bf16 %v2419_v46, %v2412_v54  ;;  %v2302_v10 = vand.u32 4294901760, %v2301_v26  ;;  %v2316_v37 = vsub.f32 %v12534_v7, %v15627_v44  ;;  %v16145_v26 = vld [vmem:[#allocation19_spill] sm:$0xff]  ;;  %v16159_v44 = vld [vmem:[#allocation17_spill] sm:$0xff] }
 0x11a   :  { %v2426_v51 = vand.u32 4294901760, %v2425_v40  ;;  %v2433_v48 = vand.u32 4294901760, %v2432_v19  ;;  %v10012_v21 = vpack.c.bf16 %v12154_v62, %v12143_v50  ;;  %v2311_v43 = vand.u32 4294901760, %v2310_v22  ;;  %v16146_v40 = vld [vmem:[#allocation20_spill] sm:$0xff]  ;;  %v16148_v22 = vld [vmem:[#allocation13_spill] sm:$0xff] }
 0x11b   :  { %10001 = vmatpush3.bf16.msra.mxu1 %v10000_v15  ;;  %v10006_v30 = vpack.c.bf16 %v2545_v35, %v2538_v4  ;;  %v10014_v54 = vpack.c.bf16 %v12217_v34, %v12212_v58  ;;  %v2317_v41 = vand.u32 4294901760, %v2316_v37  ;;  %v10016_v15 = vpack.c.bf16 %v12241_v36, %v12229_v38  ;;  %v16144_v35 = vld [vmem:[#allocation11_spill] sm:$0xff]  ;;  %v16150_v4 = vld [vmem:[#allocation14_spill] sm:$0xff] }
 0x11c   :  { %9977 = vmatpush3.bf16.msra.mxu0 %v12564_v33  ;;  %10003 = vmatprep.subr.bf16.mxu1 %v10002_v45  ;;  %v10008_v47 = vpack.c.bf16 %v2433_v48, %v2426_v51  ;;  %v10018_v46 = vpack.c.bf16 %v12252_v14, %v12249_v32  ;;  %v10022_v19 = vpack.c.bf16 %v16146_v40, %v16145_v26  ;;  %v16147_v45 = vld [vmem:[#allocation16_spill] sm:$0xff]  ;;  %v16152_v51 = vld [vmem:[#allocation27_spill] sm:$0xff] }
 0x11d   :  { %10011 = vmatprep.subr.bf16.mxu0 %v10010_v17  ;;  %v16149_v17 = vld [vmem:[#allocation15_spill] sm:$0xff]  ;;  %v10026_v48 = vpack.c.bf16 %v16152_v51, %v12312_v25  ;;  %v10040_v60 = vpack.c.bf16 %v12498_v1, %v12484_v53 }
 0x11f   :  { %2303 = vmatmul.mubr.f32.vlgmr.msra.gmra.mrb[24].mxu0 %v2302_v10  ;;  %10005 = vmatpush3.bf16.msra.mxu1 %v10004_v0  ;;  %v10020_v0 = vpack.c.bf16 %v16144_v35, %v12254_v9  ;;  %v16151_v10 = vld [vmem:[#allocation25_spill] sm:$0xff] }
 0x120   :  { %10013 = vmatpush3.bf16.msra.mxu0 %v10012_v21  ;;  %2312 = vmatprep.mubr.f32.mxu0 %v2311_v43  ;;  %v10024_v37 = vpack.c.bf16 %v16151_v10, %v16150_v4  ;;  %v16153_v21 = vand.u32 4294901760, %v16147_v45  ;;  %v10028_v43 = vpack.c.bf16 %v12357_v59, %v12347_v5 }
 0x121   :  { %10007 = vmatprep.subr.bf16.mxu1 %v10006_v30  ;;  %10015 = vmatprep.subr.bf16.mxu0 %v10014_v54  ;;  %v10030_v30 = vpack.c.bf16 %v12392_v39, %v12379_v12  ;;  %v16154_v54 = vld [vmem:[#allocation24_spill] sm:$0xff] }
 0x123   :  { %2318 = vmatmul.mubr.f32.gmra.mrb[26].mxu0 %v2317_v41  ;;  %10009 = vmatpush3.bf16.msra.mxu1 %v10008_v47  ;;  %v10032_v41 = vpack.c.bf16 %v16154_v54, %v12398_v29  ;;  %v16155_v47 = vld [vmem:[#allocation28_spill] sm:$0xff] }
 0x124   :  { %10017 = vmatpush3.bf16.msra.mxu0 %v10016_v15  ;;  %10043 = vmatprep.subr.bf16.mxu1 %v12215_v49  ;;  %v16156_v15 = vld [vmem:[#allocation29_spill] sm:$0xff] }
 0x125   :  { %10019 = vmatprep.subr.bf16.mxu0 %v10018_v46  ;;  %2692 = vmatprep.mubr.f32.mxu0 %v16147_v45  ;;  %v10034_v46 = vpack.c.bf16 %v16156_v15, %v16155_v47 }
 0x126   :  { %2550 = vmatmul.mubr.f32.vlgmr.msra.gmra.mrb[24].mxu1 %v12462_v23 }
 0x127   :  { %10045 = vmatpush3.bf16.msra.mxu1 %v16148_v22  ;;  %2555 = vmatprep.mubr.f32.mxu1 %v12472_v24  ;;  %v12631_v24 = vld [vmem:[#allocation5 + $0x300] sm:$0xff] }
 0x128   :  { %10021 = vmatpush3.bf16.msra.mxu0 %v10020_v0  ;;  %10047 = vmatprep.subr.bf16.mxu1 %v16149_v17 }
 0x129   :  { %10023 = vmatprep.subr.bf16.mxu0 %v10022_v19  ;;  %v16157_v19 = vld [vmem:[#allocation22_spill] sm:$0xff] }
 0x12a   :  { %2557 = vmatmul.mubr.f32.gmra.mrb[26].mxu1 %v12503_v63 }
 0x12b   :  { %10049 = vmatpush3.bf16.msra.mxu1 %v12239_v52  ;;  %2808 = vmatprep.mubr.f32.mxu1 %v16153_v21 }
 0x12c   :  { %10025 = vmatpush3.bf16.msra.mxu0 %v10024_v37  ;;  %10051 = vmatprep.subr.bf16.mxu1 %v12247_v13  ;;  %v16158_v37 = vld [vmem:[#allocation26_spill] sm:$0xff] }
 0x12d   :  { %10027 = vmatprep.subr.bf16.mxu0 %v10026_v48  ;;  %v10036_v48 = vpack.c.bf16 %v12441_v2, %v12436_v57 }
 0x12f   :  { %10053 = vmatpush3.bf16.msra.mxu1 %v12270_v28 }
 0x130   :  { %10029 = vmatpush3.bf16.msra.mxu0 %v10028_v43  ;;  %10055 = vmatprep.subr.bf16.mxu1 %v12279_v61  ;;  %v7770_v0 = vpop.f32.mrb[0].mxu0  ;;  %v10038_v43 = vpack.c.bf16 %v12479_v11, %v12476_v8 }
 0x131   :  { %10031 = vmatprep.subr.bf16.mxu0 %v10030_v30  ;;  %v7771_v45 = vpop.f32.mrb[1].mxu0  ;;  %v16160_v30 = vld [vmem:[#allocation21_spill] sm:$0xff] }
 0x132   :  { %v7772_v21 = vadd.f32 %v7771_v45, %v7770_v0  ;;  %v16161_v0 = vand.u32 4294901760, %v12132_v18  ;;  %v16163_v18 = vand.u32 4294901760, %v12143_v50  ;;  %v16167_v50 = vand.u32 4294901760, %v12229_v38 }
 0x133   :  { %10057 = vmatpush3.bf16.msra.mxu1 %v16157_v19  ;;  %v16173_v38 = vand.u32 4294901760, %v12623_v42 }
 0x134   :  { %10033 = vmatpush3.bf16.msra.mxu0 %v10032_v41  ;;  %10059 = vmatprep.subr.bf16.mxu1 %v16158_v37  ;;  %v12625_v41 = vld [vmem:[#allocation5 + $0x388] sm:$0xff] }
 0x135   :  { %10035 = vmatprep.subr.bf16.mxu0 %v10034_v46  ;;  %v16162_v46 = vand.u32 4294901760, %v12140_v6  ;;  %v16164_v6 = vand.u32 4294901760, %v12154_v62  ;;  %v16168_v62 = vand.u32 4294901760, %v12241_v36  ;;  %v12672_v36 = vsub.f32 %v12623_v42, %v16173_v38 }
 0x136   :  { %v16181_v38 = vand.u32 4294901760, %v12347_v5  ;;  %v16188_v5 = vand.u32 4294901760, %v16156_v15 }
 0x137   :  { %10061 = vmatpush3.bf16.msra.mxu1 %v16159_v44  ;;  %v7808_v16 = vpop.f32.mrb[0].mxu1  ;;  %v10074_v45 = vpack.c.bf16 %v16162_v46, %v16161_v0  ;;  %v16165_v46 = vand.u32 4294901760, %v12212_v58  ;;  %v12651_v44 = vld [vmem:[#allocation5 + $0x390] sm:$0xff]  ;;  %v16170_v58 = vand.u32 4294901760, %v12252_v14 }
 0x138   :  { %10037 = vmatpush3.bf16.msra.mxu0 %v10036_v48  ;;  %10063 = vmatprep.subr.bf16.mxu1 %v16160_v30  ;;  %v7809_v63 = vpop.f32.mrb[1].mxu1  ;;  %v12633_v48 = vld [vmem:[#allocation5 + $0x308] sm:$0xff]  ;;  %v3115_v30 = vand.u32 4294901760, %v12631_v24 }
 0x139   :  { %10039 = vmatprep.subr.bf16.mxu0 %v10038_v43  ;;  %v7810_v23 = vadd.f32 %v7809_v63, %v7808_v16  ;;  %v10076_v43 = vpack.c.bf16 %v16164_v6, %v16163_v18  ;;  %v16166_v63 = vand.u32 4294901760, %v12217_v34  ;;  %v16172_v18 = vand.u32 4294901760, %v16144_v35 }
 0x13a   :  { %v16176_v35 = vand.u32 4294901760, %v16146_v40 }
 0x13b   :  { %10065 = vmatpush3.bf16.msra.mxu1 %v12396_v3  ;;  %v12643_v0 = vadd.f32 %v7810_v23, %v7772_v21  ;;  %v10078_v16 = vpack.c.bf16 %v16166_v63, %v16165_v46  ;;  %v7811_v3 = vpop.f32.mrb[2].mxu1  ;;  %v10080_v23 = vpack.c.bf16 %v16168_v62, %v16167_v50  ;;  %v16169_v21 = vand.u32 4294901760, %v12249_v32 }
 0x13c   :  { %10041 = vmatpush3.bf16.msra.mxu0 %v10040_v60  ;;  %10067 = vmatprep.subr.bf16.mxu1 %v12407_v20  ;;  %v3118_v60 = vand.u32 4294901760, %v12633_v48  ;;  %v12653_v20 = vld [vmem:[#allocation5 + $0x398] sm:$0xff]  ;;  %v7812_v46 = vpop.f32.mrb[3].mxu1  ;;  %v16174_v32 = vand.u32 4294901760, %v12625_v41  ;;  %v16178_v62 = vand.u32 4294901760, %v16151_v10 }
 0x13d   :  { %10075 = vmatprep.subr.bf16.mxu0 %v10074_v45  ;;  %v10082_v34 = vpack.c.bf16 %v16170_v58, %v16169_v21  ;;  %v16171_v45 = vand.u32 4294901760, %v12254_v9  ;;  %v7813_v63 = vadd.f32 %v7812_v46, %v7811_v3  ;;  %v16175_v9 = vand.u32 4294901760, %v16145_v26  ;;  %v202_v46 = vld [vmem:[#allocation5 + $0x310] sm:$0xff] }
 0x13e   :  { %v12677_v14 = vsub.f32 %v12625_v41, %v16174_v32  ;;  %v16177_v3 = vand.u32 4294901760, %v16150_v4  ;;  %v3169_v58 = vand.u32 4294901760, %v12651_v44  ;;  %v16180_v26 = vand.u32 4294901760, %v16152_v51 }
 0x13f   :  { %v10084_v6 = vpack.c.bf16 %v16172_v18, %v16171_v45  ;;  %2695 = vmatmul.mubr.f32.vlgmr.msra.gmra.mrb[28].mxu0 %v12501_v27  ;;  %10069 = vmatpush3.bf16.msra.mxu1 %v12521_v55  ;;  %v10086_v50 = vpack.c.bf16 %v16176_v35, %v16175_v9  ;;  %v3172_v45 = vand.u32 4294901760, %v12653_v20  ;;  %v12700_v4 = vsub.f32 %v12631_v24, %v3115_v30 }
 0x140   :  { %10077 = vmatpush3.bf16.msra.mxu0 %v10076_v43  ;;  %2701 = vmatprep.mubr.f32.mxu0 %v12514_v31  ;;  %v12688_v21 = vpack.c.bf16 %v16178_v62, %v16177_v3  ;;  %v16179_v43 = vand.u32 4294901760, %v12312_v25  ;;  %v12703_v10 = vsub.f32 %v12633_v48, %v3118_v60  ;;  %v16182_v32 = vand.u32 4294901760, %v12357_v59 }
 0x141   :  { %10071 = vmatprep.subr.bf16.mxu1 %v12541_v56  ;;  %10079 = vmatprep.subr.bf16.mxu0 %v10078_v16  ;;  %v16183_v25 = vand.u32 4294901760, %v12379_v12  ;;  %v16184_v51 = vand.u32 4294901760, %v12392_v39  ;;  %v16185_v24 = vand.u32 4294901760, %v12398_v29  ;;  %v16186_v3 = vand.u32 4294901760, %v16154_v54  ;;  %v220_v54 = vld [vmem:[#allocation5 + $0x3a0] sm:$0xff] }
 0x142   :  { %v12697_v18 = vpack.c.bf16 %v16180_v26, %v16179_v43  ;;  %v7773_v40 = vpop.f32.mrb[2].mxu0  ;;  %v12709_v9 = vpack.c.bf16 %v16182_v32, %v16181_v38  ;;  %v16187_v62 = vand.u32 4294901760, %v16155_v47  ;;  %v203_v43 = vld [vmem:[#allocation5 + $0x318] sm:$0xff]  ;;  %v16189_v12 = vand.u32 4294901760, %v12436_v57  ;;  %v221_v38 = vld [vmem:[#allocation5 + $0x3a8] sm:$0xff] }
 0x143   :  { %v7774_v16 = vpop.f32.mrb[3].mxu0  ;;  %v12715_v35 = vpack.c.bf16 %v16184_v51, %v16183_v25  ;;  %v12721_v48 = vpack.c.bf16 %v16186_v3, %v16185_v24  ;;  %2704 = vmatmul.mubr.f32.gmra.mrb[30].mxu0 %v12534_v7  ;;  %10073 = vmatpush3.bf16.msra.mxu1 %v12564_v33  ;;  %v16190_v29 = vand.u32 4294901760, %v12441_v2  ;;  %v15648_v47 = vand.u32 4294901760, %v12672_v36  ;;  %v12752_v51 = vld [vmem:[#allocation5 + $0x320] sm:$0xff] }
 0x144   :  { %v12727_v59 = vpack.c.bf16 %v16188_v5, %v16187_v62  ;;  %v7775_v39 = vadd.f32 %v7774_v16, %v7773_v40  ;;  %v15647_v15 = vand.u32 4294901760, %v12677_v14  ;;  %10081 = vmatpush3.bf16.msra.mxu0 %v10080_v23  ;;  %10107 = vmatprep.subr.bf16.mxu1 %v12215_v49  ;;  %v16191_v32 = vand.u32 4294901760, %v12476_v8  ;;  %v16193_v23 = vld [vmem:[#allocation18_spill] sm:$0xff] }
 0x145   :  { %v12735_v26 = vpack.c.bf16 %v16190_v29, %v16189_v12  ;;  %v16192_v25 = vand.u32 4294901760, %v12479_v11  ;;  %v12747_v57 = vsub.f32 %v12651_v44, %v3169_v58  ;;  %v12750_v2 = vsub.f32 %v12653_v20, %v3172_v45  ;;  %10083 = vmatprep.subr.bf16.mxu0 %v10082_v34  ;;  %2989 = vmatprep.mubr.f32.mxu0 %v16193_v23 }
 0x146   :  { %v3121_v16 = vand.u32 4294901760, %v202_v46  ;;  %v12754_v24 = vadd.f32 %v7813_v63, %v7775_v39  ;;  %v3124_v49 = vand.u32 4294901760, %v203_v43  ;;  %v15642_v8 = vand.u32 4294901760, %v12700_v4 }
 0x147   :  { %v12744_v40 = vpack.c.bf16 %v16192_v25, %v16191_v32  ;;  %v15641_v11 = vand.u32 4294901760, %v12703_v10  ;;  %v16194_v3 = vand.u32 4294901760, %v12501_v27  ;;  %v16195_v44 = vand.u32 4294901760, %v12484_v53 }
 0x148   :  { %v16196_v20 = vand.u32 4294901760, %v12498_v1  ;;  %v16197_v34 = vand.u32 4294901760, %v12623_v42  ;;  %v16198_v63 = vand.u32 4294901760, %v12625_v41  ;;  %v3175_v39 = vand.u32 4294901760, %v220_v54  ;;  %v205_v42 = vld [vmem:[#allocation5 + $0x328] sm:$0xff]  ;;  %10085 = vmatpush3.bf16.msra.mxu0 %v10084_v6 }
 0x149   :  { %2812 = vmatmul.mubr.f32.vlgmr.msra.gmra.mrb[28].mxu1 %v16194_v3  ;;  %v3178_v12 = vand.u32 4294901760, %v221_v38  ;;  %v16200_v29 = vand.u32 4294901760, %v12514_v31  ;;  %v12776_v27 = vpack.c.bf16 %v3118_v60, %v3115_v30  ;;  %v3357_v53 = vsub.f32 %v12672_v36, %v15648_v47  ;;  %v222_v30 = vld [vmem:[#allocation5 + $0x3b0] sm:$0xff]  ;;  %10087 = vmatprep.subr.bf16.mxu0 %v10086_v50 }
 0x14a   :  { %v12765_v62 = vpack.c.bf16 %v16196_v20, %v16195_v44  ;;  %v12771_v5 = vpack.c.bf16 %v16198_v63, %v16197_v34  ;;  %10109 = vmatpush3.bf16.msra.mxu1 %v16148_v22  ;;  %v3364_v1 = vsub.f32 %v12677_v14, %v15647_v15  ;;  %v3127_v41 = vand.u32 4294901760, %v12752_v51  ;;  %v226_v47 = vld [vmem:[#allocation5 + $0x3d0] sm:$0xff] }
 0x14b   :  { %2819 = vmatprep.mubr.f32.mxu1 %v16200_v29  ;;  %10111 = vmatprep.subr.bf16.mxu1 %v16149_v17  ;;  %v12786_v22 = vpack.c.bf16 %v3172_v45, %v3169_v58  ;;  %v12788_v31 = vsub.f32 %v202_v46, %v3121_v16  ;;  %v15639_v60 = vand.u32 4294901760, %v12747_v57  ;;  %v15640_v32 = vand.u32 4294901760, %v12750_v2  ;;  %v223_v58 = vld [vmem:[#allocation5 + $0x3b8] sm:$0xff] }
 0x14c   :  { %16199 = vst [vmem:[#allocation11_spill] sm:$0xff] %v12771_v5  ;;  %v12792_v25 = vpack.c.bf16 %v3124_v49, %v3121_v16  ;;  %v12794_v3 = vsub.f32 %v203_v43, %v3124_v49  ;;  %v3245_v6 = vsub.f32 %v12700_v4, %v15642_v8  ;;  %v3252_v17 = vsub.f32 %v12703_v10, %v15641_v11  ;;  %v47_v16 = vld [vmem:[#allocation2 + $0x38] sm:$0xff] }
 0x14d   :  { %16201 = vst [vmem:[#allocation19_spill] sm:$0xff] %v12786_v22  ;;  %v16203_v45 = vand.u32 4294901760, %v12534_v7  ;;  %v12804_v46 = vpack.c.bf16 %v3178_v12, %v3175_v39  ;;  %v12806_v44 = vsub.f32 %v220_v54, %v3175_v39  ;;  %v12808_v50 = vsub.f32 %v221_v38, %v3178_v12  ;;  %v206_v7 = vld [vmem:[#allocation5 + $0x330] sm:$0xff]  ;;  %v207_v29 = vld [vmem:[#allocation5 + $0x338] sm:$0xff]  ;;  %10089 = vmatpush3.bf16.msra.mxu0 %v12688_v21 }
 0x14e   :  { %16202 = vst [vmem:[#allocation20_spill] sm:$0xff] %v12792_v25  ;;  %v3130_v43 = vand.u32 4294901760, %v205_v42  ;;  %10113 = vmatpush3.bf16.msra.mxu1 %v12239_v52  ;;  %v3358_v49 = vand.u32 4294901760, %v3357_v53  ;;  %v3365_v20 = vand.u32 4294901760, %v3364_v1  ;;  %v12813_v34 = vsub.f32 %v12752_v51, %v3127_v41  ;;  %10091 = vmatprep.subr.bf16.mxu0 %v12697_v18 }
 0x14f   :  { %2823 = vmatmul.mubr.f32.gmra.mrb[30].mxu1 %v16203_v45  ;;  %v3181_v63 = vand.u32 4294901760, %v222_v30  ;;  %10115 = vmatprep.subr.bf16.mxu1 %v12247_v13  ;;  %v3184_v54 = vand.u32 4294901760, %v223_v58  ;;  %v3371_v38 = vsub.f32 %v12747_v57, %v15639_v60  ;;  %v3378_v52 = vsub.f32 %v12750_v2, %v15640_v32 }
 0x150   :  { %3100 = vmatprep.mubr.f32.mxu1 %v16193_v23  ;;  %16204 = vst [vmem:[#allocation16_spill] sm:$0xff] %v12813_v34  ;;  %v15644_v23 = vand.u32 4294901760, %v12788_v31  ;;  %v3246_v51 = vand.u32 4294901760, %v3245_v6  ;;  %v3253_v39 = vand.u32 4294901760, %v3252_v17  ;;  %v15643_v12 = vand.u32 4294901760, %v12794_v3  ;;  %v224_v6 = vld [vmem:[#allocation5 + $0x3c0] sm:$0xff] }
 0x151   :  { %v79_v21 = vmul.f32 %v47_v16, %v47_v16  ;;  %v3133_v53 = vand.u32 4294901760, %v206_v7  ;;  %v3136_v13 = vand.u32 4294901760, %v207_v29  ;;  %v15645_v1 = vand.u32 4294901760, %v12806_v44  ;;  %10093 = vmatpush3.bf16.msra.mxu0 %v12709_v9 }
 0x152   :  { %v15646_v45 = vand.u32 4294901760, %v12808_v50  ;;  %10117 = vmatpush3.bf16.msra.mxu1 %v12270_v28  ;;  %v12829_v60 = vpack.c.bf16 %v3365_v20, %v3358_v49  ;;  %v12831_v32 = vpack.c.bf16 %v3130_v43, %v3127_v41  ;;  %v12833_v11 = vsub.f32 %v205_v42, %v3130_v43  ;;  %v225_v49 = vld [vmem:[#allocation5 + $0x3c8] sm:$0xff]  ;;  %10095 = vmatprep.subr.bf16.mxu0 %v12715_v35 }
 0x153   :  { %v12835_v18 = vsub.f32 %v222_v30, %v3181_v63  ;;  %10119 = vmatprep.subr.bf16.mxu1 %v12279_v61  ;;  %v12839_v17 = vpack.c.bf16 %v3184_v54, %v3181_v63  ;;  %v3372_v16 = vand.u32 4294901760, %v3371_v38  ;;  %v3379_v8 = vand.u32 4294901760, %v3378_v52  ;;  %v7846_v30 = vpop.f32.mrb[4].mxu0 }
 0x154   :  { %16205 = vst [vmem:[#allocation13_spill] sm:$0xff] %v12833_v11  ;;  %v3259_v28 = vsub.f32 %v12788_v31, %v15644_v23  ;;  %v12845_v42 = vpack.c.bf16 %v3253_v39, %v3246_v51  ;;  %v12847_v41 = vsub.f32 %v223_v58, %v3184_v54  ;;  %v3266_v9 = vsub.f32 %v12794_v3, %v15643_v12  ;;  %v208_v58 = vld [vmem:[#allocation5 + $0x340] sm:$0xff]  ;;  %v209_v54 = vld [vmem:[#allocation5 + $0x348] sm:$0xff]  ;;  %v7847_v38 = vpop.f32.mrb[5].mxu0 }
 0x155   :  { %16206 = vst [vmem:[#allocation15_spill] sm:$0xff] %v12835_v18  ;;  %16207 = vst [vmem:[#allocation14_spill] sm:$0xff] %v12839_v17  ;;  %v12852_v61 = vand.u32 4294901760, %v79_v21  ;;  %v12854_v43 = vpack.c.bf16 %v3136_v13, %v3133_v53  ;;  %v3187_v20 = vand.u32 4294901760, %v224_v6  ;;  %v3385_v63 = vsub.f32 %v12806_v44, %v15645_v1  ;;  %10097 = vmatpush3.bf16.msra.mxu0 %v12721_v48 }
 0x156   :  { %16208 = vst [vmem:[#allocation25_spill] sm:$0xff] %v12847_v41  ;;  %v3392_v35 = vsub.f32 %v12808_v50, %v15646_v45  ;;  %10121 = vmatpush3.bf16.msra.mxu1 %v16157_v19  ;;  %v12863_v52 = vsub.f32 %v206_v7, %v3133_v53  ;;  %v12865_v51 = vsub.f32 %v207_v29, %v3136_v13  ;;  %v3190_v39 = vand.u32 4294901760, %v225_v49 }
 0x157   :  { %16209 = vst [vmem:[#allocation27_spill] sm:$0xff] %v12852_v61  ;;  %16210 = vst [vmem:[#allocation24_spill] sm:$0xff] %v12854_v43  ;;  %v15649_v12 = vand.u32 4294901760, %v12813_v34  ;;  %v7848_v23 = vadd.f32 %v7847_v38, %v7846_v30  ;;  %10123 = vmatprep.subr.bf16.mxu1 %v16158_v37  ;;  %v12870_v1 = vpack.c.bf16 %v3379_v8, %v3372_v16  ;;  %v3260_v45 = vand.u32 4294901760, %v3259_v28  ;;  %v7849_v30 = vpop.f32.mrb[6].mxu0  ;;  %v16214_v28 = vld [vmem:[#allocation17_spill] sm:$0xff] }
 0x158   :  { %16211 = vst [vmem:[#allocation28_spill] sm:$0xff] %v12863_v52  ;;  %16212 = vst [vmem:[#allocation29_spill] sm:$0xff] %v12865_v51  ;;  %10099 = vmatprep.subr.bf16.mxu0 %v12727_v59  ;;  %v3267_v19 = vand.u32 4294901760, %v3266_v9  ;;  %v3139_v7 = vand.u32 4294901760, %v208_v58  ;;  %v3142_v29 = vand.u32 4294901760, %v209_v54  ;;  %v12875_v53 = vsub.f32 %v79_v21, %v12852_v61  ;;  %v7850_v16 = vpop.f32.mrb[7].mxu0 }
 0x159   :  { %v861_v13 = vadd.f32 %v7848_v23, %v12643_v0  ;;  %v12878_v48 = vsub.f32 %v224_v6, %v3187_v20  ;;  %v3386_v37 = vand.u32 4294901760, %v3385_v63  ;;  %v3393_v8 = vand.u32 4294901760, %v3392_v35  ;;  %v227_v21 = vld [vmem:[#allocation5 + $0x3d8] sm:$0xff]  ;;  %10101 = vmatpush3.bf16.msra.mxu0 %v12735_v26  ;;  %v16216_v23 = vld [vmem:[#allocation21_spill] sm:$0xff]  ;;  %v7884_v35 = vpop.f32.mrb[4].mxu1 }
 0x15a   :  { %16213 = vst [vmem:[#allocation22_spill] sm:$0xff] %v12875_v53  ;;  %10125 = vmatpush3.bf16.msra.mxu1 %v16214_v28  ;;  %v12881_v38 = vpack.c.bf16 %v3190_v39, %v3187_v20  ;;  %v12883_v15 = vsub.f32 %v225_v49, %v3190_v39  ;;  %v12888_v59 = vsub.f32 %v12813_v34, %v15649_v12  ;;  %v3193_v9 = vand.u32 4294901760, %v226_v47  ;;  %v210_v49 = vld [vmem:[#allocation5 + $0x350] sm:$0xff] }
 0x15b   :  { %v7851_v0 = vadd.f32 %v7850_v16, %v7849_v30  ;;  %10127 = vmatprep.subr.bf16.mxu1 %v16216_v23  ;;  %v16217_v6 = vand.u32 4294901760, %v12833_v11  ;;  %10103 = vmatprep.subr.bf16.mxu0 %v12744_v40  ;;  %v12898_v39 = vpack.c.bf16 %v3267_v19, %v3260_v45  ;;  %v12900_v28 = vpack.c.bf16 %v3142_v29, %v3139_v7  ;;  %v7885_v23 = vpop.f32.mrb[5].mxu1  ;;  %v16219_v40 = vld [vmem:[#allocation23_spill] sm:$0xff] }
 0x15c   :  { %16215 = vst [vmem:[#allocation26_spill] sm:$0xff] %v12881_v38  ;;  %v12902_v30 = vsub.f32 %v208_v58, %v3139_v7  ;;  %v15658_v26 = vand.u32 4294901760, %v12875_v53  ;;  %v12906_v12 = vpack.c.bf16 %v3393_v8, %v3386_v37  ;;  %v3196_v20 = vand.u32 4294901760, %v227_v21  ;;  %v16224_v58 = vld [vmem:[#allocation30_spill] sm:$0xff] }
 0x15d   :  { %v3280_v63 = vsub.f32 %v12833_v11, %v16217_v6  ;;  %16218 = vst [vmem:[#allocation18_spill] sm:$0xff] %v12900_v28  ;;  %v870_v16 = vadd.f32 %v7851_v0, %v12754_v24  ;;  %v12908_v6 = vsub.f32 %v209_v54, %v3142_v29  ;;  %v211_v11 = vld [vmem:[#allocation5 + $0x358] sm:$0xff]  ;;  %v7886_v34 = vadd.f32 %v7885_v23, %v7884_v35  ;;  %v7887_v35 = vpop.f32.mrb[6].mxu1 }
 0x15e   :  { %10129 = vmatpush3.bf16.msra.mxu1 %v16219_v40  ;;  %v12911_v45 = vsub.f32 %v226_v47, %v3193_v9  ;;  %10105 = vmatpush3.bf16.msra.mxu0 %v12765_v62  ;;  %v16220_v24 = vld [vmem:[#allocation12_spill] sm:$0xff]  ;;  %v3274_v7 = vand.u32 4294901760, %v12888_v59  ;;  %v16221_v29 = vand.u32 4294901760, %v12835_v18  ;;  %v16222_v8 = vand.u32 4294901760, %v12847_v41  ;;  %v228_v40 = vld [vmem:[#allocation5 + $0x3e0] sm:$0xff] }
 0x15f   :  { %10131 = vmatprep.subr.bf16.mxu1 %v16220_v24  ;;  %v3281_v54 = vand.u32 4294901760, %v3280_v63  ;;  %v12924_v0 = vadd.f32 %v7886_v34, %v861_v13  ;;  %10139 = vmatprep.subr.bf16.mxu0 %v12771_v5  ;;  %v3145_v23 = vand.u32 4294901760, %v210_v49  ;;  %v3148_v62 = vand.u32 4294901760, %v211_v11  ;;  %v229_v24 = vld [vmem:[#allocation5 + $0x3e8] sm:$0xff]  ;;  %v7888_v63 = vpop.f32.mrb[7].mxu1 }
 0x160   :  { %v3399_v37 = vsub.f32 %v12835_v18, %v16221_v29  ;;  %v3406_v47 = vsub.f32 %v12847_v41, %v16222_v8  ;;  %v3213_v59 = vsub.f32 %v12875_v53, %v15658_v26  ;;  %v12930_v19 = vpack.c.bf16 %v3196_v20, %v3193_v9  ;;  %v213_v53 = vld [vmem:[#allocation5 + $0x368] sm:$0xff] }
 0x161   :  { %v12932_v29 = vsub.f32 %v227_v21, %v3196_v20  ;;  %v7889_v13 = vadd.f32 %v7888_v63, %v7887_v35  ;;  %2991 = vmatmul.mubr.f32.vlgmr.msra.gmra.mrb[32].mxu0 %v16224_v58  ;;  %v16225_v41 = vand.u32 4294901760, %v12863_v52  ;;  %v16226_v26 = vand.u32 4294901760, %v12865_v51  ;;  %v16227_v21 = vld [vmem:[#allocation31_spill] sm:$0xff]  ;;  %v212_v63 = vld [vmem:[#allocation5 + $0x360] sm:$0xff] }
 0x162   :  { %16223 = vst [vmem:[#allocation17_spill] sm:$0xff] %v12930_v19  ;;  %10133 = vmatpush3.bf16.msra.mxu1 %v12521_v55  ;;  %10141 = vmatpush3.bf16.msra.mxu0 %v12776_v27  ;;  %v3400_v20 = vand.u32 4294901760, %v3399_v37  ;;  %v3407_v8 = vand.u32 4294901760, %v3406_v47  ;;  %v3199_v34 = vand.u32 4294901760, %v228_v40  ;;  %v3202_v35 = vand.u32 4294901760, %v229_v24 }
 0x163   :  { %v3287_v18 = vsub.f32 %v12863_v52, %v16225_v41  ;;  %v3294_v9 = vsub.f32 %v12865_v51, %v16226_v26  ;;  %2996 = vmatprep.mubr.f32.mxu0 %v16227_v21  ;;  %v12946_v5 = vadd.f32 %v7889_v13, %v870_v16  ;;  %10135 = vmatprep.subr.bf16.mxu1 %v12541_v56  ;;  %v3214_v26 = vand.u32 4294901760, %v3213_v59  ;;  %v16231_v56 = vld [vmem:[#allocation32_spill] sm:$0xff] }
 0x164   :  { %10143 = vmatprep.subr.bf16.mxu0 %v12786_v22  ;;  %v12950_v55 = vpack.c.bf16 %v3281_v54, %v3274_v7  ;;  %v12952_v41 = vpack.c.bf16 %v3148_v62, %v3145_v23  ;;  %v12954_v51 = vsub.f32 %v210_v49, %v3145_v23  ;;  %v12956_v52 = vsub.f32 %v211_v11, %v3148_v62  ;;  %v12966_v49 = vld [vmem:[#allocation5 + $0x3f0] sm:$0xff] }
 0x165   :  { %v16229_v37 = vand.u32 4294901760, %v12878_v48  ;;  %v16230_v16 = vand.u32 4294901760, %v12883_v15  ;;  %2998 = vmatmul.mubr.f32.gmra.mrb[34].mxu0 %v16231_v56  ;;  %v3288_v7 = vand.u32 4294901760, %v3287_v18  ;;  %v3295_v54 = vand.u32 4294901760, %v3294_v9  ;;  %v46_v11 = vld [vmem:[#allocation2 + $0x30] sm:$0xff] }
 0x166   :  { %16228 = vst [vmem:[#allocation21_spill] sm:$0xff] %v12956_v52  ;;  %10137 = vmatpush3.bf16.msra.mxu1 %v12564_v33  ;;  %v3151_v22 = vand.u32 4294901760, %v212_v63  ;;  %v3154_v59 = vand.u32 4294901760, %v213_v53  ;;  %10145 = vmatpush3.bf16.msra.mxu0 %v12792_v25  ;;  %v12970_v23 = vpack.c.bf16 %v3407_v8, %v3400_v20  ;;  %v12972_v62 = vpack.c.bf16 %v3202_v35, %v3199_v34 }
 0x167   :  { %v3413_v47 = vsub.f32 %v12878_v48, %v16229_v37  ;;  %v3420_v13 = vsub.f32 %v12883_v15, %v16230_v16  ;;  %10171 = vmatprep.subr.bf16.mxu1 %v12829_v60  ;;  %v12974_v37 = vsub.f32 %v228_v40, %v3199_v34  ;;  %10147 = vmatprep.subr.bf16.mxu0 %v12804_v46  ;;  %v15671_v18 = vand.u32 4294901760, %v12908_v6  ;;  %v63_v60 = vld [vmem:[#allocation2 + $0xb8] sm:$0xff] }
 0x168   :  { %v12978_v33 = vsub.f32 %v229_v24, %v3202_v35  ;;  %v15672_v25 = vand.u32 4294901760, %v12932_v29  ;;  %3215 = vmatprep.mubr.f32.mxu0 %v3214_v26  ;;  %v12984_v40 = vld [vmem:[#allocation5 + $0x3f8] sm:$0xff]  ;;  %v15675_v34 = vand.u32 4294901760, %v12966_v49  ;;  %v78_v16 = vmul.f32 %v46_v11, %v46_v11 }
 0x169   :  { %16232 = vst [vmem:[#allocation23_spill] sm:$0xff] %v12974_v37  ;;  %3102 = vmatmul.mubr.f32.vlgmr.msra.gmra.mrb[32].mxu1 %v16224_v58  ;;  %v3414_v8 = vand.u32 4294901760, %v3413_v47  ;;  %v3421_v20 = vand.u32 4294901760, %v3420_v13  ;;  %v10184_v24 = vpack.c.bf16 %v3295_v54, %v3288_v7  ;;  %v12989_v35 = vpack.c.bf16 %v3154_v59, %v3151_v22  ;;  %v13000_v13 = vld [vmem:[#allocation5 + $0x370] sm:$0xff] }
 0x16a   :  { %16233 = vst [vmem:[#allocation12_spill] sm:$0xff] %v12978_v33  ;;  %10173 = vmatpush3.bf16.msra.mxu1 %v12845_v42  ;;  %3107 = vmatprep.mubr.f32.mxu1 %v16227_v21  ;;  %v12991_v9 = vsub.f32 %v212_v63, %v3151_v22  ;;  %v12995_v58 = vsub.f32 %v213_v53, %v3154_v59  ;;  %v16234_v26 = vand.u32 4294901760, %v12902_v30  ;;  %v13002_v42 = vld [vmem:[#allocation5 + $0x378] sm:$0xff]  ;;  %v62_v7 = vld [vmem:[#allocation2 + $0xb0] sm:$0xff]  ;;  %v16235_v53 = vand.u32 4294901760, %v12911_v45 }
 0x16b   :  { %10149 = vmatpush3.bf16.msra.mxu0 %v12831_v32  ;;  %10175 = vmatprep.subr.bf16.mxu1 %v12870_v1  ;;  %v95_v21 = vmul.f32 %v63_v60, %v63_v60  ;;  %v3308_v22 = vsub.f32 %v12908_v6, %v15671_v18  ;;  %v3208_v1 = vand.u32 4294901760, %v12984_v40  ;;  %v3434_v54 = vsub.f32 %v12932_v29, %v15672_v25 }
 0x16c   :  { %v3301_v47 = vsub.f32 %v12902_v30, %v16234_v26  ;;  %10151 = vmatprep.subr.bf16.mxu0 %v12839_v17  ;;  %v3427_v63 = vsub.f32 %v12911_v45, %v16235_v53  ;;  %v10186_v59 = vpack.c.bf16 %v3421_v20, %v3414_v8  ;;  %v13019_v11 = vsub.f32 %v12966_v49, %v15675_v34 }
 0x16d   :  { %3109 = vmatmul.mubr.f32.gmra.mrb[34].mxu1 %v16231_v56  ;;  %v13022_v26 = vand.u32 4294901760, %v78_v16  ;;  %v3157_v53 = vand.u32 4294901760, %v13000_v13  ;;  %v3160_v18 = vand.u32 4294901760, %v13002_v42  ;;  %v94_v17 = vmul.f32 %v62_v7, %v62_v7 }
 0x16e   :  { %10177 = vmatpush3.bf16.msra.mxu1 %v12898_v39  ;;  %3466 = vmatprep.mubr.f32.mxu1 %v12852_v61  ;;  %v3302_v56 = vand.u32 4294901760, %v3301_v47  ;;  %v15686_v8 = vand.u32 4294901760, %v12974_v37  ;;  %v13033_v34 = vand.u32 4294901760, %v95_v21  ;;  %v3309_v39 = vand.u32 4294901760, %v3308_v22 }
 0x16f   :  { %16236 = vst [vmem:[#allocation30_spill] sm:$0xff] %v13022_v26  ;;  %10153 = vmatpush3.bf16.msra.mxu0 %v12854_v43  ;;  %10179 = vmatprep.subr.bf16.mxu1 %v12906_v12  ;;  %v13037_v60 = vsub.f32 %v12984_v40, %v3208_v1  ;;  %v3428_v7 = vand.u32 4294901760, %v3427_v63  ;;  %v3435_v25 = vand.u32 4294901760, %v3434_v54  ;;  %v16238_v61 = vand.u32 4294901760, %v12954_v51 }
 0x170   :  { %16237 = vst [vmem:[#allocation31_spill] sm:$0xff] %v13033_v34  ;;  %10155 = vmatprep.subr.bf16.mxu0 %v12881_v38  ;;  %v13043_v12 = vsub.f32 %v78_v16, %v13022_v26  ;;  %v13049_v22 = vsub.f32 %v13000_v13, %v3157_v53  ;;  %v13052_v40 = vsub.f32 %v13002_v42, %v3160_v18  ;;  %v16239_v63 = vand.u32 4294901760, %v12956_v52 }
 0x171   :  { %v3315_v43 = vsub.f32 %v12954_v51, %v16238_v61  ;;  %v13057_v61 = vand.u32 4294901760, %v94_v17  ;;  %v16241_v16 = vand.u32 4294901760, %v12978_v33  ;;  %v13068_v42 = vsub.f32 %v95_v21, %v13033_v34 }
 0x172   :  { %10181 = vmatpush3.bf16.msra.mxu1 %v12950_v55  ;;  %v3322_v54 = vsub.f32 %v12956_v52, %v16239_v63  ;;  %v3441_v55 = vsub.f32 %v12974_v37, %v15686_v8  ;;  %v10188_v63 = vpack.c.bf16 %v3309_v39, %v3302_v56  ;;  %v10190_v20 = vpack.c.bf16 %v3435_v25, %v3428_v7 }
 0x173   :  { %16240 = vst [vmem:[#allocation32_spill] sm:$0xff] %v13057_v61  ;;  %10157 = vmatpush3.bf16.msra.mxu0 %v12900_v28  ;;  %10183 = vmatprep.subr.bf16.mxu1 %v12970_v23  ;;  %v3448_v13 = vsub.f32 %v12978_v33, %v16241_v16  ;;  %v15691_v47 = vand.u32 4294901760, %v13019_v11  ;;  %v7922_v23 = vpop.f32.mrb[8].mxu0  ;;  %v3316_v38 = vand.u32 4294901760, %v3315_v43  ;;  %v16242_v8 = vand.u32 4294901760, %v12991_v9 }
 0x174   :  { %10159 = vmatprep.subr.bf16.mxu0 %v12930_v19  ;;  %v16243_v16 = vand.u32 4294901760, %v12995_v58  ;;  %v7923_v33 = vpop.f32.mrb[9].mxu0  ;;  %v3323_v56 = vand.u32 4294901760, %v3322_v54  ;;  %v13081_v25 = vsub.f32 %v94_v17, %v13057_v61  ;;  %v15692_v39 = vand.u32 4294901760, %v13049_v22 }
 0x175   :  { %v3329_v37 = vsub.f32 %v12991_v9, %v16242_v8  ;;  %v15693_v43 = vand.u32 4294901760, %v13052_v40  ;;  %v7924_v7 = vadd.f32 %v7923_v33, %v7922_v23  ;;  %v3442_v52 = vand.u32 4294901760, %v3441_v55 }
 0x176   :  { %v3336_v21 = vsub.f32 %v12995_v58, %v16243_v16  ;;  %10185 = vmatpush3.bf16.msra.mxu1 %v10184_v24  ;;  %v3449_v8 = vand.u32 4294901760, %v3448_v13  ;;  %v16244_v24 = vand.u32 4294901760, %v12966_v49  ;;  %v13092_v17 = vpack.c.bf16 %v3160_v18, %v3157_v53  ;;  %v7925_v13 = vpop.f32.mrb[10].mxu0 }
 0x177   :  { %10161 = vmatpush3.bf16.msra.mxu0 %v12952_v41  ;;  %10187 = vmatprep.subr.bf16.mxu1 %v10186_v59  ;;  %v3455_v16 = vsub.f32 %v13019_v11, %v15691_v47  ;;  %v16246_v33 = vand.u32 4294901760, %v13037_v60  ;;  %v1157_v55 = vadd.f32 %v7924_v7, %v12924_v0  ;;  %v16247_v23 = vand.u32 4294901760, %v13043_v12 }
 0x178   :  { %10163 = vmatprep.subr.bf16.mxu0 %v12972_v62  ;;  %v13090_v54 = vpack.c.bf16 %v3208_v1, %v16244_v24  ;;  %v3330_v49 = vand.u32 4294901760, %v3329_v37  ;;  %v3337_v1 = vand.u32 4294901760, %v3336_v21  ;;  %v7926_v24 = vpop.f32.mrb[11].mxu0  ;;  %v10192_v18 = vpack.c.bf16 %v3323_v56, %v3316_v38  ;;  %v7960_v38 = vpop.f32.mrb[8].mxu1 }
 0x179   :  { %v3462_v59 = vsub.f32 %v13037_v60, %v16246_v33  ;;  %v3219_v28 = vsub.f32 %v13043_v12, %v16247_v23  ;;  %v3343_v47 = vsub.f32 %v13049_v22, %v15692_v39  ;;  %v3350_v0 = vsub.f32 %v13052_v40, %v15693_v43  ;;  %v7961_v43 = vpop.f32.mrb[9].mxu1 }
 0x17a   :  { %16245 = vst [vmem:[#allocation33_spill] sm:$0xff] %v13090_v54  ;;  %10189 = vmatpush3.bf16.msra.mxu1 %v10188_v63  ;;  %v7927_v7 = vadd.f32 %v7926_v24, %v7925_v13  ;;  %v10194_v33 = vpack.c.bf16 %v3449_v8, %v3442_v52  ;;  %v16248_v37 = vand.u32 4294901760, %v13068_v42  ;;  %v10202_v21 = vpack.c.bf16 %v12677_v14, %v12672_v36 }
 0x17b   :  { %10165 = vmatpush3.bf16.msra.mxu0 %v12989_v35  ;;  %10191 = vmatprep.subr.bf16.mxu1 %v10190_v20  ;;  %v3456_v56 = vand.u32 4294901760, %v3455_v16  ;;  %v3463_v23 = vand.u32 4294901760, %v3462_v59  ;;  %v3220_v13 = vand.u32 4294901760, %v3219_v28  ;;  %v10196_v24 = vpack.c.bf16 %v3337_v1, %v3330_v49 }
 0x17c   :  { %v3228_v63 = vsub.f32 %v13068_v42, %v16248_v37  ;;  %10167 = vmatprep.subr.bf16.mxu0 %v13090_v54  ;;  %v1164_v39 = vadd.f32 %v7927_v7, %v12946_v5  ;;  %v7962_v53 = vadd.f32 %v7961_v43, %v7960_v38  ;;  %v16249_v52 = vand.u32 4294901760, %v13081_v25  ;;  %v7963_v5 = vpop.f32.mrb[10].mxu1 }
 0x17d   :  { %v3344_v8 = vand.u32 4294901760, %v3343_v47  ;;  %v3351_v37 = vand.u32 4294901760, %v3350_v0  ;;  %v10204_v16 = vpack.c.bf16 %v12703_v10, %v12700_v4  ;;  %v10198_v28 = vpack.c.bf16 %v3463_v23, %v3456_v56  ;;  %v7964_v49 = vpop.f32.mrb[11].mxu1  ;;  %v16254_v56 = vld [vmem:[#allocation25_spill] sm:$0xff] }
 0x17e   :  { %10193 = vmatpush3.bf16.msra.mxu1 %v10192_v18  ;;  %v3234_v20 = vsub.f32 %v13081_v25, %v16249_v52  ;;  %v3229_v59 = vand.u32 4294901760, %v3228_v63  ;;  %v1268_v54 = vadd.f32 %v7962_v53, %v1157_v55  ;;  %v10206_v43 = vpack.c.bf16 %v12750_v2, %v12747_v57  ;;  %v16250_v53 = vld [vmem:[#allocation11_spill] sm:$0xff]  ;;  %v16252_v63 = vld [vmem:[#allocation13_spill] sm:$0xff] }
 0x17f   :  { %10169 = vmatpush3.bf16.msra.mxu0 %v13092_v17  ;;  %10195 = vmatprep.subr.bf16.mxu1 %v10194_v33  ;;  %v7965_v1 = vadd.f32 %v7964_v49, %v7963_v5  ;;  %v10200_v18 = vpack.c.bf16 %v3351_v37, %v3344_v8  ;;  %v10208_v0 = vpack.c.bf16 %v12794_v3, %v12788_v31  ;;  %v16251_v33 = vld [vmem:[#allocation16_spill] sm:$0xff]  ;;  %v16258_v52 = vld [vmem:[#allocation29_spill] sm:$0xff] }
 0x180   :  { %10203 = vmatprep.subr.bf16.mxu0 %v10202_v21  ;;  %v3235_v47 = vand.u32 4294901760, %v3234_v20  ;;  %v10210_v55 = vpack.c.bf16 %v12808_v50, %v12806_v44  ;;  %v10212_v38 = vpack.c.bf16 %v16252_v63, %v16251_v33  ;;  %v16253_v21 = vld [vmem:[#allocation15_spill] sm:$0xff]  ;;  %v10218_v8 = vpack.c.bf16 %v12883_v15, %v12878_v48  ;;  %v16259_v37 = vld [vmem:[#allocation20_spill] sm:$0xff] }
 0x181   :  { %v1275_v7 = vadd.f32 %v7965_v1, %v1164_v39  ;;  %v10214_v23 = vpack.c.bf16 %v16254_v56, %v16253_v21  ;;  %v16256_v39 = vld [vmem:[#allocation19_spill] sm:$0xff]  ;;  %v10222_v5 = vpack.c.bf16 %v12932_v29, %v12911_v45 }
 0x182   :  { %3221 = vmatmul.mubr.f32.vlgmr.msra.gmra.mrb[36].mxu0 %v3220_v13  ;;  %10197 = vmatpush3.bf16.msra.mxu1 %v10196_v24  ;;  %v16255_v13 = vld [vmem:[#allocation22_spill] sm:$0xff]  ;;  %v16257_v24 = vld [vmem:[#allocation28_spill] sm:$0xff]  ;;  %v16263_v1 = vld [vmem:[#allocation23_spill] sm:$0xff] }
 0x183   :  { %10205 = vmatpush3.bf16.msra.mxu0 %v10204_v16  ;;  %3230 = vmatprep.mubr.f32.mxu0 %v3229_v59  ;;  %v10216_v20 = vpack.c.bf16 %v16258_v52, %v16257_v24  ;;  %v16260_v16 = vand.u32 4294901760, %v16255_v13  ;;  %v10220_v59 = vpack.c.bf16 %v12908_v6, %v12902_v30 }
 0x184   :  { %10199 = vmatprep.subr.bf16.mxu1 %v10198_v28  ;;  %10207 = vmatprep.subr.bf16.mxu0 %v10206_v43  ;;  %v16261_v28 = vld [vmem:[#allocation14_spill] sm:$0xff]  ;;  %v16262_v43 = vld [vmem:[#allocation21_spill] sm:$0xff] }
 0x185   :  { %v10224_v49 = vpack.c.bf16 %v16262_v43, %v12954_v51 }
 0x186   :  { %3236 = vmatmul.mubr.f32.gmra.mrb[38].mxu0 %v3235_v47  ;;  %10201 = vmatpush3.bf16.msra.mxu1 %v10200_v18  ;;  %v16264_v47 = vld [vmem:[#allocation12_spill] sm:$0xff] }
 0x187   :  { %10209 = vmatpush3.bf16.msra.mxu0 %v10208_v0  ;;  %10235 = vmatprep.subr.bf16.mxu1 %v16250_v53  ;;  %v10226_v18 = vpack.c.bf16 %v16264_v47, %v16263_v1 }
 0x188   :  { %10211 = vmatprep.subr.bf16.mxu0 %v10210_v55  ;;  %3610 = vmatprep.mubr.f32.mxu0 %v16255_v13  ;;  %v16266_v13 = vld [vmem:[#allocation26_spill] sm:$0xff] }
 0x189   :  { %3468 = vmatmul.mubr.f32.vlgmr.msra.gmra.mrb[36].mxu1 %v13022_v26 }
 0x18a   :  { %10237 = vmatpush3.bf16.msra.mxu1 %v12776_v27  ;;  %3473 = vmatprep.mubr.f32.mxu1 %v13033_v34  ;;  %v16267_v34 = vld [vmem:[#allocation18_spill] sm:$0xff] }
 0x18b   :  { %10213 = vmatpush3.bf16.msra.mxu0 %v10212_v38  ;;  %10239 = vmatprep.subr.bf16.mxu1 %v16256_v39  ;;  %v16265_v38 = vld [vmem:[#allocation24_spill] sm:$0xff] }
 0x18c   :  { %10215 = vmatprep.subr.bf16.mxu0 %v10214_v23 }
 0x18d   :  { %3475 = vmatmul.mubr.f32.gmra.mrb[38].mxu1 %v13057_v61 }
 0x18e   :  { %10241 = vmatpush3.bf16.msra.mxu1 %v16259_v37  ;;  %3726 = vmatprep.mubr.f32.mxu1 %v16260_v16 }
 0x18f   :  { %10217 = vmatpush3.bf16.msra.mxu0 %v10216_v20  ;;  %10243 = vmatprep.subr.bf16.mxu1 %v12804_v46  ;;  %v10228_v20 = vpack.c.bf16 %v12995_v58, %v12991_v9 }
 0x190   :  { %10219 = vmatprep.subr.bf16.mxu0 %v10218_v8  ;;  %v10230_v8 = vpack.c.bf16 %v13037_v60, %v13019_v11 }
 0x192   :  { %10245 = vmatpush3.bf16.msra.mxu1 %v12831_v32  ;;  %v7998_v0 = vpop.f32.mrb[12].mxu0 }
 0x193   :  { %10221 = vmatpush3.bf16.msra.mxu0 %v10220_v59  ;;  %10247 = vmatprep.subr.bf16.mxu1 %v16261_v28  ;;  %v7999_v55 = vpop.f32.mrb[13].mxu0 }
 0x194   :  { %10223 = vmatprep.subr.bf16.mxu0 %v10222_v5  ;;  %v8000_v23 = vadd.f32 %v7999_v55, %v7998_v0  ;;  %v13166_v5 = vld [vmem:[#allocation5 + $0x480] sm:$0xff]  ;;  %v13172_v0 = vld [vmem:[#allocation5 + $0x488] sm:$0xff]  ;;  %v16268_v55 = vand.u32 4294901760, %v12672_v36  ;;  %v16270_v36 = vand.u32 4294901760, %v12700_v4  ;;  %v13203_v4 = vld [vmem:[#allocation5 + $0x498] sm:$0xff] }
 0x196   :  { %10249 = vmatpush3.bf16.msra.mxu1 %v16265_v38  ;;  %v1387_v16 = vadd.f32 %v8000_v23, %v1268_v54  ;;  %v8001_v59 = vpop.f32.mrb[14].mxu0  ;;  %v16269_v54 = vand.u32 4294901760, %v12677_v14  ;;  %v16271_v14 = vand.u32 4294901760, %v12703_v10 }
 0x197   :  { %10225 = vmatpush3.bf16.msra.mxu0 %v10224_v49  ;;  %10251 = vmatprep.subr.bf16.mxu1 %v16266_v13  ;;  %v8002_v61 = vpop.f32.mrb[15].mxu0  ;;  %v10232_v49 = vpack.c.bf16 %v13052_v40, %v13049_v22  ;;  %v15703_v13 = vand.u32 4294901760, %v13166_v5 }
 0x198   :  { %10227 = vmatprep.subr.bf16.mxu0 %v10226_v18  ;;  %v8003_v26 = vadd.f32 %v8002_v61, %v8001_v59  ;;  %v8036_v18 = vpop.f32.mrb[12].mxu1  ;;  %v10266_v23 = vpack.c.bf16 %v16269_v54, %v16268_v55  ;;  %v13181_v59 = vld [vmem:[#allocation5 + $0x400] sm:$0xff]  ;;  %v13201_v54 = vld [vmem:[#allocation5 + $0x490] sm:$0xff] }
 0x19a   :  { %10253 = vmatpush3.bf16.msra.mxu1 %v16267_v34  ;;  %v1402_v38 = vadd.f32 %v8003_v26, %v1275_v7  ;;  %v8037_v34 = vpop.f32.mrb[13].mxu1  ;;  %v16273_v7 = vand.u32 4294901760, %v12750_v2  ;;  %v16275_v2 = vand.u32 4294901760, %v12794_v3  ;;  %v4087_v3 = vand.u32 4294901760, %v13201_v54 }
 0x19b   :  { %10229 = vmatpush3.bf16.msra.mxu0 %v10228_v20  ;;  %10255 = vmatprep.subr.bf16.mxu1 %v12930_v19  ;;  %v8038_v61 = vadd.f32 %v8037_v34, %v8036_v18  ;;  %v15704_v20 = vand.u32 4294901760, %v13172_v0  ;;  %v13183_v19 = vld [vmem:[#allocation5 + $0x408] sm:$0xff]  ;;  %v16272_v34 = vand.u32 4294901760, %v12747_v57  ;;  %v16274_v57 = vand.u32 4294901760, %v12788_v31 }
 0x19c   :  { %10231 = vmatprep.subr.bf16.mxu0 %v10230_v8  ;;  %v10268_v8 = vpack.c.bf16 %v16271_v14, %v16270_v36  ;;  %v8039_v26 = vpop.f32.mrb[14].mxu1  ;;  %v16279_v31 = vand.u32 4294901760, %v16252_v63 }
 0x19d   :  { %v13190_v55 = vadd.f32 %v8038_v61, %v1387_v16  ;;  %v10270_v18 = vpack.c.bf16 %v16273_v7, %v16272_v34  ;;  %v8040_v10 = vpop.f32.mrb[15].mxu1  ;;  %v4033_v16 = vand.u32 4294901760, %v13181_v59  ;;  %v4036_v61 = vand.u32 4294901760, %v13183_v19 }
 0x19e   :  { %10257 = vmatpush3.bf16.msra.mxu1 %v12952_v41  ;;  %v10272_v36 = vpack.c.bf16 %v16275_v2, %v16274_v57  ;;  %v13216_v14 = vsub.f32 %v13172_v0, %v15704_v20  ;;  %v16276_v34 = vand.u32 4294901760, %v12806_v44  ;;  %v4090_v57 = vand.u32 4294901760, %v13203_v4  ;;  %v16280_v20 = vld [vmem:[#allocation33_spill] sm:$0xff] }
 0x19f   :  { %10233 = vmatpush3.bf16.msra.mxu0 %v10232_v49  ;;  %10259 = vmatprep.subr.bf16.mxu1 %v12972_v62  ;;  %v13199_v49 = vsub.f32 %v13166_v5, %v15703_v13  ;;  %v16282_v44 = vand.u32 4294901760, %v16254_v56  ;;  %v16288_v56 = vand.u32 4294901760, %v12908_v6  ;;  %v16291_v6 = vand.u32 4294901760, %v12954_v51 }
 0x1a0   :  { %10267 = vmatprep.subr.bf16.mxu0 %v10266_v23  ;;  %v8041_v23 = vadd.f32 %v8040_v10, %v8039_v26  ;;  %v16277_v26 = vand.u32 4294901760, %v12808_v50  ;;  %v16278_v10 = vand.u32 4294901760, %v16251_v33  ;;  %v16284_v33 = vand.u32 4294901760, %v16258_v52 }
 0x1a1   :  { %v13259_v52 = vsub.f32 %v13183_v19, %v4036_v61  ;;  %v16293_v19 = vand.u32 4294901760, %v16263_v1  ;;  %v16296_v51 = vand.u32 4294901760, %v12995_v58  ;;  %v13293_v1 = vsub.f32 %v13203_v4, %v4090_v57 }
 0x1a2   :  { %3613 = vmatmul.mubr.f32.vlgmr.msra.gmra.mrb[40].mxu0 %v13043_v12  ;;  %10261 = vmatpush3.bf16.msra.mxu1 %v12989_v35  ;;  %v10274_v7 = vpack.c.bf16 %v16277_v26, %v16276_v34  ;;  %v10276_v13 = vpack.c.bf16 %v16279_v31, %v16278_v10  ;;  %v13229_v2 = vadd.f32 %v8041_v23, %v1402_v38  ;;  %v16283_v34 = vand.u32 4294901760, %v16257_v24  ;;  %v234_v26 = vld [vmem:[#allocation5 + $0x410] sm:$0xff] }
 0x1a3   :  { %10269 = vmatpush3.bf16.msra.mxu0 %v10268_v8  ;;  %3619 = vmatprep.mubr.f32.mxu0 %v13068_v42  ;;  %v16281_v8 = vand.u32 4294901760, %v16253_v21  ;;  %v15713_v10 = vand.u32 4294901760, %v13199_v49  ;;  %v16285_v38 = vand.u32 4294901760, %v12878_v48  ;;  %v16286_v23 = vand.u32 4294901760, %v12883_v15 }
 0x1a4   :  { %10263 = vmatprep.subr.bf16.mxu1 %v16280_v20  ;;  %10271 = vmatprep.subr.bf16.mxu0 %v10270_v18  ;;  %v13240_v63 = vpack.c.bf16 %v16284_v33, %v16283_v34  ;;  %v16287_v21 = vand.u32 4294901760, %v12902_v30  ;;  %v13256_v24 = vsub.f32 %v13181_v59, %v4033_v16  ;;  %v16289_v15 = vand.u32 4294901760, %v12911_v45 }
 0x1a5   :  { %v10278_v50 = vpack.c.bf16 %v16282_v44, %v16281_v8  ;;  %v13247_v31 = vpack.c.bf16 %v16286_v23, %v16285_v38  ;;  %v235_v8 = vld [vmem:[#allocation5 + $0x418] sm:$0xff]  ;;  %v16290_v48 = vand.u32 4294901760, %v12932_v29  ;;  %v16292_v44 = vand.u32 4294901760, %v16262_v43  ;;  %v252_v38 = vld [vmem:[#allocation5 + $0x4a0] sm:$0xff]  ;;  %v253_v23 = vld [vmem:[#allocation5 + $0x4a8] sm:$0xff] }
 0x1a6   :  { %v13253_v18 = vpack.c.bf16 %v16288_v56, %v16287_v21  ;;  %3622 = vmatmul.mubr.f32.gmra.mrb[42].mxu0 %v13081_v25  ;;  %10265 = vmatpush3.bf16.msra.mxu1 %v13092_v17  ;;  %v16294_v34 = vand.u32 4294901760, %v16264_v47  ;;  %v15709_v45 = vand.u32 4294901760, %v13216_v14  ;;  %v16295_v29 = vand.u32 4294901760, %v12991_v9  ;;  %v236_v56 = vld [vmem:[#allocation5 + $0x420] sm:$0xff] }
 0x1a7   :  { %v13267_v30 = vpack.c.bf16 %v16290_v48, %v16289_v15  ;;  %v13273_v59 = vpack.c.bf16 %v16292_v44, %v16291_v6  ;;  %10273 = vmatpush3.bf16.msra.mxu0 %v10272_v36  ;;  %10299 = vmatprep.subr.bf16.mxu1 %v16250_v53  ;;  %v13290_v21 = vsub.f32 %v13201_v54, %v4087_v3  ;;  %v4039_v47 = vand.u32 4294901760, %v234_v26  ;;  %v237_v15 = vld [vmem:[#allocation5 + $0x428] sm:$0xff]  ;;  %v16301_v54 = vld [vmem:[#allocation27_spill] sm:$0xff] }
 0x1a8   :  { %v13279_v33 = vpack.c.bf16 %v16294_v34, %v16293_v19  ;;  %v13287_v43 = vpack.c.bf16 %v16296_v51, %v16295_v29  ;;  %10275 = vmatprep.subr.bf16.mxu0 %v10274_v7  ;;  %v16297_v36 = vand.u32 4294901760, %v13019_v11  ;;  %v16298_v53 = vand.u32 4294901760, %v13037_v60  ;;  %3907 = vmatprep.mubr.f32.mxu0 %v16301_v54 }
 0x1a9   :  { %v16299_v9 = vand.u32 4294901760, %v13049_v22  ;;  %v16300_v58 = vand.u32 4294901760, %v13052_v40  ;;  %v4042_v4 = vand.u32 4294901760, %v235_v8  ;;  %v4275_v44 = vsub.f32 %v13199_v49, %v15713_v10 }
 0x1aa   :  { %v13299_v48 = vpack.c.bf16 %v16298_v53, %v16297_v36  ;;  %v16302_v7 = vand.u32 4294901760, %v13043_v12  ;;  %v4093_v11 = vand.u32 4294901760, %v252_v38  ;;  %v4096_v60 = vand.u32 4294901760, %v253_v23 }
 0x1ab   :  { %v13305_v6 = vpack.c.bf16 %v16300_v58, %v16299_v9  ;;  %v15707_v19 = vand.u32 4294901760, %v13256_v24  ;;  %v15705_v22 = vand.u32 4294901760, %v13259_v52  ;;  %v16303_v40 = vand.u32 4294901760, %v13068_v42  ;;  %10277 = vmatpush3.bf16.msra.mxu0 %v10276_v13  ;;  %v254_v42 = vld [vmem:[#allocation5 + $0x4b0] sm:$0xff]  ;;  %v255_v13 = vld [vmem:[#allocation5 + $0x4b8] sm:$0xff] }
 0x1ac   :  { %3730 = vmatmul.mubr.f32.vlgmr.msra.gmra.mrb[40].mxu1 %v16302_v7  ;;  %v16304_v34 = vand.u32 4294901760, %v13166_v5  ;;  %v16305_v29 = vand.u32 4294901760, %v13172_v0  ;;  %v4282_v12 = vsub.f32 %v13216_v14, %v15709_v45  ;;  %v4045_v36 = vand.u32 4294901760, %v236_v56  ;;  %10279 = vmatprep.subr.bf16.mxu0 %v10278_v50 }
 0x1ad   :  { %10301 = vmatpush3.bf16.msra.mxu1 %v12776_v27  ;;  %3737 = vmatprep.mubr.f32.mxu1 %v16303_v40  ;;  %v4048_v53 = vand.u32 4294901760, %v237_v15  ;;  %v13328_v9 = vpack.c.bf16 %v4036_v61, %v4033_v16  ;;  %v13330_v27 = vsub.f32 %v234_v26, %v4039_v47  ;;  %v15706_v5 = vand.u32 4294901760, %v13290_v21 }
 0x1ae   :  { %v13322_v51 = vpack.c.bf16 %v16305_v29, %v16304_v34  ;;  %10303 = vmatprep.subr.bf16.mxu1 %v16256_v39  ;;  %v15708_v0 = vand.u32 4294901760, %v13293_v1  ;;  %v13334_v58 = vpack.c.bf16 %v4090_v57, %v4087_v3  ;;  %v13336_v7 = vpack.c.bf16 %v4042_v4, %v4039_v47  ;;  %v49_v57 = vld [vmem:[#allocation2 + $0x48] sm:$0xff]  ;;  %v238_v47 = vld [vmem:[#allocation5 + $0x430] sm:$0xff] }
 0x1af   :  { %v13338_v40 = vsub.f32 %v235_v8, %v4042_v4  ;;  %v4276_v34 = vand.u32 4294901760, %v4275_v44  ;;  %v16308_v39 = vand.u32 4294901760, %v13081_v25  ;;  %v13342_v16 = vpack.c.bf16 %v4096_v60, %v4093_v11  ;;  %v239_v4 = vld [vmem:[#allocation5 + $0x438] sm:$0xff]  ;;  %10281 = vmatpush3.bf16.msra.mxu0 %v13240_v63 }
 0x1b0   :  { %16306 = vst [vmem:[#allocation11_spill] sm:$0xff] %v13336_v7  ;;  %v13344_v61 = vsub.f32 %v252_v38, %v4093_v11  ;;  %v4163_v26 = vsub.f32 %v13256_v24, %v15707_v19  ;;  %v4170_v3 = vsub.f32 %v13259_v52, %v15705_v22  ;;  %v13354_v50 = vsub.f32 %v253_v23, %v4096_v60  ;;  %v257_v19 = vld [vmem:[#allocation5 + $0x4c8] sm:$0xff] }
 0x1b1   :  { %16307 = vst [vmem:[#allocation16_spill] sm:$0xff] %v13338_v40  ;;  %3741 = vmatmul.mubr.f32.gmra.mrb[42].mxu1 %v16308_v39  ;;  %v4283_v25 = vand.u32 4294901760, %v4282_v12  ;;  %v13356_v8 = vpack.c.bf16 %v4048_v53, %v4045_v36  ;;  %v4099_v38 = vand.u32 4294901760, %v254_v42  ;;  %v4102_v44 = vand.u32 4294901760, %v255_v13  ;;  %10283 = vmatprep.subr.bf16.mxu0 %v13247_v31 }
 0x1b2   :  { %16309 = vst [vmem:[#allocation13_spill] sm:$0xff] %v13344_v61  ;;  %10305 = vmatpush3.bf16.msra.mxu1 %v16259_v37  ;;  %4018 = vmatprep.mubr.f32.mxu1 %v16301_v54  ;;  %16310 = vst [vmem:[#allocation15_spill] sm:$0xff] %v13354_v50  ;;  %v4289_v11 = vsub.f32 %v13290_v21, %v15706_v5  ;;  %v4296_v37 = vsub.f32 %v13293_v1, %v15708_v0  ;;  %v15710_v23 = vand.u32 4294901760, %v13330_v27  ;;  %v256_v5 = vld [vmem:[#allocation5 + $0x4c0] sm:$0xff] }
 0x1b3   :  { %16311 = vst [vmem:[#allocation25_spill] sm:$0xff] %v13356_v8  ;;  %10307 = vmatprep.subr.bf16.mxu1 %v12804_v46  ;;  %v13368_v54 = vsub.f32 %v236_v56, %v4045_v36  ;;  %v13370_v60 = vsub.f32 %v237_v15, %v4048_v53  ;;  %v15711_v63 = vand.u32 4294901760, %v13338_v40  ;;  %v81_v46 = vmul.f32 %v49_v57, %v49_v57 }
 0x1b4   :  { %v4164_v29 = vand.u32 4294901760, %v4163_v26  ;;  %v4171_v12 = vand.u32 4294901760, %v4170_v3  ;;  %v4051_v39 = vand.u32 4294901760, %v238_v47  ;;  %v4054_v22 = vand.u32 4294901760, %v239_v4  ;;  %10285 = vmatpush3.bf16.msra.mxu0 %v13253_v18  ;;  %v8074_v18 = vpop.f32.mrb[16].mxu0 }
 0x1b5   :  { %v13374_v0 = vpack.c.bf16 %v4283_v25, %v4276_v34  ;;  %v13376_v45 = vsub.f32 %v254_v42, %v4099_v38  ;;  %v15712_v31 = vand.u32 4294901760, %v13344_v61  ;;  %v15714_v56 = vand.u32 4294901760, %v13354_v50  ;;  %10287 = vmatprep.subr.bf16.mxu0 %v13267_v30  ;;  %v16318_v30 = vld [vmem:[#allocation24_spill] sm:$0xff] }
 0x1b6   :  { %10309 = vmatpush3.bf16.msra.mxu1 %v12831_v32  ;;  %v13382_v15 = vpack.c.bf16 %v4102_v44, %v4099_v38  ;;  %v4290_v36 = vand.u32 4294901760, %v4289_v11  ;;  %v4297_v53 = vand.u32 4294901760, %v4296_v37  ;;  %v4177_v32 = vsub.f32 %v13330_v27, %v15710_v23  ;;  %v240_v11 = vld [vmem:[#allocation5 + $0x440] sm:$0xff]  ;;  %v8075_v37 = vpop.f32.mrb[17].mxu0 }
 0x1b7   :  { %16312 = vst [vmem:[#allocation22_spill] sm:$0xff] %v13376_v45  ;;  %10311 = vmatprep.subr.bf16.mxu1 %v16261_v28  ;;  %v4184_v42 = vsub.f32 %v13338_v40, %v15711_v63  ;;  %v4105_v34 = vand.u32 4294901760, %v256_v5  ;;  %v4108_v26 = vand.u32 4294901760, %v257_v19  ;;  %v13391_v3 = vand.u32 4294901760, %v81_v46 }
 0x1b8   :  { %16313 = vst [vmem:[#allocation19_spill] sm:$0xff] %v13382_v15  ;;  %v13393_v28 = vpack.c.bf16 %v4171_v12, %v4164_v29  ;;  %v13395_v57 = vsub.f32 %v255_v13, %v4102_v44  ;;  %v13397_v25 = vpack.c.bf16 %v4054_v22, %v4051_v39  ;;  %v13399_v38 = vsub.f32 %v238_v47, %v4051_v39  ;;  %v241_v13 = vld [vmem:[#allocation5 + $0x448] sm:$0xff]  ;;  %v258_v12 = vld [vmem:[#allocation5 + $0x4d0] sm:$0xff] }
 0x1b9   :  { %16314 = vst [vmem:[#allocation28_spill] sm:$0xff] %v13391_v3  ;;  %v13402_v23 = vsub.f32 %v239_v4, %v4054_v22  ;;  %v4303_v63 = vsub.f32 %v13344_v61, %v15712_v31  ;;  %v4310_v29 = vsub.f32 %v13354_v50, %v15714_v56  ;;  %v8076_v47 = vadd.f32 %v8075_v37, %v8074_v18  ;;  %v16320_v39 = vld [vmem:[#allocation26_spill] sm:$0xff]  ;;  %v8077_v37 = vpop.f32.mrb[18].mxu0 }
 0x1ba   :  { %16315 = vst [vmem:[#allocation29_spill] sm:$0xff] %v13395_v57  ;;  %16316 = vst [vmem:[#allocation20_spill] sm:$0xff] %v13397_v25  ;;  %10313 = vmatpush3.bf16.msra.mxu1 %v16318_v30  ;;  %10289 = vmatpush3.bf16.msra.mxu0 %v13273_v59  ;;  %v13413_v30 = vpack.c.bf16 %v4297_v53, %v4290_v36  ;;  %v4178_v22 = vand.u32 4294901760, %v4177_v32  ;;  %v4185_v31 = vand.u32 4294901760, %v4184_v42  ;;  %v4057_v56 = vand.u32 4294901760, %v240_v11  ;;  %v259_v36 = vld [vmem:[#allocation5 + $0x4d8] sm:$0xff] }
 0x1bb   :  { %16317 = vst [vmem:[#allocation14_spill] sm:$0xff] %v13399_v38  ;;  %16319 = vst [vmem:[#allocation21_spill] sm:$0xff] %v13402_v23  ;;  %10315 = vmatprep.subr.bf16.mxu1 %v16320_v39  ;;  %10291 = vmatprep.subr.bf16.mxu0 %v13279_v33  ;;  %v13417_v10 = vpack.c.bf16 %v4108_v26, %v4105_v34  ;;  %v13420_v50 = vsub.f32 %v81_v46, %v13391_v3  ;;  %v4060_v39 = vand.u32 4294901760, %v241_v13  ;;  %v8078_v32 = vpop.f32.mrb[19].mxu0  ;;  %v16323_v44 = vld [vmem:[#allocation18_spill] sm:$0xff] }
 0x1bc   :  { %v1779_v18 = vadd.f32 %v8076_v47, %v13190_v55  ;;  %v13423_v59 = vsub.f32 %v256_v5, %v4105_v34  ;;  %v4111_v53 = vand.u32 4294901760, %v258_v12  ;;  %v13426_v4 = vsub.f32 %v257_v19, %v4108_v26  ;;  %v16326_v55 = vld [vmem:[#allocation17_spill] sm:$0xff]  ;;  %v8112_v26 = vpop.f32.mrb[16].mxu1  ;;  %v242_v19 = vld [vmem:[#allocation5 + $0x450] sm:$0xff] }
 0x1bd   :  { %16321 = vst [vmem:[#allocation23_spill] sm:$0xff] %v13417_v10  ;;  %16322 = vst [vmem:[#allocation12_spill] sm:$0xff] %v13420_v50  ;;  %v4304_v33 = vand.u32 4294901760, %v4303_v63  ;;  %v4311_v42 = vand.u32 4294901760, %v4310_v29  ;;  %v16325_v61 = vand.u32 4294901760, %v13368_v54  ;;  %v8079_v40 = vadd.f32 %v8078_v32, %v8077_v37  ;;  %v8113_v37 = vpop.f32.mrb[17].mxu1 }
 0x1be   :  { %10317 = vmatpush3.bf16.msra.mxu1 %v16323_v44  ;;  %16324 = vst [vmem:[#allocation33_spill] sm:$0xff] %v13426_v4  ;;  %10293 = vmatpush3.bf16.msra.mxu0 %v13287_v43  ;;  %v16327_v5 = vand.u32 4294901760, %v13370_v60  ;;  %v13439_v63 = vpack.c.bf16 %v4185_v31, %v4178_v22  ;;  %v13441_v29 = vsub.f32 %v240_v11, %v4057_v56  ;;  %v15723_v43 = vand.u32 4294901760, %v13420_v50  ;;  %v243_v31 = vld [vmem:[#allocation5 + $0x458] sm:$0xff]  ;;  %v16332_v22 = vld [vmem:[#allocation30_spill] sm:$0xff] }
 0x1bf   :  { %v4191_v46 = vsub.f32 %v13368_v54, %v16325_v61  ;;  %10319 = vmatprep.subr.bf16.mxu1 %v16326_v55  ;;  %10295 = vmatprep.subr.bf16.mxu0 %v13299_v48  ;;  %v4114_v61 = vand.u32 4294901760, %v259_v36  ;;  %v1788_v44 = vadd.f32 %v8079_v40, %v13229_v2  ;;  %v13445_v32 = vpack.c.bf16 %v4060_v39, %v4057_v56 }
 0x1c0   :  { %v4198_v34 = vsub.f32 %v13370_v60, %v16327_v5  ;;  %v13447_v55 = vsub.f32 %v241_v13, %v4060_v39  ;;  %v13449_v5 = vsub.f32 %v258_v12, %v4111_v53  ;;  %v8114_v47 = vadd.f32 %v8113_v37, %v8112_v26  ;;  %v260_v26 = vld [vmem:[#allocation5 + $0x4e0] sm:$0xff] }
 0x1c1   :  { %16328 = vst [vmem:[#allocation27_spill] sm:$0xff] %v13445_v32  ;;  %v13452_v48 = vpack.c.bf16 %v4311_v42, %v4304_v33  ;;  %v15728_v11 = vand.u32 4294901760, %v13399_v38  ;;  %v4192_v2 = vand.u32 4294901760, %v4191_v46  ;;  %v16329_v56 = vand.u32 4294901760, %v13376_v45  ;;  %v8115_v33 = vpop.f32.mrb[18].mxu1 }
 0x1c2   :  { %10321 = vmatpush3.bf16.msra.mxu1 %v12952_v41  ;;  %10297 = vmatpush3.bf16.msra.mxu0 %v13305_v6  ;;  %v4199_v40 = vand.u32 4294901760, %v4198_v34  ;;  %v16330_v12 = vand.u32 4294901760, %v13395_v57  ;;  %v13464_v39 = vadd.f32 %v8114_v47, %v1779_v18  ;;  %v13467_v42 = vpack.c.bf16 %v4114_v61, %v4111_v53  ;;  %v8116_v34 = vpop.f32.mrb[19].mxu1 }
 0x1c3   :  { %10323 = vmatprep.subr.bf16.mxu1 %v12972_v62  ;;  %v4317_v13 = vsub.f32 %v13376_v45, %v16329_v56  ;;  %10331 = vmatprep.subr.bf16.mxu0 %v13322_v51  ;;  %v4063_v6 = vand.u32 4294901760, %v242_v19  ;;  %v261_v62 = vld [vmem:[#allocation5 + $0x4e8] sm:$0xff]  ;;  %v4131_v46 = vsub.f32 %v13420_v50, %v15723_v43  ;;  %v13472_v37 = vsub.f32 %v259_v36, %v4114_v61  ;;  %v16334_v36 = vld [vmem:[#allocation31_spill] sm:$0xff] }
 0x1c4   :  { %v4324_v41 = vsub.f32 %v13395_v57, %v16330_v12  ;;  %16331 = vst [vmem:[#allocation24_spill] sm:$0xff] %v13467_v42  ;;  %v4066_v56 = vand.u32 4294901760, %v243_v31  ;;  %v8117_v47 = vadd.f32 %v8116_v34, %v8115_v33  ;;  %v4205_v53 = vsub.f32 %v13399_v38, %v15728_v11  ;;  %v244_v34 = vld [vmem:[#allocation5 + $0x460] sm:$0xff]  ;;  %v245_v50 = vld [vmem:[#allocation5 + $0x468] sm:$0xff] }
 0x1c5   :  { %3909 = vmatmul.mubr.f32.vlgmr.msra.gmra.mrb[44].mxu0 %v16332_v22  ;;  %v16333_v57 = vand.u32 4294901760, %v13402_v23  ;;  %v4318_v61 = vand.u32 4294901760, %v4317_v13  ;;  %v4117_v18 = vand.u32 4294901760, %v260_v26  ;;  %v4120_v33 = vand.u32 4294901760, %v261_v62 }
 0x1c6   :  { %10325 = vmatpush3.bf16.msra.mxu1 %v12989_v35  ;;  %10333 = vmatpush3.bf16.msra.mxu0 %v13328_v9  ;;  %v4325_v12 = vand.u32 4294901760, %v4324_v41  ;;  %v13486_v45 = vadd.f32 %v8117_v47, %v1788_v44  ;;  %v13490_v35 = vpack.c.bf16 %v4199_v40, %v4192_v2  ;;  %v13492_v11 = vsub.f32 %v242_v19, %v4063_v6 }
 0x1c7   :  { %v4212_v43 = vsub.f32 %v13402_v23, %v16333_v57  ;;  %3914 = vmatprep.mubr.f32.mxu0 %v16334_v36  ;;  %10327 = vmatprep.subr.bf16.mxu1 %v16280_v20  ;;  %v4132_v57 = vand.u32 4294901760, %v4131_v46  ;;  %v13494_v23 = vpack.c.bf16 %v4066_v56, %v4063_v6  ;;  %v13496_v38 = vsub.f32 %v243_v31, %v4066_v56  ;;  %v16338_v20 = vld [vmem:[#allocation32_spill] sm:$0xff]  ;;  %v13506_v6 = vld [vmem:[#allocation5 + $0x4f0] sm:$0xff]  ;;  %v48_v31 = vld [vmem:[#allocation2 + $0x40] sm:$0xff] }
 0x1c8   :  { %10335 = vmatprep.subr.bf16.mxu0 %v13334_v58  ;;  %v16336_v13 = vand.u32 4294901760, %v13423_v59  ;;  %v16337_v44 = vand.u32 4294901760, %v13426_v4  ;;  %v4206_v2 = vand.u32 4294901760, %v4205_v53  ;;  %v4069_v40 = vand.u32 4294901760, %v244_v34 }
 0x1c9   :  { %16335 = vst [vmem:[#allocation26_spill] sm:$0xff] %v13496_v38  ;;  %3916 = vmatmul.mubr.f32.gmra.mrb[46].mxu0 %v16338_v20  ;;  %v4213_v19 = vand.u32 4294901760, %v4212_v43  ;;  %v4072_v46 = vand.u32 4294901760, %v245_v50  ;;  %v13510_v56 = vpack.c.bf16 %v4325_v12, %v4318_v61  ;;  %v15737_v43 = vand.u32 4294901760, %v13447_v55 }
 0x1ca   :  { %v4331_v41 = vsub.f32 %v13423_v59, %v16336_v13  ;;  %v4338_v47 = vsub.f32 %v13426_v4, %v16337_v44  ;;  %10329 = vmatpush3.bf16.msra.mxu1 %v13092_v17  ;;  %10337 = vmatpush3.bf16.msra.mxu0 %v13336_v7  ;;  %v13512_v13 = vpack.c.bf16 %v4120_v33, %v4117_v18  ;;  %v15738_v7 = vand.u32 4294901760, %v13472_v37 }
 0x1cb   :  { %10363 = vmatprep.subr.bf16.mxu1 %v13374_v0  ;;  %v13514_v44 = vsub.f32 %v260_v26, %v4117_v18  ;;  %10339 = vmatprep.subr.bf16.mxu0 %v13342_v16  ;;  %v13518_v17 = vsub.f32 %v261_v62, %v4120_v33  ;;  %v65_v0 = vld [vmem:[#allocation2 + $0xc8] sm:$0xff]  ;;  %v13524_v26 = vld [vmem:[#allocation5 + $0x4f8] sm:$0xff]  ;;  %v15741_v18 = vand.u32 4294901760, %v13506_v6  ;;  %v80_v4 = vmul.f32 %v48_v31, %v48_v31 }
 0x1cc   :  { %4133 = vmatprep.mubr.f32.mxu0 %v4132_v57  ;;  %v4332_v12 = vand.u32 4294901760, %v4331_v41  ;;  %v4339_v61 = vand.u32 4294901760, %v4338_v47  ;;  %v10376_v62 = vpack.c.bf16 %v4213_v19, %v4206_v2  ;;  %v13529_v33 = vpack.c.bf16 %v4072_v46, %v4069_v40  ;;  %v13540_v47 = vld [vmem:[#allocation5 + $0x470] sm:$0xff]  ;;  %v64_v2 = vld [vmem:[#allocation2 + $0xc0] sm:$0xff] }
 0x1cd   :  { %16339 = vst [vmem:[#allocation18_spill] sm:$0xff] %v13514_v44  ;;  %16340 = vst [vmem:[#allocation17_spill] sm:$0xff] %v13518_v17  ;;  %4020 = vmatmul.mubr.f32.vlgmr.msra.gmra.mrb[44].mxu1 %v16332_v22  ;;  %v13531_v53 = vsub.f32 %v244_v34, %v4069_v40  ;;  %v13535_v22 = vsub.f32 %v245_v50, %v4072_v46  ;;  %v16341_v57 = vand.u32 4294901760, %v13441_v29  ;;  %v16342_v50 = vand.u32 4294901760, %v13449_v5 }
 0x1ce   :  { %10365 = vmatpush3.bf16.msra.mxu1 %v13393_v28  ;;  %4025 = vmatprep.mubr.f32.mxu1 %v16334_v36  ;;  %v13542_v28 = vld [vmem:[#allocation5 + $0x478] sm:$0xff]  ;;  %v97_v36 = vmul.f32 %v65_v0, %v65_v0  ;;  %v4226_v34 = vsub.f32 %v13447_v55, %v15737_v43  ;;  %v4352_v40 = vsub.f32 %v13472_v37, %v15738_v7 }
 0x1cf   :  { %10341 = vmatpush3.bf16.msra.mxu0 %v13356_v8  ;;  %10367 = vmatprep.subr.bf16.mxu1 %v13413_v30  ;;  %v4219_v41 = vsub.f32 %v13441_v29, %v16341_v57  ;;  %v4126_v30 = vand.u32 4294901760, %v13524_v26  ;;  %v4345_v19 = vsub.f32 %v13449_v5, %v16342_v50  ;;  %v10378_v46 = vpack.c.bf16 %v4339_v61, %v4332_v12 }
 0x1d0   :  { %10343 = vmatprep.subr.bf16.mxu0 %v13382_v15  ;;  %v13559_v31 = vsub.f32 %v13506_v6, %v15741_v18  ;;  %v13562_v57 = vand.u32 4294901760, %v80_v4  ;;  %v4075_v50 = vand.u32 4294901760, %v13540_v47  ;;  %v4078_v43 = vand.u32 4294901760, %v13542_v28 }
 0x1d1   :  { %4027 = vmatmul.mubr.f32.gmra.mrb[46].mxu1 %v16338_v20  ;;  %v96_v15 = vmul.f32 %v64_v2, %v64_v2  ;;  %v4220_v20 = vand.u32 4294901760, %v4219_v41  ;;  %v15752_v12 = vand.u32 4294901760, %v13514_v44  ;;  %v13573_v18 = vand.u32 4294901760, %v97_v36 }
 0x1d2   :  { %16343 = vst [vmem:[#allocation30_spill] sm:$0xff] %v13562_v57  ;;  %10369 = vmatpush3.bf16.msra.mxu1 %v13439_v63  ;;  %4384 = vmatprep.mubr.f32.mxu1 %v13391_v3  ;;  %v4227_v63 = vand.u32 4294901760, %v4226_v34  ;;  %v13577_v0 = vsub.f32 %v13524_v26, %v4126_v30  ;;  %v4346_v2 = vand.u32 4294901760, %v4345_v19  ;;  %v4353_v7 = vand.u32 4294901760, %v4352_v40 }
 0x1d3   :  { %10345 = vmatpush3.bf16.msra.mxu0 %v13397_v25  ;;  %10371 = vmatprep.subr.bf16.mxu1 %v13452_v48  ;;  %16344 = vst [vmem:[#allocation31_spill] sm:$0xff] %v13573_v18  ;;  %v16345_v3 = vand.u32 4294901760, %v13492_v11  ;;  %v13583_v48 = vsub.f32 %v80_v4, %v13562_v57  ;;  %v13589_v34 = vsub.f32 %v13540_v47, %v4075_v50  ;;  %v16346_v19 = vand.u32 4294901760, %v13496_v38 }
 0x1d4   :  { %10347 = vmatprep.subr.bf16.mxu0 %v13417_v10  ;;  %v13592_v26 = vsub.f32 %v13542_v28, %v4078_v43  ;;  %v4359_v4 = vsub.f32 %v13514_v44, %v15752_v12  ;;  %v13608_v28 = vsub.f32 %v97_v36, %v13573_v18  ;;  %v10382_v61 = vpack.c.bf16 %v4353_v7, %v4346_v2 }
 0x1d5   :  { %v4233_v25 = vsub.f32 %v13492_v11, %v16345_v3  ;;  %v4240_v40 = vsub.f32 %v13496_v38, %v16346_v19  ;;  %v13597_v3 = vand.u32 4294901760, %v96_v15  ;;  %v10380_v19 = vpack.c.bf16 %v4227_v63, %v4220_v20 }
 0x1d6   :  { %10373 = vmatpush3.bf16.msra.mxu1 %v13490_v35  ;;  %v16348_v35 = vand.u32 4294901760, %v13518_v17  ;;  %v15757_v41 = vand.u32 4294901760, %v13559_v31  ;;  %v16349_v12 = vand.u32 4294901760, %v13531_v53  ;;  %v15758_v63 = vand.u32 4294901760, %v13589_v34 }
 0x1d7   :  { %16347 = vst [vmem:[#allocation32_spill] sm:$0xff] %v13597_v3  ;;  %10349 = vmatpush3.bf16.msra.mxu0 %v13445_v32  ;;  %10375 = vmatprep.subr.bf16.mxu1 %v13510_v56  ;;  %v8150_v56 = vpop.f32.mrb[20].mxu0  ;;  %v4234_v10 = vand.u32 4294901760, %v4233_v25  ;;  %v4241_v20 = vand.u32 4294901760, %v4240_v40  ;;  %v13621_v7 = vsub.f32 %v96_v15, %v13597_v3  ;;  %v15759_v25 = vand.u32 4294901760, %v13592_v26 }
 0x1d8   :  { %v4366_v47 = vsub.f32 %v13518_v17, %v16348_v35  ;;  %10351 = vmatprep.subr.bf16.mxu0 %v13467_v42  ;;  %v4247_v44 = vsub.f32 %v13531_v53, %v16349_v12  ;;  %v16350_v35 = vand.u32 4294901760, %v13535_v22  ;;  %v8151_v17 = vpop.f32.mrb[21].mxu0  ;;  %v4360_v38 = vand.u32 4294901760, %v4359_v4 }
 0x1d9   :  { %v8152_v2 = vadd.f32 %v8151_v17, %v8150_v56  ;;  %v13632_v15 = vpack.c.bf16 %v4078_v43, %v4075_v50  ;;  %v16353_v17 = vand.u32 4294901760, %v13577_v0  ;;  %v16354_v56 = vand.u32 4294901760, %v13583_v48 }
 0x1da   :  { %v4254_v36 = vsub.f32 %v13535_v22, %v16350_v35  ;;  %10377 = vmatpush3.bf16.msra.mxu1 %v10376_v62  ;;  %v4367_v12 = vand.u32 4294901760, %v4366_v47  ;;  %v16351_v62 = vand.u32 4294901760, %v13506_v6  ;;  %v4373_v35 = vsub.f32 %v13559_v31, %v15757_v41  ;;  %v8153_v47 = vpop.f32.mrb[22].mxu0 }
 0x1db   :  { %10353 = vmatpush3.bf16.msra.mxu0 %v13494_v23  ;;  %10379 = vmatprep.subr.bf16.mxu1 %v10378_v46  ;;  %v4380_v46 = vsub.f32 %v13577_v0, %v16353_v17  ;;  %v2075_v4 = vadd.f32 %v8152_v2, %v13464_v39  ;;  %v4137_v32 = vsub.f32 %v13583_v48, %v16354_v56  ;;  %v4248_v6 = vand.u32 4294901760, %v4247_v44 }
 0x1dc   :  { %10355 = vmatprep.subr.bf16.mxu0 %v13512_v13  ;;  %v13630_v40 = vpack.c.bf16 %v4126_v30, %v16351_v62  ;;  %v4255_v30 = vand.u32 4294901760, %v4254_v36  ;;  %v8154_v62 = vpop.f32.mrb[23].mxu0  ;;  %v10384_v43 = vpack.c.bf16 %v4241_v20, %v4234_v10  ;;  %v4261_v41 = vsub.f32 %v13589_v34, %v15758_v63  ;;  %v8188_v10 = vpop.f32.mrb[20].mxu1 }
 0x1dd   :  { %v4268_v39 = vsub.f32 %v13592_v26, %v15759_v25  ;;  %v8155_v2 = vadd.f32 %v8154_v62, %v8153_v47  ;;  %v10386_v17 = vpack.c.bf16 %v4367_v12, %v4360_v38  ;;  %v16355_v44 = vand.u32 4294901760, %v13608_v28  ;;  %v8189_v25 = vpop.f32.mrb[21].mxu1 }
 0x1de   :  { %16352 = vst [vmem:[#allocation34_spill] sm:$0xff] %v13630_v40  ;;  %10381 = vmatpush3.bf16.msra.mxu1 %v10380_v19  ;;  %v10394_v36 = vpack.c.bf16 %v13216_v14, %v13199_v49  ;;  %v4374_v20 = vand.u32 4294901760, %v4373_v35  ;;  %v4381_v56 = vand.u32 4294901760, %v4380_v46  ;;  %v4138_v47 = vand.u32 4294901760, %v4137_v32 }
 0x1df   :  { %10357 = vmatpush3.bf16.msra.mxu0 %v13529_v33  ;;  %10383 = vmatprep.subr.bf16.mxu1 %v10382_v61  ;;  %v4146_v19 = vsub.f32 %v13608_v28, %v16355_v44  ;;  %v2082_v63 = vadd.f32 %v8155_v2, %v13486_v45  ;;  %v10388_v62 = vpack.c.bf16 %v4255_v30, %v4248_v6  ;;  %v16356_v38 = vand.u32 4294901760, %v13621_v7  ;;  %v8191_v45 = vpop.f32.mrb[22].mxu1 }
 0x1e0   :  { %10359 = vmatprep.subr.bf16.mxu0 %v13630_v40  ;;  %v8190_v50 = vadd.f32 %v8189_v25, %v8188_v10  ;;  %v4262_v12 = vand.u32 4294901760, %v4261_v41  ;;  %v4269_v44 = vand.u32 4294901760, %v4268_v39  ;;  %v10396_v35 = vpack.c.bf16 %v13259_v52, %v13256_v24  ;;  %v8192_v6 = vpop.f32.mrb[23].mxu1  ;;  %v16357_v39 = vld [vmem:[#allocation16_spill] sm:$0xff] }
 0x1e1   :  { %v4152_v61 = vsub.f32 %v13621_v7, %v16356_v38  ;;  %v4147_v46 = vand.u32 4294901760, %v4146_v19  ;;  %v10390_v32 = vpack.c.bf16 %v4381_v56, %v4374_v20  ;;  %v10398_v25 = vpack.c.bf16 %v13293_v1, %v13290_v21  ;;  %v16361_v20 = vld [vmem:[#allocation29_spill] sm:$0xff] }
 0x1e2   :  { %10385 = vmatpush3.bf16.msra.mxu1 %v10384_v43  ;;  %v2186_v40 = vadd.f32 %v8190_v50, %v2075_v4  ;;  %v8193_v30 = vadd.f32 %v8192_v6, %v8191_v45  ;;  %v10392_v43 = vpack.c.bf16 %v4269_v44, %v4262_v12  ;;  %v10400_v2 = vpack.c.bf16 %v16357_v39, %v13330_v27  ;;  %v16358_v4 = vld [vmem:[#allocation13_spill] sm:$0xff]  ;;  %v16359_v50 = vld [vmem:[#allocation15_spill] sm:$0xff] }
 0x1e3   :  { %10361 = vmatpush3.bf16.msra.mxu0 %v13632_v15  ;;  %10387 = vmatprep.subr.bf16.mxu1 %v10386_v17  ;;  %v4153_v41 = vand.u32 4294901760, %v4152_v61  ;;  %v10402_v19 = vpack.c.bf16 %v16359_v50, %v16358_v4  ;;  %v10404_v10 = vpack.c.bf16 %v13370_v60, %v13368_v54  ;;  %v16365_v61 = vld [vmem:[#allocation33_spill] sm:$0xff]  ;;  %v16366_v44 = vld [vmem:[#allocation11_spill] sm:$0xff]  ;;  %v10414_v45 = vpack.c.bf16 %v13472_v37, %v13449_v5 }
 0x1e4   :  { %10395 = vmatprep.subr.bf16.mxu0 %v10394_v36  ;;  %v2193_v17 = vadd.f32 %v8193_v30, %v2082_v63  ;;  %v16360_v36 = vld [vmem:[#allocation22_spill] sm:$0xff]  ;;  %v10410_v12 = vpack.c.bf16 %v16365_v61, %v13423_v59 }
 0x1e5   :  { %v10406_v56 = vpack.c.bf16 %v16361_v20, %v16360_v36  ;;  %v16363_v63 = vld [vmem:[#allocation14_spill] sm:$0xff] }
 0x1e6   :  { %4139 = vmatmul.mubr.f32.vlgmr.msra.gmra.mrb[48].mxu0 %v4138_v47  ;;  %10389 = vmatpush3.bf16.msra.mxu1 %v10388_v62  ;;  %v16362_v47 = vld [vmem:[#allocation12_spill] sm:$0xff]  ;;  %v16364_v62 = vld [vmem:[#allocation21_spill] sm:$0xff]  ;;  %v16370_v30 = vld [vmem:[#allocation18_spill] sm:$0xff] }
 0x1e7   :  { %10397 = vmatpush3.bf16.msra.mxu0 %v10396_v35  ;;  %4148 = vmatprep.mubr.f32.mxu0 %v4147_v46  ;;  %v10408_v38 = vpack.c.bf16 %v16364_v62, %v16363_v63  ;;  %v16367_v35 = vand.u32 4294901760, %v16362_v47  ;;  %v10412_v46 = vpack.c.bf16 %v13447_v55, %v13441_v29 }
 0x1e8   :  { %10391 = vmatprep.subr.bf16.mxu1 %v10390_v32  ;;  %10399 = vmatprep.subr.bf16.mxu0 %v10398_v25  ;;  %v16368_v32 = vld [vmem:[#allocation19_spill] sm:$0xff]  ;;  %v16369_v25 = vld [vmem:[#allocation26_spill] sm:$0xff] }
 0x1e9   :  { %v10416_v6 = vpack.c.bf16 %v16369_v25, %v13492_v11 }
 0x1ea   :  { %4154 = vmatmul.mubr.f32.gmra.mrb[50].mxu0 %v4153_v41  ;;  %10393 = vmatpush3.bf16.msra.mxu1 %v10392_v43  ;;  %v16371_v41 = vld [vmem:[#allocation17_spill] sm:$0xff] }
 0x1eb   :  { %10401 = vmatpush3.bf16.msra.mxu0 %v10400_v2  ;;  %10427 = vmatprep.subr.bf16.mxu1 %v13322_v51  ;;  %v10418_v43 = vpack.c.bf16 %v16371_v41, %v16370_v30 }
 0x1ec   :  { %10403 = vmatprep.subr.bf16.mxu0 %v10402_v19  ;;  %4528 = vmatprep.mubr.f32.mxu0 %v16362_v47  ;;  %v16373_v47 = vld [vmem:[#allocation23_spill] sm:$0xff] }
 0x1ed   :  { %4386 = vmatmul.mubr.f32.vlgmr.msra.gmra.mrb[48].mxu1 %v13562_v57  ;;  %v13709_v57 = vld [vmem:[#allocation5 + $0x588] sm:$0xff] }
 0x1ee   :  { %10429 = vmatpush3.bf16.msra.mxu1 %v13328_v9  ;;  %4391 = vmatprep.mubr.f32.mxu1 %v13573_v18  ;;  %v13707_v18 = vld [vmem:[#allocation5 + $0x580] sm:$0xff] }
 0x1ef   :  { %10405 = vmatpush3.bf16.msra.mxu0 %v10404_v10  ;;  %10431 = vmatprep.subr.bf16.mxu1 %v13334_v58  ;;  %v16372_v10 = vld [vmem:[#allocation20_spill] sm:$0xff] }
 0x1f0   :  { %10407 = vmatprep.subr.bf16.mxu0 %v10406_v56 }
 0x1f1   :  { %4393 = vmatmul.mubr.f32.gmra.mrb[50].mxu1 %v13597_v3  ;;  %v16374_v3 = vld [vmem:[#allocation27_spill] sm:$0xff] }
 0x1f2   :  { %10433 = vmatpush3.bf16.msra.mxu1 %v16366_v44  ;;  %4644 = vmatprep.mubr.f32.mxu1 %v16367_v35  ;;  %v8226_v2 = vpop.f32.mrb[24].mxu0 }
 0x1f3   :  { %10409 = vmatpush3.bf16.msra.mxu0 %v10408_v38  ;;  %10435 = vmatprep.subr.bf16.mxu1 %v13342_v16  ;;  %v8227_v19 = vpop.f32.mrb[25].mxu0  ;;  %v10420_v38 = vpack.c.bf16 %v13535_v22, %v13531_v53 }
 0x1f4   :  { %10411 = vmatprep.subr.bf16.mxu0 %v10410_v12  ;;  %v8228_v56 = vadd.f32 %v8227_v19, %v8226_v2  ;;  %v10422_v12 = vpack.c.bf16 %v13577_v0, %v13559_v31  ;;  %v13716_v19 = vld [vmem:[#allocation5 + $0x508] sm:$0xff] }
 0x1f6   :  { %10437 = vmatpush3.bf16.msra.mxu1 %v13356_v8  ;;  %v2305_v35 = vadd.f32 %v8228_v56, %v2186_v40  ;;  %v16375_v56 = vand.u32 4294901760, %v13199_v49  ;;  %v16377_v49 = vand.u32 4294901760, %v13256_v24  ;;  %v16381_v8 = vand.u32 4294901760, %v13330_v27 }
 0x1f7   :  { %10413 = vmatpush3.bf16.msra.mxu0 %v10412_v46  ;;  %10439 = vmatprep.subr.bf16.mxu1 %v16368_v32  ;;  %v8229_v46 = vpop.f32.mrb[26].mxu0  ;;  %v16383_v24 = vand.u32 4294901760, %v16358_v4 }
 0x1f8   :  { %10415 = vmatprep.subr.bf16.mxu0 %v10414_v45  ;;  %v8230_v45 = vpop.f32.mrb[27].mxu0 }
 0x1f9   :  { %v8231_v2 = vadd.f32 %v8230_v45, %v8229_v46  ;;  %v8264_v40 = vpop.f32.mrb[24].mxu1  ;;  %v5002_v46 = vand.u32 4294901760, %v13709_v57 }
 0x1fa   :  { %10441 = vmatpush3.bf16.msra.mxu1 %v16372_v10  ;;  %v8265_v32 = vpop.f32.mrb[25].mxu1 }
 0x1fb   :  { %10417 = vmatpush3.bf16.msra.mxu0 %v10416_v6  ;;  %10443 = vmatprep.subr.bf16.mxu1 %v16373_v47  ;;  %v10424_v6 = vpack.c.bf16 %v13592_v26, %v13589_v34  ;;  %v2320_v10 = vadd.f32 %v8231_v2, %v2193_v17  ;;  %v8266_v45 = vadd.f32 %v8265_v32, %v8264_v40  ;;  %v16379_v32 = vand.u32 4294901760, %v13290_v21 }
 0x1fc   :  { %10419 = vmatprep.subr.bf16.mxu0 %v10418_v43  ;;  %v13714_v43 = vld [vmem:[#allocation5 + $0x500] sm:$0xff]  ;;  %v16380_v2 = vand.u32 4294901760, %v13293_v1  ;;  %v13754_v21 = vsub.f32 %v13709_v57, %v5002_v46 }
 0x1fd   :  { %v13732_v17 = vadd.f32 %v8266_v45, %v2305_v35  ;;  %v16385_v27 = vand.u32 4294901760, %v13714_v43  ;;  %v283_v35 = vld [vmem:[#allocation5 + $0x598] sm:$0xff]  ;;  %v16387_v45 = vand.u32 4294901760, %v13368_v54  ;;  %v16394_v54 = vand.u32 4294901760, %v13423_v59 }
 0x1fe   :  { %10445 = vmatpush3.bf16.msra.mxu1 %v16374_v3  ;;  %v16376_v3 = vand.u32 4294901760, %v13216_v14  ;;  %v16378_v14 = vand.u32 4294901760, %v13259_v52  ;;  %v10462_v40 = vpack.c.bf16 %v16380_v2, %v16379_v32  ;;  %v16384_v52 = vand.u32 4294901760, %v16359_v50  ;;  %v282_v50 = vld [vmem:[#allocation5 + $0x590] sm:$0xff]  ;;  %v267_v59 = vld [vmem:[#allocation5 + $0x518] sm:$0xff] }
 0x1ff   :  { %10421 = vmatpush3.bf16.msra.mxu0 %v10420_v38  ;;  %10447 = vmatprep.subr.bf16.mxu1 %v13467_v42  ;;  %v4999_v38 = vand.u32 4294901760, %v13707_v18  ;;  %v16389_v32 = vand.u32 4294901760, %v16360_v36  ;;  %v16390_v2 = vand.u32 4294901760, %v16361_v20  ;;  %v16396_v36 = vand.u32 4294901760, %v13441_v29 }
 0x200   :  { %10423 = vmatprep.subr.bf16.mxu0 %v10422_v12  ;;  %v10458_v47 = vpack.c.bf16 %v16376_v3, %v16375_v56  ;;  %v10460_v3 = vpack.c.bf16 %v16378_v14, %v16377_v49  ;;  %v8267_v12 = vpop.f32.mrb[26].mxu1  ;;  %v10466_v49 = vpack.c.bf16 %v16384_v52, %v16383_v24  ;;  %v16388_v14 = vand.u32 4294901760, %v13370_v60 }
 0x201   :  { %v8268_v56 = vpop.f32.mrb[27].mxu1  ;;  %v16392_v24 = vand.u32 4294901760, %v16364_v62  ;;  %v16395_v60 = vand.u32 4294901760, %v16365_v61  ;;  %v16397_v20 = vand.u32 4294901760, %v13447_v55  ;;  %v266_v62 = vld [vmem:[#allocation5 + $0x510] sm:$0xff]  ;;  %v285_v61 = vld [vmem:[#allocation5 + $0x5a8] sm:$0xff] }
 0x202   :  { %10449 = vmatpush3.bf16.msra.mxu1 %v13494_v23  ;;  %v8269_v1 = vadd.f32 %v8268_v56, %v8267_v12  ;;  %v10468_v12 = vpack.c.bf16 %v16388_v14, %v16387_v45  ;;  %v10470_v56 = vpack.c.bf16 %v16390_v2, %v16389_v32  ;;  %v16398_v45 = vand.u32 4294901760, %v13449_v5  ;;  %v284_v32 = vld [vmem:[#allocation5 + $0x5a0] sm:$0xff] }
 0x203   :  { %10425 = vmatpush3.bf16.msra.mxu0 %v10424_v6  ;;  %10451 = vmatprep.subr.bf16.mxu1 %v13512_v13  ;;  %v16382_v6 = vand.u32 4294901760, %v16357_v39  ;;  %v16386_v39 = vand.u32 4294901760, %v13716_v19  ;;  %v5008_v14 = vand.u32 4294901760, %v283_v35  ;;  %v16400_v29 = vand.u32 4294901760, %v13492_v11 }
 0x204   :  { %10459 = vmatprep.subr.bf16.mxu0 %v10458_v47  ;;  %v13749_v47 = vsub.f32 %v13707_v18, %v4999_v38  ;;  %v16401_v55 = vand.u32 4294901760, %v16369_v25  ;;  %v16404_v11 = vand.u32 4294901760, %v13531_v53  ;;  %v16405_v25 = vand.u32 4294901760, %v13535_v22 }
 0x205   :  { %v10464_v42 = vpack.c.bf16 %v16382_v6, %v16381_v8  ;;  %v13761_v8 = vsub.f32 %v13714_v43, %v16385_v27  ;;  %v13766_v4 = vsub.f32 %v13716_v19, %v16386_v39  ;;  %v16391_v6 = vand.u32 4294901760, %v16363_v63 }
 0x206   :  { %4531 = vmatmul.mubr.f32.vlgmr.msra.gmra.mrb[52].mxu0 %v13583_v48  ;;  %10453 = vmatpush3.bf16.msra.mxu1 %v13529_v33  ;;  %v13783_v27 = vadd.f32 %v8269_v1, %v2320_v10  ;;  %v13790_v39 = vpack.c.bf16 %v16395_v60, %v16394_v54  ;;  %v13796_v63 = vpack.c.bf16 %v16397_v20, %v16396_v36  ;;  %v16399_v10 = vand.u32 4294901760, %v13472_v37 }
 0x207   :  { %10461 = vmatpush3.bf16.msra.mxu0 %v10460_v3  ;;  %4537 = vmatprep.mubr.f32.mxu0 %v13608_v28  ;;  %v13781_v52 = vpack.c.bf16 %v16392_v24, %v16391_v6  ;;  %v16393_v3 = vld [vmem:[#allocation34_spill] sm:$0xff]  ;;  %v15778_v2 = vand.u32 4294901760, %v13749_v47  ;;  %v13811_v5 = vpack.c.bf16 %v16401_v55, %v16400_v29  ;;  %v15776_v37 = vand.u32 4294901760, %v13754_v21  ;;  %v16410_v55 = vld [vmem:[#allocation28_spill] sm:$0xff] }
 0x208   :  { %10455 = vmatprep.subr.bf16.mxu1 %v16393_v3  ;;  %10463 = vmatprep.subr.bf16.mxu0 %v10462_v40  ;;  %v13802_v1 = vpack.c.bf16 %v16399_v10, %v16398_v45  ;;  %v5005_v40 = vand.u32 4294901760, %v282_v50  ;;  %v15775_v6 = vand.u32 4294901760, %v13761_v8  ;;  %v15772_v24 = vand.u32 4294901760, %v13766_v4 }
 0x209   :  { %v16402_v54 = vand.u32 4294901760, %v16370_v30  ;;  %v16403_v60 = vand.u32 4294901760, %v16371_v41  ;;  %v13827_v20 = vpack.c.bf16 %v16405_v25, %v16404_v11  ;;  %v16406_v45 = vand.u32 4294901760, %v13559_v31  ;;  %v269_v11 = vld [vmem:[#allocation5 + $0x528] sm:$0xff] }
 0x20a   :  { %4540 = vmatmul.mubr.f32.gmra.mrb[54].mxu0 %v13621_v7  ;;  %10457 = vmatpush3.bf16.msra.mxu1 %v13632_v15  ;;  %v16407_v10 = vand.u32 4294901760, %v13577_v0  ;;  %v16409_v30 = vand.u32 4294901760, %v13592_v26  ;;  %v4960_v53 = vand.u32 4294901760, %v267_v59  ;;  %v5011_v22 = vand.u32 4294901760, %v284_v32 }
 0x20b   :  { %10465 = vmatpush3.bf16.msra.mxu0 %v10464_v42  ;;  %10491 = vmatprep.subr.bf16.mxu1 %v13322_v51  ;;  %v13821_v36 = vpack.c.bf16 %v16403_v60, %v16402_v54  ;;  %v4957_v42 = vand.u32 4294901760, %v266_v62  ;;  %v16408_v51 = vand.u32 4294901760, %v13589_v34  ;;  %v5014_v54 = vand.u32 4294901760, %v285_v61  ;;  %v268_v60 = vld [vmem:[#allocation5 + $0x520] sm:$0xff] }
 0x20c   :  { %v13833_v29 = vpack.c.bf16 %v16407_v10, %v16406_v45  ;;  %10467 = vmatprep.subr.bf16.mxu0 %v10466_v49  ;;  %4825 = vmatprep.mubr.f32.mxu0 %v16410_v55  ;;  %v16411_v31 = vand.u32 4294901760, %v13583_v48  ;;  %v13848_v0 = vpack.c.bf16 %v5002_v46, %v4999_v38  ;;  %v13850_v34 = vsub.f32 %v282_v50, %v5005_v40 }
 0x20d   :  { %v13839_v41 = vpack.c.bf16 %v16409_v30, %v16408_v51  ;;  %v13852_v26 = vsub.f32 %v283_v35, %v5008_v14  ;;  %v5193_v49 = vsub.f32 %v13749_v47, %v15778_v2  ;;  %v16413_v25 = vand.u32 4294901760, %v13608_v28  ;;  %v287_v30 = vld [vmem:[#allocation5 + $0x5b8] sm:$0xff] }
 0x20e   :  { %4648 = vmatmul.mubr.f32.vlgmr.msra.gmra.mrb[52].mxu1 %v16411_v31  ;;  %v5200_v18 = vsub.f32 %v13754_v21, %v15776_v37  ;;  %v5081_v57 = vsub.f32 %v13761_v8, %v15775_v6  ;;  %v5088_v48 = vsub.f32 %v13766_v4, %v15772_v24  ;;  %v16415_v28 = vand.u32 4294901760, %v13716_v19 }
 0x20f   :  { %16412 = vst [vmem:[#allocation16_spill] sm:$0xff] %v13852_v26  ;;  %10493 = vmatpush3.bf16.msra.mxu1 %v13328_v9  ;;  %4655 = vmatprep.mubr.f32.mxu1 %v16413_v25  ;;  %v16414_v9 = vand.u32 4294901760, %v13714_v43  ;;  %v13876_v46 = vsub.f32 %v266_v62, %v4957_v42  ;;  %v4963_v50 = vand.u32 4294901760, %v268_v60  ;;  %v4966_v35 = vand.u32 4294901760, %v269_v11  ;;  %v270_v25 = vld [vmem:[#allocation5 + $0x530] sm:$0xff] }
 0x210   :  { %10469 = vmatpush3.bf16.msra.mxu0 %v10468_v12  ;;  %10495 = vmatprep.subr.bf16.mxu1 %v13334_v58  ;;  %v13878_v45 = vpack.c.bf16 %v5008_v14, %v5005_v40  ;;  %v13880_v10 = vpack.c.bf16 %v4960_v53, %v4957_v42  ;;  %v13882_v51 = vsub.f32 %v267_v59, %v4960_v53  ;;  %v286_v58 = vld [vmem:[#allocation5 + $0x5b0] sm:$0xff]  ;;  %v16420_v43 = vand.u32 4294901760, %v13621_v7  ;;  %v51_v40 = vld [vmem:[#allocation2 + $0x58] sm:$0xff] }
 0x211   :  { %v13874_v38 = vpack.c.bf16 %v16415_v28, %v16414_v9  ;;  %16416 = vst [vmem:[#allocation13_spill] sm:$0xff] %v13876_v46  ;;  %10471 = vmatprep.subr.bf16.mxu0 %v10470_v56  ;;  %v13884_v12 = vpack.c.bf16 %v5014_v54, %v5011_v22  ;;  %v13888_v19 = vsub.f32 %v284_v32, %v5011_v22  ;;  %v5194_v31 = vand.u32 4294901760, %v5193_v49  ;;  %v271_v22 = vld [vmem:[#allocation5 + $0x538] sm:$0xff] }
 0x212   :  { %16417 = vst [vmem:[#allocation15_spill] sm:$0xff] %v13878_v45  ;;  %16418 = vst [vmem:[#allocation22_spill] sm:$0xff] %v13880_v10  ;;  %4659 = vmatmul.mubr.f32.gmra.mrb[54].mxu1 %v16420_v43  ;;  %v13890_v62 = vsub.f32 %v285_v61, %v5014_v54  ;;  %v15770_v56 = vand.u32 4294901760, %v13850_v34  ;;  %v5201_v14 = vand.u32 4294901760, %v5200_v18  ;;  %v5082_v59 = vand.u32 4294901760, %v5081_v57  ;;  %v288_v18 = vld [vmem:[#allocation5 + $0x5c0] sm:$0xff] }
 0x213   :  { %16419 = vst [vmem:[#allocation29_spill] sm:$0xff] %v13882_v51  ;;  %16421 = vst [vmem:[#allocation12_spill] sm:$0xff] %v13888_v19  ;;  %10497 = vmatpush3.bf16.msra.mxu1 %v16366_v44  ;;  %4936 = vmatprep.mubr.f32.mxu1 %v16410_v55  ;;  %v5089_v42 = vand.u32 4294901760, %v5088_v48  ;;  %v15771_v53 = vand.u32 4294901760, %v13852_v26  ;;  %v13898_v7 = vpack.c.bf16 %v4966_v35, %v4963_v50  ;;  %v5017_v32 = vand.u32 4294901760, %v286_v58  ;;  %v13907_v57 = vld [vmem:[#allocation5 + $0x5c8] sm:$0xff] }
 0x214   :  { %16422 = vst [vmem:[#allocation14_spill] sm:$0xff] %v13890_v62  ;;  %10473 = vmatpush3.bf16.msra.mxu0 %v13781_v52  ;;  %10499 = vmatprep.subr.bf16.mxu1 %v13342_v16  ;;  %v5020_v61 = vand.u32 4294901760, %v287_v30  ;;  %v15773_v54 = vand.u32 4294901760, %v13876_v46  ;;  %v13902_v44 = vsub.f32 %v268_v60, %v4963_v50  ;;  %v13904_v55 = vsub.f32 %v269_v11, %v4966_v35  ;;  %v16425_v43 = vld [vmem:[#allocation19_spill] sm:$0xff] }
 0x215   :  { %16423 = vst [vmem:[#allocation21_spill] sm:$0xff] %v13898_v7  ;;  %10475 = vmatprep.subr.bf16.mxu0 %v13790_v39  ;;  %v15774_v49 = vand.u32 4294901760, %v13882_v51  ;;  %v83_v52 = vmul.f32 %v51_v40, %v51_v40  ;;  %v5207_v16 = vsub.f32 %v13850_v34, %v15770_v56  ;;  %v4969_v48 = vand.u32 4294901760, %v270_v25  ;;  %v16424_v39 = vld [vmem:[#allocation25_spill] sm:$0xff] }
 0x216   :  { %v15777_v9 = vand.u32 4294901760, %v13888_v19  ;;  %v15779_v28 = vand.u32 4294901760, %v13890_v62  ;;  %v13915_v60 = vpack.c.bf16 %v5201_v14, %v5194_v31  ;;  %v13917_v11 = vpack.c.bf16 %v5089_v42, %v5082_v59 }
 0x217   :  { %10501 = vmatpush3.bf16.msra.mxu1 %v16424_v39  ;;  %v5214_v50 = vsub.f32 %v13852_v26, %v15771_v53  ;;  %v4972_v35 = vand.u32 4294901760, %v271_v22  ;;  %v13924_v40 = vpack.c.bf16 %v5020_v61, %v5017_v32  ;;  %v5095_v56 = vsub.f32 %v13876_v46, %v15773_v54 }
 0x218   :  { %10477 = vmatpush3.bf16.msra.mxu0 %v13796_v63  ;;  %10503 = vmatprep.subr.bf16.mxu1 %v16425_v43  ;;  %v5023_v39 = vand.u32 4294901760, %v288_v18  ;;  %v5026_v31 = vand.u32 4294901760, %v13907_v57  ;;  %v13931_v14 = vsub.f32 %v286_v58, %v5017_v32  ;;  %v13933_v59 = vsub.f32 %v287_v30, %v5020_v61  ;;  %v8302_v43 = vpop.f32.mrb[28].mxu0  ;;  %v272_v58 = vld [vmem:[#allocation5 + $0x540] sm:$0xff]  ;;  %v273_v30 = vld [vmem:[#allocation5 + $0x548] sm:$0xff]  ;;  %v16429_v61 = vld [vmem:[#allocation20_spill] sm:$0xff] }
 0x219   :  { %16426 = vst [vmem:[#allocation33_spill] sm:$0xff] %v13924_v40  ;;  %10479 = vmatprep.subr.bf16.mxu0 %v13802_v1  ;;  %v5102_v63 = vsub.f32 %v13882_v51, %v15774_v49  ;;  %v13938_v42 = vand.u32 4294901760, %v83_v52  ;;  %v5208_v53 = vand.u32 4294901760, %v5207_v16  ;;  %v13940_v24 = vsub.f32 %v270_v25, %v4969_v48  ;;  %v8303_v32 = vpop.f32.mrb[29].mxu0  ;;  %v291_v51 = vld [vmem:[#allocation5 + $0x5d8] sm:$0xff] }
 0x21a   :  { %v5221_v54 = vsub.f32 %v13888_v19, %v15777_v9  ;;  %v5228_v1 = vsub.f32 %v13890_v62, %v15779_v28  ;;  %v5215_v49 = vand.u32 4294901760, %v5214_v50  ;;  %v13949_v6 = vpack.c.bf16 %v4972_v35, %v4969_v48  ;;  %v16431_v9 = vld [vmem:[#allocation23_spill] sm:$0xff] }
 0x21b   :  { %16427 = vst [vmem:[#allocation11_spill] sm:$0xff] %v13938_v42  ;;  %16428 = vst [vmem:[#allocation26_spill] sm:$0xff] %v13940_v24  ;;  %10505 = vmatpush3.bf16.msra.mxu1 %v16429_v61  ;;  %v8304_v37 = vadd.f32 %v8303_v32, %v8302_v43  ;;  %v13955_v2 = vsub.f32 %v271_v22, %v4972_v35  ;;  %v5096_v28 = vand.u32 4294901760, %v5095_v56  ;;  %v290_v19 = vld [vmem:[#allocation5 + $0x5d0] sm:$0xff]  ;;  %v5103_v50 = vand.u32 4294901760, %v5102_v63 }
 0x21c   :  { %16430 = vst [vmem:[#allocation18_spill] sm:$0xff] %v13949_v6  ;;  %10481 = vmatpush3.bf16.msra.mxu0 %v13811_v5  ;;  %10507 = vmatprep.subr.bf16.mxu1 %v16431_v9  ;;  %v13957_v62 = vpack.c.bf16 %v5026_v31, %v5023_v39  ;;  %v4975_v48 = vand.u32 4294901760, %v272_v58  ;;  %v4978_v61 = vand.u32 4294901760, %v273_v30  ;;  %v13961_v16 = vsub.f32 %v83_v52, %v13938_v42  ;;  %v8305_v5 = vpop.f32.mrb[30].mxu0  ;;  %v16435_v35 = vld [vmem:[#allocation27_spill] sm:$0xff] }
 0x21d   :  { %16432 = vst [vmem:[#allocation17_spill] sm:$0xff] %v13955_v2  ;;  %10483 = vmatprep.subr.bf16.mxu0 %v13821_v36  ;;  %v2697_v43 = vadd.f32 %v8304_v37, %v13732_v17  ;;  %v13964_v32 = vsub.f32 %v288_v18, %v5023_v39  ;;  %v5222_v22 = vand.u32 4294901760, %v5221_v54  ;;  %v5229_v9 = vand.u32 4294901760, %v5228_v1  ;;  %v8306_v56 = vpop.f32.mrb[31].mxu0  ;;  %v16438_v37 = vld [vmem:[#allocation24_spill] sm:$0xff] }
 0x21e   :  { %16433 = vst [vmem:[#allocation34_spill] sm:$0xff] %v13957_v62  ;;  %v13967_v25 = vpack.c.bf16 %v5215_v49, %v5208_v53  ;;  %v16436_v36 = vand.u32 4294901760, %v13902_v44  ;;  %v16437_v46 = vand.u32 4294901760, %v13904_v55  ;;  %v5029_v26 = vand.u32 4294901760, %v290_v19  ;;  %v8340_v49 = vpop.f32.mrb[28].mxu1  ;;  %v274_v53 = vld [vmem:[#allocation5 + $0x550] sm:$0xff] }
 0x21f   :  { %16434 = vst [vmem:[#allocation28_spill] sm:$0xff] %v13964_v32  ;;  %10509 = vmatpush3.bf16.msra.mxu1 %v16435_v35  ;;  %v8307_v17 = vadd.f32 %v8306_v56, %v8305_v5  ;;  %v5032_v54 = vand.u32 4294901760, %v291_v51  ;;  %v15790_v18 = vand.u32 4294901760, %v13931_v14  ;;  %v13980_v39 = vpack.c.bf16 %v5103_v50, %v5096_v28  ;;  %v8341_v56 = vpop.f32.mrb[29].mxu1 }
 0x220   :  { %v5109_v63 = vsub.f32 %v13902_v44, %v16436_v36  ;;  %v5116_v52 = vsub.f32 %v13904_v55, %v16437_v46  ;;  %10485 = vmatpush3.bf16.msra.mxu0 %v13827_v20  ;;  %10511 = vmatprep.subr.bf16.mxu1 %v16438_v37  ;;  %v13983_v1 = vsub.f32 %v13907_v57, %v5026_v31  ;;  %v15791_v5 = vand.u32 4294901760, %v13961_v16  ;;  %v275_v57 = vld [vmem:[#allocation5 + $0x558] sm:$0xff] }
 0x221   :  { %10487 = vmatprep.subr.bf16.mxu0 %v13833_v29  ;;  %v13985_v46 = vpack.c.bf16 %v4978_v61, %v4975_v48  ;;  %v2706_v20 = vadd.f32 %v8307_v17, %v13783_v27  ;;  %v13989_v35 = vpack.c.bf16 %v5229_v9, %v5222_v22  ;;  %v13991_v36 = vsub.f32 %v272_v58, %v4975_v48 }
 0x222   :  { %v13993_v37 = vsub.f32 %v273_v30, %v4978_v61  ;;  %v8342_v29 = vadd.f32 %v8341_v56, %v8340_v49  ;;  %v5110_v28 = vand.u32 4294901760, %v5109_v63  ;;  %v15792_v31 = vand.u32 4294901760, %v13940_v24  ;;  %v8343_v61 = vpop.f32.mrb[30].mxu1  ;;  %v293_v56 = vld [vmem:[#allocation5 + $0x5e8] sm:$0xff] }
 0x223   :  { %16439 = vst [vmem:[#allocation25_spill] sm:$0xff] %v13985_v46  ;;  %10513 = vmatpush3.bf16.msra.mxu1 %v13494_v23  ;;  %v15793_v50 = vand.u32 4294901760, %v13955_v2  ;;  %v5117_v27 = vand.u32 4294901760, %v5116_v52  ;;  %v14000_v22 = vpack.c.bf16 %v5032_v54, %v5029_v26  ;;  %v5235_v58 = vsub.f32 %v13931_v14, %v15790_v18  ;;  %v8344_v52 = vpop.f32.mrb[31].mxu1  ;;  %v16442_v18 = vld [vmem:[#allocation30_spill] sm:$0xff] }
 0x224   :  { %10489 = vmatpush3.bf16.msra.mxu0 %v13839_v41  ;;  %10515 = vmatprep.subr.bf16.mxu1 %v13512_v13  ;;  %v16441_v30 = vand.u32 4294901760, %v13933_v59  ;;  %v14008_v48 = vadd.f32 %v8342_v29, %v2697_v43  ;;  %v14011_v9 = vsub.f32 %v290_v19, %v5029_v26  ;;  %v4981_v41 = vand.u32 4294901760, %v274_v53  ;;  %v292_v13 = vld [vmem:[#allocation5 + $0x5e0] sm:$0xff]  ;;  %v16443_v19 = vld [vmem:[#allocation31_spill] sm:$0xff] }
 0x225   :  { %16440 = vst [vmem:[#allocation19_spill] sm:$0xff] %v14000_v22  ;;  %10523 = vmatprep.subr.bf16.mxu0 %v13848_v0  ;;  %v5049_v63 = vsub.f32 %v13961_v16, %v15791_v5  ;;  %v14016_v17 = vsub.f32 %v291_v51, %v5032_v54  ;;  %v4984_v49 = vand.u32 4294901760, %v275_v57  ;;  %v8345_v29 = vadd.f32 %v8344_v52, %v8343_v61  ;;  %v276_v43 = vld [vmem:[#allocation5 + $0x560] sm:$0xff] }
 0x226   :  { %v5242_v23 = vsub.f32 %v13933_v59, %v16441_v30  ;;  %v5123_v26 = vsub.f32 %v13940_v24, %v15792_v31  ;;  %v5130_v51 = vsub.f32 %v13955_v2, %v15793_v50  ;;  %v14030_v54 = vpack.c.bf16 %v5117_v27, %v5110_v28  ;;  %v277_v30 = vld [vmem:[#allocation5 + $0x568] sm:$0xff] }
 0x227   :  { %4827 = vmatmul.mubr.f32.vlgmr.msra.gmra.mrb[56].mxu0 %v16442_v18  ;;  %10517 = vmatpush3.bf16.msra.mxu1 %v13529_v33  ;;  %v5236_v5 = vand.u32 4294901760, %v5235_v58  ;;  %v5035_v52 = vand.u32 4294901760, %v292_v13  ;;  %v14032_v33 = vadd.f32 %v8345_v29, %v2706_v20  ;;  %v14036_v31 = vsub.f32 %v274_v53, %v4981_v41  ;;  %v16446_v29 = vld [vmem:[#allocation32_spill] sm:$0xff] }
 0x228   :  { %10525 = vmatpush3.bf16.msra.mxu0 %v13874_v38  ;;  %4832 = vmatprep.mubr.f32.mxu0 %v16443_v19  ;;  %v5243_v61 = vand.u32 4294901760, %v5242_v23  ;;  %v5038_v50 = vand.u32 4294901760, %v293_v56  ;;  %v5050_v2 = vand.u32 4294901760, %v5049_v63  ;;  %v14038_v24 = vpack.c.bf16 %v4984_v49, %v4981_v41  ;;  %v50_v41 = vld [vmem:[#allocation2 + $0x50] sm:$0xff] }
 0x229   :  { %10519 = vmatprep.subr.bf16.mxu1 %v16393_v3  ;;  %10527 = vmatprep.subr.bf16.mxu0 %v13878_v45  ;;  %v16444_v28 = vand.u32 4294901760, %v13964_v32  ;;  %v16445_v58 = vand.u32 4294901760, %v13983_v1  ;;  %v5124_v3 = vand.u32 4294901760, %v5123_v26  ;;  %v5131_v53 = vand.u32 4294901760, %v5130_v51 }
 0x22a   :  { %v4987_v45 = vand.u32 4294901760, %v276_v43  ;;  %v4990_v63 = vand.u32 4294901760, %v277_v30  ;;  %v15804_v20 = vand.u32 4294901760, %v13993_v37  ;;  %v14061_v26 = vsub.f32 %v293_v56, %v5038_v50 }
 0x22b   :  { %v5249_v27 = vsub.f32 %v13964_v32, %v16444_v28  ;;  %v5256_v23 = vsub.f32 %v13983_v1, %v16445_v58  ;;  %4834 = vmatmul.mubr.f32.gmra.mrb[58].mxu0 %v16446_v29  ;;  %10521 = vmatpush3.bf16.msra.mxu1 %v13632_v15  ;;  %v14051_v28 = vpack.c.bf16 %v5243_v61, %v5236_v5  ;;  %v15805_v51 = vand.u32 4294901760, %v14011_v9  ;;  %v14069_v61 = vld [vmem:[#allocation5 + $0x5f0] sm:$0xff] }
 0x22c   :  { %10529 = vmatpush3.bf16.msra.mxu0 %v13880_v10  ;;  %10555 = vmatprep.subr.bf16.mxu1 %v13915_v60  ;;  %v14053_v32 = vsub.f32 %v275_v57, %v4984_v49  ;;  %v14055_v58 = vsub.f32 %v292_v13, %v5035_v52  ;;  %v14059_v15 = vpack.c.bf16 %v5038_v50, %v5035_v52  ;;  %v67_v60 = vld [vmem:[#allocation2 + $0xd8] sm:$0xff]  ;;  %v16450_v13 = vand.u32 4294901760, %v13991_v36 }
 0x22d   :  { %10531 = vmatprep.subr.bf16.mxu0 %v13884_v12  ;;  %16449 = vst [vmem:[#allocation27_spill] sm:$0xff] %v14061_v26  ;;  %5051 = vmatprep.mubr.f32.mxu0 %v5050_v2  ;;  %v5250_v5 = vand.u32 4294901760, %v5249_v27  ;;  %v5257_v57 = vand.u32 4294901760, %v5256_v23  ;;  %v14071_v52 = vld [vmem:[#allocation5 + $0x5f8] sm:$0xff]  ;;  %v82_v50 = vmul.f32 %v50_v41, %v50_v41  ;;  %v10568_v56 = vpack.c.bf16 %v5131_v53, %v5124_v3  ;;  %v14086_v23 = vld [vmem:[#allocation5 + $0x570] sm:$0xff] }
 0x22e   :  { %16447 = vst [vmem:[#allocation20_spill] sm:$0xff] %v14053_v32  ;;  %16448 = vst [vmem:[#allocation23_spill] sm:$0xff] %v14055_v58  ;;  %4938 = vmatmul.mubr.f32.vlgmr.msra.gmra.mrb[56].mxu1 %v16442_v18  ;;  %v5137_v49 = vsub.f32 %v13991_v36, %v16450_v13  ;;  %v14075_v2 = vpack.c.bf16 %v4990_v63, %v4987_v45  ;;  %v14077_v10 = vsub.f32 %v276_v43, %v4987_v45  ;;  %v66_v3 = vld [vmem:[#allocation2 + $0xd0] sm:$0xff] }
 0x22f   :  { %10557 = vmatpush3.bf16.msra.mxu1 %v13917_v11  ;;  %4943 = vmatprep.mubr.f32.mxu1 %v16443_v19  ;;  %v14081_v18 = vsub.f32 %v277_v30, %v4990_v63  ;;  %v5144_v27 = vsub.f32 %v13993_v37, %v15804_v20  ;;  %v14088_v11 = vld [vmem:[#allocation5 + $0x578] sm:$0xff]  ;;  %v99_v19 = vmul.f32 %v67_v60, %v67_v60  ;;  %v5044_v43 = vand.u32 4294901760, %v14071_v52 }
 0x230   :  { %10533 = vmatpush3.bf16.msra.mxu0 %v13898_v7  ;;  %10559 = vmatprep.subr.bf16.mxu1 %v13967_v25  ;;  %v5263_v25 = vsub.f32 %v14011_v9, %v15805_v51  ;;  %v16451_v30 = vand.u32 4294901760, %v14016_v17  ;;  %v10570_v63 = vpack.c.bf16 %v5257_v57, %v5250_v5  ;;  %v5138_v41 = vand.u32 4294901760, %v5137_v49 }
 0x231   :  { %10535 = vmatprep.subr.bf16.mxu0 %v13924_v40  ;;  %v14101_v13 = vand.u32 4294901760, %v82_v50  ;;  %v4993_v20 = vand.u32 4294901760, %v14086_v23  ;;  %v4996_v45 = vand.u32 4294901760, %v14088_v11  ;;  %v98_v40 = vmul.f32 %v66_v3, %v66_v3 }
 0x232   :  { %v5270_v53 = vsub.f32 %v14016_v17, %v16451_v30  ;;  %4945 = vmatmul.mubr.f32.gmra.mrb[58].mxu1 %v16446_v29  ;;  %v5145_v29 = vand.u32 4294901760, %v5144_v27  ;;  %v14112_v49 = vand.u32 4294901760, %v99_v19  ;;  %v14121_v3 = vsub.f32 %v14071_v52, %v5044_v43 }
 0x233   :  { %16452 = vst [vmem:[#allocation24_spill] sm:$0xff] %v14101_v13  ;;  %10561 = vmatpush3.bf16.msra.mxu1 %v13980_v39  ;;  %5302 = vmatprep.mubr.f32.mxu1 %v13938_v42  ;;  %v16454_v39 = vand.u32 4294901760, %v14069_v61  ;;  %v5264_v51 = vand.u32 4294901760, %v5263_v25  ;;  %v14127_v57 = vsub.f32 %v82_v50, %v14101_v13  ;;  %v14136_v52 = vsub.f32 %v14088_v11, %v4996_v45 }
 0x234   :  { %10537 = vmatpush3.bf16.msra.mxu0 %v13949_v6  ;;  %10563 = vmatprep.subr.bf16.mxu1 %v13989_v35  ;;  %16453 = vst [vmem:[#allocation30_spill] sm:$0xff] %v14112_v49  ;;  %v5271_v60 = vand.u32 4294901760, %v5270_v53  ;;  %v16455_v35 = vand.u32 4294901760, %v14036_v31  ;;  %v16456_v25 = vand.u32 4294901760, %v14053_v32  ;;  %v16458_v50 = vand.u32 4294901760, %v14055_v58 }
 0x235   :  { %10539 = vmatprep.subr.bf16.mxu0 %v13957_v62  ;;  %v14118_v30 = vsub.f32 %v14069_v61, %v16454_v39  ;;  %v14133_v39 = vsub.f32 %v14086_v23, %v4993_v20  ;;  %v16459_v23 = vand.u32 4294901760, %v14061_v26  ;;  %v14152_v11 = vsub.f32 %v99_v19, %v14112_v49 }
 0x236   :  { %v5151_v27 = vsub.f32 %v14036_v31, %v16455_v35  ;;  %v5158_v53 = vsub.f32 %v14053_v32, %v16456_v25  ;;  %v14141_v35 = vand.u32 4294901760, %v98_v40  ;;  %v10572_v25 = vpack.c.bf16 %v5145_v29, %v5138_v41 }
 0x237   :  { %10565 = vmatpush3.bf16.msra.mxu1 %v14030_v54  ;;  %v5277_v54 = vsub.f32 %v14055_v58, %v16458_v50  ;;  %v5284_v42 = vsub.f32 %v14061_v26, %v16459_v23  ;;  %v10574_v5 = vpack.c.bf16 %v5271_v60, %v5264_v51  ;;  %v15822_v62 = vand.u32 4294901760, %v14118_v30 }
 0x238   :  { %16457 = vst [vmem:[#allocation31_spill] sm:$0xff] %v14141_v35  ;;  %10541 = vmatpush3.bf16.msra.mxu0 %v13985_v46  ;;  %10567 = vmatprep.subr.bf16.mxu1 %v14051_v28  ;;  %v8378_v28 = vpop.f32.mrb[32].mxu0  ;;  %v5152_v6 = vand.u32 4294901760, %v5151_v27  ;;  %v16460_v50 = vand.u32 4294901760, %v14077_v10  ;;  %v16461_v23 = vand.u32 4294901760, %v14081_v18  ;;  %v5159_v41 = vand.u32 4294901760, %v5158_v53 }
 0x239   :  { %10543 = vmatprep.subr.bf16.mxu0 %v14000_v22  ;;  %v8379_v26 = vpop.f32.mrb[33].mxu0  ;;  %v14165_v51 = vsub.f32 %v98_v40, %v14141_v35  ;;  %v15823_v60 = vand.u32 4294901760, %v14133_v39  ;;  %v15824_v29 = vand.u32 4294901760, %v14136_v52  ;;  %v5278_v32 = vand.u32 4294901760, %v5277_v54 }
 0x23a   :  { %v5165_v58 = vsub.f32 %v14077_v10, %v16460_v50  ;;  %v5172_v19 = vsub.f32 %v14081_v18, %v16461_v23  ;;  %v8380_v27 = vadd.f32 %v8379_v26, %v8378_v28  ;;  %v5285_v50 = vand.u32 4294901760, %v5284_v42  ;;  %v8381_v54 = vpop.f32.mrb[34].mxu0 }
 0x23b   :  { %10569 = vmatpush3.bf16.msra.mxu1 %v10568_v56  ;;  %v16462_v56 = vand.u32 4294901760, %v14069_v61  ;;  %v14176_v40 = vpack.c.bf16 %v4996_v45, %v4993_v20  ;;  %v5291_v23 = vsub.f32 %v14118_v30, %v15822_v62  ;;  %v16464_v26 = vand.u32 4294901760, %v14121_v3 }
 0x23c   :  { %10545 = vmatpush3.bf16.msra.mxu0 %v14038_v24  ;;  %10571 = vmatprep.subr.bf16.mxu1 %v10570_v63  ;;  %v2993_v42 = vadd.f32 %v8380_v27, %v14008_v48  ;;  %v16465_v28 = vand.u32 4294901760, %v14127_v57  ;;  %v5166_v61 = vand.u32 4294901760, %v5165_v58  ;;  %v10576_v20 = vpack.c.bf16 %v5159_v41, %v5152_v6  ;;  %v8416_v6 = vpop.f32.mrb[32].mxu1 }
 0x23d   :  { %10547 = vmatprep.subr.bf16.mxu0 %v14059_v15  ;;  %v14174_v53 = vpack.c.bf16 %v5044_v43, %v16462_v56  ;;  %v5298_v63 = vsub.f32 %v14121_v3, %v16464_v26  ;;  %v5173_v43 = vand.u32 4294901760, %v5172_v19  ;;  %v8382_v56 = vpop.f32.mrb[35].mxu0  ;;  %v5179_v62 = vsub.f32 %v14133_v39, %v15823_v60 }
 0x23e   :  { %v5055_v46 = vsub.f32 %v14127_v57, %v16465_v28  ;;  %v5186_v48 = vsub.f32 %v14136_v52, %v15824_v29  ;;  %v8383_v27 = vadd.f32 %v8382_v56, %v8381_v54  ;;  %v10578_v26 = vpack.c.bf16 %v5285_v50, %v5278_v32  ;;  %v8417_v29 = vpop.f32.mrb[33].mxu1 }
 0x23f   :  { %16463 = vst [vmem:[#allocation32_spill] sm:$0xff] %v14174_v53  ;;  %10573 = vmatpush3.bf16.msra.mxu1 %v10572_v25  ;;  %v16466_v58 = vand.u32 4294901760, %v14152_v11  ;;  %v10586_v19 = vpack.c.bf16 %v13754_v21, %v13749_v47  ;;  %v5292_v41 = vand.u32 4294901760, %v5291_v23  ;;  %v5299_v28 = vand.u32 4294901760, %v5298_v63 }
 0x240   :  { %10549 = vmatpush3.bf16.msra.mxu0 %v14075_v2  ;;  %10575 = vmatprep.subr.bf16.mxu1 %v10574_v5  ;;  %v3000_v60 = vadd.f32 %v8383_v27, %v14032_v33  ;;  %v5056_v54 = vand.u32 4294901760, %v5055_v46  ;;  %v10580_v56 = vpack.c.bf16 %v5173_v43, %v5166_v61  ;;  %v8418_v45 = vadd.f32 %v8417_v29, %v8416_v6  ;;  %v8419_v33 = vpop.f32.mrb[34].mxu1  ;;  %v16468_v29 = vld [vmem:[#allocation16_spill] sm:$0xff]  ;;  %v16469_v27 = vld [vmem:[#allocation13_spill] sm:$0xff] }
 0x241   :  { %v5064_v25 = vsub.f32 %v14152_v11, %v16466_v58  ;;  %10551 = vmatprep.subr.bf16.mxu0 %v14174_v53  ;;  %v16467_v32 = vand.u32 4294901760, %v14165_v51  ;;  %v5180_v50 = vand.u32 4294901760, %v5179_v62  ;;  %v5187_v58 = vand.u32 4294901760, %v5186_v48  ;;  %v8420_v43 = vpop.f32.mrb[35].mxu1 }
 0x242   :  { %v10588_v23 = vpack.c.bf16 %v13766_v4, %v13761_v8  ;;  %v3104_v53 = vadd.f32 %v8418_v45, %v2993_v42  ;;  %v10582_v46 = vpack.c.bf16 %v5299_v28, %v5292_v41  ;;  %v10590_v61 = vpack.c.bf16 %v16468_v29, %v13850_v34  ;;  %v16471_v42 = vld [vmem:[#allocation12_spill] sm:$0xff]  ;;  %v16472_v45 = vld [vmem:[#allocation14_spill] sm:$0xff] }
 0x243   :  { %10577 = vmatpush3.bf16.msra.mxu1 %v10576_v20  ;;  %v5070_v5 = vsub.f32 %v14165_v51, %v16467_v32  ;;  %v5065_v63 = vand.u32 4294901760, %v5064_v25  ;;  %v8421_v20 = vadd.f32 %v8420_v43, %v8419_v33  ;;  %v10584_v48 = vpack.c.bf16 %v5187_v58, %v5180_v50  ;;  %v16474_v28 = vld [vmem:[#allocation26_spill] sm:$0xff] }
 0x244   :  { %10553 = vmatpush3.bf16.msra.mxu0 %v14176_v40  ;;  %10579 = vmatprep.subr.bf16.mxu1 %v10578_v26  ;;  %v16470_v26 = vld [vmem:[#allocation29_spill] sm:$0xff]  ;;  %v10594_v25 = vpack.c.bf16 %v16472_v45, %v16471_v42  ;;  %v10598_v41 = vpack.c.bf16 %v13933_v59, %v13931_v14  ;;  %v16477_v58 = vld [vmem:[#allocation22_spill] sm:$0xff]  ;;  %v10606_v33 = vpack.c.bf16 %v14016_v17, %v14011_v9 }
 0x245   :  { %10587 = vmatprep.subr.bf16.mxu0 %v10586_v19  ;;  %v5071_v62 = vand.u32 4294901760, %v5070_v5  ;;  %v10592_v6 = vpack.c.bf16 %v16470_v26, %v16469_v27  ;;  %v3111_v32 = vadd.f32 %v8421_v20, %v3000_v60  ;;  %v10596_v19 = vpack.c.bf16 %v13904_v55, %v13902_v44  ;;  %v16473_v60 = vld [vmem:[#allocation15_spill] sm:$0xff]  ;;  %v16476_v5 = vld [vmem:[#allocation28_spill] sm:$0xff] }
 0x246   :  { %v10602_v50 = vpack.c.bf16 %v13983_v1, %v16476_v5  ;;  %v16482_v20 = vld [vmem:[#allocation27_spill] sm:$0xff] }
 0x247   :  { %5057 = vmatmul.mubr.f32.vlgmr.msra.gmra.mrb[60].mxu0 %v5056_v54  ;;  %10581 = vmatpush3.bf16.msra.mxu1 %v10580_v56  ;;  %v16475_v54 = vld [vmem:[#allocation17_spill] sm:$0xff] }
 0x248   :  { %10589 = vmatpush3.bf16.msra.mxu0 %v10588_v23  ;;  %5066 = vmatprep.mubr.f32.mxu0 %v5065_v63  ;;  %v10600_v56 = vpack.c.bf16 %v16475_v54, %v16474_v28  ;;  %v16478_v23 = vand.u32 4294901760, %v13961_v16  ;;  %v10604_v63 = vpack.c.bf16 %v13993_v37, %v13991_v36 }
 0x249   :  { %10583 = vmatprep.subr.bf16.mxu1 %v10582_v46  ;;  %10591 = vmatprep.subr.bf16.mxu0 %v10590_v61  ;;  %v16479_v46 = vld [vmem:[#allocation33_spill] sm:$0xff]  ;;  %v16480_v61 = vld [vmem:[#allocation20_spill] sm:$0xff] }
 0x24a   :  { %v10608_v43 = vpack.c.bf16 %v16480_v61, %v14036_v31 }
 0x24b   :  { %5072 = vmatmul.mubr.f32.gmra.mrb[62].mxu0 %v5071_v62  ;;  %10585 = vmatpush3.bf16.msra.mxu1 %v10584_v48 }
 0x24c   :  { %10593 = vmatpush3.bf16.msra.mxu0 %v10592_v6  ;;  %10619 = vmatprep.subr.bf16.mxu1 %v13848_v0 }
 0x24d   :  { %10595 = vmatprep.subr.bf16.mxu0 %v10594_v25  ;;  %5446 = vmatprep.mubr.f32.mxu0 %v13961_v16  ;;  %v16481_v16 = vld [vmem:[#allocation23_spill] sm:$0xff]  ;;  %v16483_v25 = vld [vmem:[#allocation18_spill] sm:$0xff] }
 0x24e   :  { %5304 = vmatmul.mubr.f32.vlgmr.msra.gmra.mrb[60].mxu1 %v14101_v13  ;;  %v10610_v62 = vpack.c.bf16 %v16482_v20, %v16481_v16  ;;  %v14253_v13 = vld [vmem:[#allocation5 + $0x688] sm:$0xff] }
 0x24f   :  { %10621 = vmatpush3.bf16.msra.mxu1 %v13874_v38  ;;  %5309 = vmatprep.mubr.f32.mxu1 %v14112_v49  ;;  %v14251_v49 = vld [vmem:[#allocation5 + $0x680] sm:$0xff] }
 0x250   :  { %10597 = vmatpush3.bf16.msra.mxu0 %v10596_v19  ;;  %10623 = vmatprep.subr.bf16.mxu1 %v16473_v60 }
 0x251   :  { %10599 = vmatprep.subr.bf16.mxu0 %v10598_v41  ;;  %v16484_v41 = vld [vmem:[#allocation34_spill] sm:$0xff] }
 0x252   :  { %5311 = vmatmul.mubr.f32.gmra.mrb[62].mxu1 %v14141_v35  ;;  %v16485_v35 = vld [vmem:[#allocation25_spill] sm:$0xff] }
 0x253   :  { %10625 = vmatpush3.bf16.msra.mxu1 %v16477_v58  ;;  %5562 = vmatprep.mubr.f32.mxu1 %v16478_v23 }
 0x254   :  { %10601 = vmatpush3.bf16.msra.mxu0 %v10600_v56  ;;  %10627 = vmatprep.subr.bf16.mxu1 %v13884_v12  ;;  %v10612_v56 = vpack.c.bf16 %v14081_v18, %v14077_v10 }
 0x255   :  { %10603 = vmatprep.subr.bf16.mxu0 %v10602_v50  ;;  %v8454_v48 = vpop.f32.mrb[36].mxu0  ;;  %v10614_v50 = vpack.c.bf16 %v14121_v3, %v14118_v30 }
 0x256   :  { %v8455_v6 = vpop.f32.mrb[37].mxu0 }
 0x257   :  { %10629 = vmatpush3.bf16.msra.mxu1 %v13898_v7  ;;  %v8456_v19 = vadd.f32 %v8455_v6, %v8454_v48  ;;  %v14260_v6 = vld [vmem:[#allocation5 + $0x608] sm:$0xff]  ;;  %v16492_v7 = vand.u32 4294901760, %v16469_v27 }
 0x258   :  { %10605 = vmatpush3.bf16.msra.mxu0 %v10604_v63  ;;  %10631 = vmatprep.subr.bf16.mxu1 %v16479_v46 }
 0x259   :  { %10607 = vmatprep.subr.bf16.mxu0 %v10606_v33  ;;  %v3223_v23 = vadd.f32 %v8456_v19, %v3104_v53  ;;  %v8457_v63 = vpop.f32.mrb[38].mxu0  ;;  %v16486_v19 = vand.u32 4294901760, %v13749_v47  ;;  %v16488_v47 = vand.u32 4294901760, %v13761_v8  ;;  %v16494_v8 = vand.u32 4294901760, %v16471_v42 }
 0x25a   :  { %v8458_v33 = vpop.f32.mrb[39].mxu0 }
 0x25b   :  { %10633 = vmatpush3.bf16.msra.mxu1 %v16483_v25  ;;  %v8459_v48 = vadd.f32 %v8458_v33, %v8457_v63  ;;  %v5920_v63 = vand.u32 4294901760, %v14253_v13 }
 0x25c   :  { %10609 = vmatpush3.bf16.msra.mxu0 %v10608_v43  ;;  %10635 = vmatprep.subr.bf16.mxu1 %v16484_v41  ;;  %v10616_v43 = vpack.c.bf16 %v14136_v52, %v14133_v39  ;;  %v8492_v53 = vpop.f32.mrb[36].mxu1 }
 0x25d   :  { %10611 = vmatprep.subr.bf16.mxu0 %v10610_v62  ;;  %v14258_v62 = vld [vmem:[#allocation5 + $0x600] sm:$0xff]  ;;  %v3238_v25 = vadd.f32 %v8459_v48, %v3111_v32  ;;  %v8493_v46 = vpop.f32.mrb[37].mxu1  ;;  %v16491_v48 = vand.u32 4294901760, %v16468_v29 }
 0x25e   :  { %v8494_v33 = vadd.f32 %v8493_v46, %v8492_v53  ;;  %v16490_v46 = vand.u32 4294901760, %v13850_v34  ;;  %v14298_v34 = vsub.f32 %v14253_v13, %v5920_v63 }
 0x25f   :  { %10637 = vmatpush3.bf16.msra.mxu1 %v16485_v35  ;;  %v16487_v35 = vand.u32 4294901760, %v13754_v21  ;;  %v16489_v21 = vand.u32 4294901760, %v13766_v4  ;;  %v16495_v4 = vand.u32 4294901760, %v16472_v45  ;;  %v314_v45 = vld [vmem:[#allocation5 + $0x690] sm:$0xff] }
 0x260   :  { %10613 = vmatpush3.bf16.msra.mxu0 %v10612_v56  ;;  %10639 = vmatprep.subr.bf16.mxu1 %v14000_v22  ;;  %v5917_v56 = vand.u32 4294901760, %v14251_v49  ;;  %v14276_v32 = vadd.f32 %v8494_v33, %v3223_v23  ;;  %v10654_v53 = vpack.c.bf16 %v16491_v48, %v16490_v46  ;;  %v315_v23 = vld [vmem:[#allocation5 + $0x698] sm:$0xff]  ;;  %v16498_v33 = vand.u32 4294901760, %v13902_v44 }
 0x261   :  { %10615 = vmatprep.subr.bf16.mxu0 %v10614_v50  ;;  %v10650_v41 = vpack.c.bf16 %v16487_v35, %v16486_v19  ;;  %v10652_v35 = vpack.c.bf16 %v16489_v21, %v16488_v47  ;;  %v8495_v50 = vpop.f32.mrb[38].mxu1  ;;  %v10658_v47 = vpack.c.bf16 %v16495_v4, %v16494_v8  ;;  %v16499_v21 = vand.u32 4294901760, %v13904_v55 }
 0x262   :  { %v8496_v19 = vpop.f32.mrb[39].mxu1  ;;  %v16500_v46 = vand.u32 4294901760, %v13931_v14  ;;  %v16501_v48 = vand.u32 4294901760, %v13933_v59  ;;  %v16503_v8 = vand.u32 4294901760, %v16475_v54  ;;  %v16505_v44 = vand.u32 4294901760, %v16476_v5  ;;  %v298_v54 = vld [vmem:[#allocation5 + $0x610] sm:$0xff] }
 0x263   :  { %10641 = vmatpush3.bf16.msra.mxu1 %v14038_v24  ;;  %v8497_v29 = vadd.f32 %v8496_v19, %v8495_v50  ;;  %v10660_v50 = vpack.c.bf16 %v16499_v21, %v16498_v33  ;;  %v16506_v55 = vand.u32 4294901760, %v13983_v1  ;;  %v16507_v14 = vand.u32 4294901760, %v13991_v36  ;;  %v299_v5 = vld [vmem:[#allocation5 + $0x618] sm:$0xff]  ;;  %v317_v1 = vld [vmem:[#allocation5 + $0x6a8] sm:$0xff] }
 0x264   :  { %10617 = vmatpush3.bf16.msra.mxu0 %v10616_v43  ;;  %10643 = vmatprep.subr.bf16.mxu1 %v14059_v15  ;;  %v16493_v43 = vand.u32 4294901760, %v16470_v26  ;;  %v16497_v26 = vand.u32 4294901760, %v14260_v6  ;;  %v10662_v19 = vpack.c.bf16 %v16501_v48, %v16500_v46  ;;  %v16508_v59 = vand.u32 4294901760, %v13993_v37  ;;  %v316_v46 = vld [vmem:[#allocation5 + $0x6a0] sm:$0xff] }
 0x265   :  { %10651 = vmatprep.subr.bf16.mxu0 %v10650_v41  ;;  %v14293_v41 = vsub.f32 %v14251_v49, %v5917_v56  ;;  %v16509_v33 = vand.u32 4294901760, %v14011_v9  ;;  %v5926_v21 = vand.u32 4294901760, %v315_v23  ;;  %v16511_v36 = vand.u32 4294901760, %v14036_v31 }
 0x266   :  { %v10656_v22 = vpack.c.bf16 %v16493_v43, %v16492_v7  ;;  %v16496_v7 = vand.u32 4294901760, %v14258_v62  ;;  %v14310_v42 = vsub.f32 %v14260_v6, %v16497_v26  ;;  %v16502_v43 = vand.u32 4294901760, %v16474_v28 }
 0x267   :  { %5449 = vmatmul.mubr.f32.vlgmr.msra.gmra.mrb[64].mxu0 %v14127_v57  ;;  %10645 = vmatpush3.bf16.msra.mxu1 %v14075_v2  ;;  %v14334_v26 = vpack.c.bf16 %v16506_v55, %v16505_v44  ;;  %v14340_v28 = vpack.c.bf16 %v16508_v59, %v16507_v14  ;;  %v15843_v48 = vand.u32 4294901760, %v14293_v41  ;;  %v16512_v37 = vand.u32 4294901760, %v16480_v61 }
 0x268   :  { %v14305_v27 = vsub.f32 %v14258_v62, %v16496_v7  ;;  %10653 = vmatpush3.bf16.msra.mxu0 %v10652_v35  ;;  %5455 = vmatprep.mubr.f32.mxu0 %v14152_v11  ;;  %v14325_v4 = vpack.c.bf16 %v16503_v8, %v16502_v43  ;;  %v14327_v7 = vadd.f32 %v8497_v29, %v3238_v25  ;;  %v16504_v35 = vld [vmem:[#allocation32_spill] sm:$0xff]  ;;  %v16510_v25 = vand.u32 4294901760, %v14016_v17 }
 0x269   :  { %10647 = vmatprep.subr.bf16.mxu1 %v16504_v35  ;;  %10655 = vmatprep.subr.bf16.mxu0 %v10654_v53  ;;  %v5923_v53 = vand.u32 4294901760, %v314_v45  ;;  %v14355_v9 = vpack.c.bf16 %v16512_v37, %v16511_v36  ;;  %v15841_v17 = vand.u32 4294901760, %v14298_v34  ;;  %v15837_v8 = vand.u32 4294901760, %v14310_v42  ;;  %v16521_v37 = vld [vmem:[#allocation11_spill] sm:$0xff] }
 0x26a   :  { %v14346_v29 = vpack.c.bf16 %v16510_v25, %v16509_v33  ;;  %v15840_v43 = vand.u32 4294901760, %v14305_v27  ;;  %v16513_v44 = vand.u32 4294901760, %v16481_v16  ;;  %v16514_v55 = vand.u32 4294901760, %v16482_v20 }
 0x26b   :  { %5458 = vmatmul.mubr.f32.gmra.mrb[66].mxu0 %v14165_v51  ;;  %10649 = vmatpush3.bf16.msra.mxu1 %v14176_v40  ;;  %v16515_v31 = vand.u32 4294901760, %v14077_v10  ;;  %v16516_v61 = vand.u32 4294901760, %v14081_v18  ;;  %v16517_v33 = vand.u32 4294901760, %v14118_v30  ;;  %v16518_v25 = vand.u32 4294901760, %v14121_v3 }
 0x26c   :  { %10657 = vmatpush3.bf16.msra.mxu0 %v10656_v22  ;;  %10683 = vmatprep.subr.bf16.mxu1 %v13848_v0  ;;  %v14365_v14 = vpack.c.bf16 %v16514_v55, %v16513_v44  ;;  %v5875_v22 = vand.u32 4294901760, %v298_v54  ;;  %v16519_v0 = vand.u32 4294901760, %v14133_v39  ;;  %v16520_v16 = vand.u32 4294901760, %v14136_v52  ;;  %v300_v55 = vld [vmem:[#allocation5 + $0x620] sm:$0xff] }
 0x26d   :  { %v14371_v59 = vpack.c.bf16 %v16516_v61, %v16515_v31  ;;  %v14377_v36 = vpack.c.bf16 %v16518_v25, %v16517_v33  ;;  %10659 = vmatprep.subr.bf16.mxu0 %v10658_v47  ;;  %5743 = vmatprep.mubr.f32.mxu0 %v16521_v37  ;;  %v5878_v10 = vand.u32 4294901760, %v299_v5  ;;  %v5929_v18 = vand.u32 4294901760, %v316_v46  ;;  %v301_v31 = vld [vmem:[#allocation5 + $0x628] sm:$0xff] }
 0x26e   :  { %v14383_v20 = vpack.c.bf16 %v16520_v16, %v16519_v0  ;;  %v5932_v44 = vand.u32 4294901760, %v317_v1  ;;  %v16522_v30 = vand.u32 4294901760, %v14127_v57  ;;  %v14392_v3 = vpack.c.bf16 %v5920_v63, %v5917_v56  ;;  %v319_v16 = vld [vmem:[#allocation5 + $0x6b8] sm:$0xff] }
 0x26f   :  { %v14394_v39 = vsub.f32 %v314_v45, %v5923_v53  ;;  %v14396_v52 = vsub.f32 %v315_v23, %v5926_v21  ;;  %v6111_v47 = vsub.f32 %v14293_v41, %v15843_v48  ;;  %v16524_v61 = vand.u32 4294901760, %v14152_v11 }
 0x270   :  { %5566 = vmatmul.mubr.f32.vlgmr.msra.gmra.mrb[64].mxu1 %v16522_v30  ;;  %v6118_v57 = vsub.f32 %v14298_v34, %v15841_v17  ;;  %v5999_v13 = vsub.f32 %v14305_v27, %v15840_v43  ;;  %v6006_v49 = vsub.f32 %v14310_v42, %v15837_v8  ;;  %10661 = vmatpush3.bf16.msra.mxu0 %v10660_v50  ;;  %v16526_v11 = vand.u32 4294901760, %v14260_v6 }
 0x271   :  { %16523 = vst [vmem:[#allocation16_spill] sm:$0xff] %v14396_v52  ;;  %10685 = vmatpush3.bf16.msra.mxu1 %v13874_v38  ;;  %5573 = vmatprep.mubr.f32.mxu1 %v16524_v61  ;;  %v16525_v38 = vand.u32 4294901760, %v14258_v62  ;;  %v14420_v63 = vsub.f32 %v298_v54, %v5875_v22  ;;  %v5881_v45 = vand.u32 4294901760, %v300_v55  ;;  %v5884_v23 = vand.u32 4294901760, %v301_v31  ;;  %v302_v61 = vld [vmem:[#allocation5 + $0x630] sm:$0xff] }
 0x272   :  { %10687 = vmatprep.subr.bf16.mxu1 %v16473_v60  ;;  %10663 = vmatprep.subr.bf16.mxu0 %v10662_v19  ;;  %v14422_v33 = vpack.c.bf16 %v5926_v21, %v5923_v53  ;;  %v14424_v25 = vpack.c.bf16 %v5878_v10, %v5875_v22  ;;  %v14426_v0 = vsub.f32 %v299_v5, %v5878_v10  ;;  %v318_v60 = vld [vmem:[#allocation5 + $0x6b0] sm:$0xff]  ;;  %v16531_v62 = vand.u32 4294901760, %v14165_v51  ;;  %v53_v53 = vld [vmem:[#allocation2 + $0x68] sm:$0xff] }
 0x273   :  { %v14418_v56 = vpack.c.bf16 %v16526_v11, %v16525_v38  ;;  %16527 = vst [vmem:[#allocation13_spill] sm:$0xff] %v14420_v63  ;;  %v14428_v50 = vpack.c.bf16 %v5932_v44, %v5929_v18  ;;  %v14432_v6 = vsub.f32 %v316_v46, %v5929_v18  ;;  %v14434_v54 = vsub.f32 %v317_v1, %v5932_v44  ;;  %v303_v18 = vld [vmem:[#allocation5 + $0x638] sm:$0xff] }
 0x274   :  { %16528 = vst [vmem:[#allocation29_spill] sm:$0xff] %v14422_v33  ;;  %16529 = vst [vmem:[#allocation12_spill] sm:$0xff] %v14424_v25  ;;  %5577 = vmatmul.mubr.f32.gmra.mrb[66].mxu1 %v16531_v62  ;;  %v6112_v30 = vand.u32 4294901760, %v6111_v47  ;;  %v15835_v19 = vand.u32 4294901760, %v14394_v39  ;;  %v6119_v21 = vand.u32 4294901760, %v6118_v57  ;;  %v6000_v5 = vand.u32 4294901760, %v5999_v13  ;;  %10665 = vmatpush3.bf16.msra.mxu0 %v14325_v4 }
 0x275   :  { %16530 = vst [vmem:[#allocation14_spill] sm:$0xff] %v14426_v0  ;;  %16532 = vst [vmem:[#allocation15_spill] sm:$0xff] %v14432_v6  ;;  %10689 = vmatpush3.bf16.msra.mxu1 %v16477_v58  ;;  %5854 = vmatprep.mubr.f32.mxu1 %v16521_v37  ;;  %v6007_v22 = vand.u32 4294901760, %v6006_v49  ;;  %v15836_v10 = vand.u32 4294901760, %v14396_v52  ;;  %v14442_v51 = vpack.c.bf16 %v5884_v23, %v5881_v45  ;;  %v5935_v46 = vand.u32 4294901760, %v318_v60  ;;  %v320_v57 = vld [vmem:[#allocation5 + $0x6c0] sm:$0xff] }
 0x276   :  { %16533 = vst [vmem:[#allocation26_spill] sm:$0xff] %v14434_v54  ;;  %10691 = vmatprep.subr.bf16.mxu1 %v13884_v12  ;;  %v5938_v1 = vand.u32 4294901760, %v319_v16  ;;  %v15838_v44 = vand.u32 4294901760, %v14420_v63  ;;  %10667 = vmatprep.subr.bf16.mxu0 %v14334_v26  ;;  %v14446_v58 = vsub.f32 %v300_v55, %v5881_v45  ;;  %v14448_v37 = vsub.f32 %v301_v31, %v5884_v23  ;;  %v14451_v13 = vld [vmem:[#allocation5 + $0x6c8] sm:$0xff]  ;;  %v16535_v26 = vld [vmem:[#allocation21_spill] sm:$0xff] }
 0x277   :  { %16534 = vst [vmem:[#allocation17_spill] sm:$0xff] %v14442_v51  ;;  %v15839_v47 = vand.u32 4294901760, %v14426_v0  ;;  %v85_v4 = vmul.f32 %v53_v53, %v53_v53  ;;  %v6125_v12 = vsub.f32 %v14394_v39, %v15835_v19  ;;  %v5887_v49 = vand.u32 4294901760, %v302_v61  ;;  %v16536_v62 = vld [vmem:[#allocation33_spill] sm:$0xff] }
 0x278   :  { %v15842_v38 = vand.u32 4294901760, %v14432_v6  ;;  %v15844_v11 = vand.u32 4294901760, %v14434_v54  ;;  %v14459_v55 = vpack.c.bf16 %v6119_v21, %v6112_v30  ;;  %v14461_v31 = vpack.c.bf16 %v6007_v22, %v6000_v5  ;;  %10669 = vmatpush3.bf16.msra.mxu0 %v14340_v28 }
 0x279   :  { %10693 = vmatpush3.bf16.msra.mxu1 %v16535_v26  ;;  %v6132_v45 = vsub.f32 %v14396_v52, %v15836_v10  ;;  %v5890_v23 = vand.u32 4294901760, %v303_v18  ;;  %v14468_v53 = vpack.c.bf16 %v5938_v1, %v5935_v46  ;;  %v6013_v19 = vsub.f32 %v14420_v63, %v15838_v44  ;;  %10671 = vmatprep.subr.bf16.mxu0 %v14346_v29 }
 0x27a   :  { %10695 = vmatprep.subr.bf16.mxu1 %v16536_v62  ;;  %v5941_v26 = vand.u32 4294901760, %v320_v57  ;;  %v5944_v30 = vand.u32 4294901760, %v14451_v13  ;;  %v14475_v21 = vsub.f32 %v318_v60, %v5935_v46  ;;  %v14477_v5 = vsub.f32 %v319_v16, %v5938_v1  ;;  %v8530_v62 = vpop.f32.mrb[40].mxu0  ;;  %v304_v60 = vld [vmem:[#allocation5 + $0x640] sm:$0xff]  ;;  %v305_v16 = vld [vmem:[#allocation5 + $0x648] sm:$0xff] }
 0x27b   :  { %16537 = vst [vmem:[#allocation28_spill] sm:$0xff] %v14468_v53  ;;  %v6020_v28 = vsub.f32 %v14426_v0, %v15839_v47  ;;  %v14482_v22 = vand.u32 4294901760, %v85_v4  ;;  %v6126_v10 = vand.u32 4294901760, %v6125_v12  ;;  %v14484_v8 = vsub.f32 %v302_v61, %v5887_v49  ;;  %v8531_v46 = vpop.f32.mrb[41].mxu0  ;;  %v16540_v1 = vld [vmem:[#allocation18_spill] sm:$0xff]  ;;  %v323_v0 = vld [vmem:[#allocation5 + $0x6d8] sm:$0xff] }
 0x27c   :  { %v6139_v44 = vsub.f32 %v14432_v6, %v15842_v38  ;;  %v6146_v29 = vsub.f32 %v14434_v54, %v15844_v11  ;;  %v6133_v47 = vand.u32 4294901760, %v6132_v45  ;;  %v14493_v43 = vpack.c.bf16 %v5890_v23, %v5887_v49  ;;  %10673 = vmatpush3.bf16.msra.mxu0 %v14355_v9  ;;  %v16542_v38 = vld [vmem:[#allocation34_spill] sm:$0xff]  ;;  %v322_v6 = vld [vmem:[#allocation5 + $0x6d0] sm:$0xff]  ;;  %v8533_v9 = vpop.f32.mrb[42].mxu0 }
 0x27d   :  { %16538 = vst [vmem:[#allocation22_spill] sm:$0xff] %v14482_v22  ;;  %16539 = vst [vmem:[#allocation20_spill] sm:$0xff] %v14484_v8  ;;  %10697 = vmatpush3.bf16.msra.mxu1 %v16540_v1  ;;  %v8532_v17 = vadd.f32 %v8531_v46, %v8530_v62  ;;  %v14499_v48 = vsub.f32 %v303_v18, %v5890_v23  ;;  %v6014_v11 = vand.u32 4294901760, %v6013_v19  ;;  %10675 = vmatprep.subr.bf16.mxu0 %v14365_v14  ;;  %v8534_v19 = vpop.f32.mrb[43].mxu0  ;;  %v16546_v23 = vld [vmem:[#allocation25_spill] sm:$0xff] }
 0x27e   :  { %16541 = vst [vmem:[#allocation23_spill] sm:$0xff] %v14493_v43  ;;  %10699 = vmatprep.subr.bf16.mxu1 %v16542_v38  ;;  %v14501_v54 = vpack.c.bf16 %v5944_v30, %v5941_v26  ;;  %v6021_v45 = vand.u32 4294901760, %v6020_v28  ;;  %v5893_v49 = vand.u32 4294901760, %v304_v60  ;;  %v5896_v1 = vand.u32 4294901760, %v305_v16 }
 0x27f   :  { %16543 = vst [vmem:[#allocation27_spill] sm:$0xff] %v14499_v48  ;;  %v14505_v12 = vsub.f32 %v85_v4, %v14482_v22  ;;  %v3615_v62 = vadd.f32 %v8532_v17, %v14276_v32  ;;  %v14508_v46 = vsub.f32 %v320_v57, %v5941_v26  ;;  %v6140_v18 = vand.u32 4294901760, %v6139_v44  ;;  %v16549_v17 = vld [vmem:[#allocation19_spill] sm:$0xff] }
 0x280   :  { %16544 = vst [vmem:[#allocation32_spill] sm:$0xff] %v14501_v54  ;;  %v6147_v38 = vand.u32 4294901760, %v6146_v29  ;;  %v14511_v61 = vpack.c.bf16 %v6133_v47, %v6126_v10  ;;  %v16547_v14 = vand.u32 4294901760, %v14446_v58  ;;  %v16548_v63 = vand.u32 4294901760, %v14448_v37  ;;  %10677 = vmatpush3.bf16.msra.mxu0 %v14371_v59  ;;  %v8568_v47 = vpop.f32.mrb[40].mxu1  ;;  %v306_v10 = vld [vmem:[#allocation5 + $0x650] sm:$0xff] }
 0x281   :  { %16545 = vst [vmem:[#allocation11_spill] sm:$0xff] %v14508_v46  ;;  %10701 = vmatpush3.bf16.msra.mxu1 %v16546_v23  ;;  %v5947_v52 = vand.u32 4294901760, %v322_v6  ;;  %v8535_v32 = vadd.f32 %v8534_v19, %v8533_v9  ;;  %v5950_v44 = vand.u32 4294901760, %v323_v0  ;;  %v15855_v57 = vand.u32 4294901760, %v14475_v21  ;;  %10679 = vmatprep.subr.bf16.mxu0 %v14377_v36  ;;  %v8569_v19 = vpop.f32.mrb[41].mxu1 }
 0x282   :  { %v6027_v28 = vsub.f32 %v14446_v58, %v16547_v14  ;;  %v6034_v4 = vsub.f32 %v14448_v37, %v16548_v63  ;;  %10703 = vmatprep.subr.bf16.mxu1 %v16549_v17  ;;  %v14524_v26 = vpack.c.bf16 %v6021_v45, %v6014_v11  ;;  %v14527_v29 = vsub.f32 %v14451_v13, %v5944_v30  ;;  %v307_v13 = vld [vmem:[#allocation5 + $0x658] sm:$0xff] }
 0x283   :  { %v14529_v63 = vpack.c.bf16 %v5896_v1, %v5893_v49  ;;  %v15856_v9 = vand.u32 4294901760, %v14505_v12  ;;  %v3624_v59 = vadd.f32 %v8535_v32, %v14327_v7  ;;  %v14533_v23 = vpack.c.bf16 %v6147_v38, %v6140_v18 }
 0x284   :  { %v14535_v14 = vsub.f32 %v304_v60, %v5893_v49  ;;  %v14537_v17 = vsub.f32 %v305_v16, %v5896_v1  ;;  %v8570_v36 = vadd.f32 %v8569_v19, %v8568_v47  ;;  %v6028_v11 = vand.u32 4294901760, %v6027_v28  ;;  %10681 = vmatpush3.bf16.msra.mxu0 %v14383_v20  ;;  %v8571_v1 = vpop.f32.mrb[42].mxu1  ;;  %v325_v19 = vld [vmem:[#allocation5 + $0x6e8] sm:$0xff] }
 0x285   :  { %16550 = vst [vmem:[#allocation21_spill] sm:$0xff] %v14529_v63  ;;  %10705 = vmatpush3.bf16.msra.mxu1 %v14038_v24  ;;  %v15857_v30 = vand.u32 4294901760, %v14484_v8  ;;  %v15858_v45 = vand.u32 4294901760, %v14499_v48  ;;  %v6035_v7 = vand.u32 4294901760, %v6034_v4  ;;  %v14544_v18 = vpack.c.bf16 %v5950_v44, %v5947_v52  ;;  %10715 = vmatprep.subr.bf16.mxu0 %v14392_v3  ;;  %v8572_v4 = vpop.f32.mrb[43].mxu1 }
 0x286   :  { %10707 = vmatprep.subr.bf16.mxu1 %v14059_v15  ;;  %v6153_v60 = vsub.f32 %v14475_v21, %v15855_v57  ;;  %v16552_v16 = vand.u32 4294901760, %v14477_v5  ;;  %v14552_v49 = vadd.f32 %v8570_v36, %v3615_v62  ;;  %v14555_v38 = vsub.f32 %v322_v6, %v5947_v52  ;;  %v324_v15 = vld [vmem:[#allocation5 + $0x6e0] sm:$0xff]  ;;  %v16553_v57 = vld [vmem:[#allocation24_spill] sm:$0xff]  ;;  %v16554_v6 = vld [vmem:[#allocation30_spill] sm:$0xff] }
 0x287   :  { %16551 = vst [vmem:[#allocation33_spill] sm:$0xff] %v14544_v18  ;;  %v5899_v20 = vand.u32 4294901760, %v306_v10  ;;  %v5967_v28 = vsub.f32 %v14505_v12, %v15856_v9  ;;  %v14560_v32 = vsub.f32 %v323_v0, %v5950_v44  ;;  %v5902_v47 = vand.u32 4294901760, %v307_v13  ;;  %5745 = vmatmul.mubr.f32.vlgmr.msra.gmra.mrb[68].mxu0 %v16553_v57  ;;  %v308_v62 = vld [vmem:[#allocation5 + $0x660] sm:$0xff] }
 0x288   :  { %v6160_v24 = vsub.f32 %v14477_v5, %v16552_v16  ;;  %v8573_v36 = vadd.f32 %v8572_v4, %v8571_v1  ;;  %v6041_v52 = vsub.f32 %v14484_v8, %v15857_v30  ;;  %v6048_v0 = vsub.f32 %v14499_v48, %v15858_v45  ;;  %10717 = vmatpush3.bf16.msra.mxu0 %v14418_v56  ;;  %v309_v16 = vld [vmem:[#allocation5 + $0x668] sm:$0xff] }
 0x289   :  { %10709 = vmatpush3.bf16.msra.mxu1 %v14075_v2  ;;  %5750 = vmatprep.mubr.f32.mxu0 %v16554_v6  ;;  %v14574_v44 = vpack.c.bf16 %v6035_v7, %v6028_v11  ;;  %v6154_v9 = vand.u32 4294901760, %v6153_v60  ;;  %v5953_v4 = vand.u32 4294901760, %v324_v15  ;;  %v14580_v30 = vsub.f32 %v306_v10, %v5899_v20 }
 0x28a   :  { %v6161_v1 = vand.u32 4294901760, %v6160_v24  ;;  %v14576_v2 = vadd.f32 %v8573_v36, %v3624_v59  ;;  %10711 = vmatprep.subr.bf16.mxu1 %v16504_v35  ;;  %10719 = vmatprep.subr.bf16.mxu0 %v14422_v33  ;;  %v5956_v45 = vand.u32 4294901760, %v325_v19  ;;  %v5968_v48 = vand.u32 4294901760, %v5967_v28  ;;  %v16557_v36 = vld [vmem:[#allocation31_spill] sm:$0xff] }
 0x28b   :  { %v14582_v8 = vpack.c.bf16 %v5902_v47, %v5899_v20  ;;  %v16555_v11 = vand.u32 4294901760, %v14508_v46  ;;  %v16556_v60 = vand.u32 4294901760, %v14527_v29  ;;  %5752 = vmatmul.mubr.f32.gmra.mrb[70].mxu0 %v16557_v36  ;;  %v6042_v35 = vand.u32 4294901760, %v6041_v52  ;;  %v52_v20 = vld [vmem:[#allocation2 + $0x60] sm:$0xff] }
 0x28c   :  { %v6049_v10 = vand.u32 4294901760, %v6048_v0  ;;  %v5905_v33 = vand.u32 4294901760, %v308_v62  ;;  %v5908_v28 = vand.u32 4294901760, %v309_v16  ;;  %10721 = vmatpush3.bf16.msra.mxu0 %v14424_v25  ;;  %v15869_v59 = vand.u32 4294901760, %v14537_v17  ;;  %5969 = vmatprep.mubr.f32.mxu0 %v5968_v48 }
 0x28d   :  { %v6167_v7 = vsub.f32 %v14508_v46, %v16555_v11  ;;  %v6174_v24 = vsub.f32 %v14527_v29, %v16556_v60  ;;  %10713 = vmatpush3.bf16.msra.mxu1 %v14176_v40  ;;  %v14595_v11 = vpack.c.bf16 %v6161_v1, %v6154_v9  ;;  %v14597_v46 = vsub.f32 %v307_v13, %v5902_v47  ;;  %v14613_v1 = vld [vmem:[#allocation5 + $0x6f0] sm:$0xff] }
 0x28e   :  { %10747 = vmatprep.subr.bf16.mxu1 %v14459_v55  ;;  %v14599_v60 = vsub.f32 %v324_v15, %v5953_v4  ;;  %10723 = vmatprep.subr.bf16.mxu0 %v14428_v50  ;;  %v14603_v40 = vpack.c.bf16 %v5956_v45, %v5953_v4  ;;  %v14605_v52 = vsub.f32 %v325_v19, %v5956_v45  ;;  %v15870_v0 = vand.u32 4294901760, %v14555_v38  ;;  %v69_v55 = vld [vmem:[#allocation2 + $0xe8] sm:$0xff]  ;;  %v14615_v4 = vld [vmem:[#allocation5 + $0x6f8] sm:$0xff] }
 0x28f   :  { %16558 = vst [vmem:[#allocation18_spill] sm:$0xff] %v14597_v46  ;;  %v6168_v9 = vand.u32 4294901760, %v6167_v7  ;;  %v6175_v13 = vand.u32 4294901760, %v6174_v24  ;;  %v16561_v15 = vand.u32 4294901760, %v14535_v14  ;;  %v84_v45 = vmul.f32 %v52_v20, %v52_v20  ;;  %v14630_v24 = vld [vmem:[#allocation5 + $0x670] sm:$0xff] }
 0x290   :  { %16559 = vst [vmem:[#allocation34_spill] sm:$0xff] %v14599_v60  ;;  %16560 = vst [vmem:[#allocation25_spill] sm:$0xff] %v14605_v52  ;;  %5856 = vmatmul.mubr.f32.vlgmr.msra.gmra.mrb[68].mxu1 %v16553_v57  ;;  %v10760_v19 = vpack.c.bf16 %v6049_v10, %v6042_v35  ;;  %v14619_v48 = vpack.c.bf16 %v5908_v28, %v5905_v33  ;;  %v14621_v25 = vsub.f32 %v308_v62, %v5905_v33  ;;  %v68_v35 = vld [vmem:[#allocation2 + $0xe0] sm:$0xff] }
 0x291   :  { %v6055_v47 = vsub.f32 %v14535_v14, %v16561_v15  ;;  %10749 = vmatpush3.bf16.msra.mxu1 %v14461_v31  ;;  %5861 = vmatprep.mubr.f32.mxu1 %v16554_v6  ;;  %v14625_v57 = vsub.f32 %v309_v16, %v5908_v28  ;;  %v6062_v7 = vsub.f32 %v14537_v17, %v15869_v59  ;;  %v14632_v31 = vld [vmem:[#allocation5 + $0x678] sm:$0xff]  ;;  %v5962_v62 = vand.u32 4294901760, %v14615_v4 }
 0x292   :  { %10725 = vmatpush3.bf16.msra.mxu0 %v14442_v51  ;;  %10751 = vmatprep.subr.bf16.mxu1 %v14511_v61  ;;  %v101_v6 = vmul.f32 %v69_v55, %v69_v55  ;;  %v6181_v61 = vsub.f32 %v14555_v38, %v15870_v0  ;;  %v16562_v16 = vand.u32 4294901760, %v14560_v32  ;;  %v10762_v28 = vpack.c.bf16 %v6175_v13, %v6168_v9 }
 0x293   :  { %10727 = vmatprep.subr.bf16.mxu0 %v14468_v53  ;;  %v6056_v20 = vand.u32 4294901760, %v6055_v47  ;;  %v14645_v15 = vand.u32 4294901760, %v84_v45  ;;  %v5911_v59 = vand.u32 4294901760, %v14630_v24  ;;  %v5914_v33 = vand.u32 4294901760, %v14632_v31 }
 0x294   :  { %v6188_v10 = vsub.f32 %v14560_v32, %v16562_v16  ;;  %5863 = vmatmul.mubr.f32.gmra.mrb[70].mxu1 %v16557_v36  ;;  %v100_v53 = vmul.f32 %v68_v35, %v68_v35  ;;  %v6063_v36 = vand.u32 4294901760, %v6062_v7  ;;  %v14656_v47 = vand.u32 4294901760, %v101_v6 }
 0x295   :  { %16563 = vst [vmem:[#allocation19_spill] sm:$0xff] %v14645_v15  ;;  %10753 = vmatpush3.bf16.msra.mxu1 %v14524_v26  ;;  %6220 = vmatprep.mubr.f32.mxu1 %v14482_v22  ;;  %v16565_v26 = vand.u32 4294901760, %v14613_v1  ;;  %v14665_v35 = vsub.f32 %v14615_v4, %v5962_v62  ;;  %v6182_v0 = vand.u32 4294901760, %v6181_v61  ;;  %v14671_v13 = vsub.f32 %v84_v45, %v14645_v15 }
 0x296   :  { %10729 = vmatpush3.bf16.msra.mxu0 %v14493_v43  ;;  %10755 = vmatprep.subr.bf16.mxu1 %v14533_v23  ;;  %16564 = vst [vmem:[#allocation24_spill] sm:$0xff] %v14656_v47  ;;  %v6189_v55 = vand.u32 4294901760, %v6188_v10  ;;  %v16566_v23 = vand.u32 4294901760, %v14580_v30  ;;  %v14680_v4 = vsub.f32 %v14632_v31, %v5914_v33  ;;  %v16567_v61 = vand.u32 4294901760, %v14597_v46 }
 0x297   :  { %10731 = vmatprep.subr.bf16.mxu0 %v14501_v54  ;;  %v14662_v16 = vsub.f32 %v14613_v1, %v16565_v26  ;;  %v14677_v26 = vsub.f32 %v14630_v24, %v5911_v59  ;;  %v16569_v45 = vand.u32 4294901760, %v14599_v60  ;;  %v16570_v24 = vand.u32 4294901760, %v14605_v52 }
 0x298   :  { %v6069_v7 = vsub.f32 %v14580_v30, %v16566_v23  ;;  %v6076_v10 = vsub.f32 %v14597_v46, %v16567_v61  ;;  %v14685_v23 = vand.u32 4294901760, %v100_v53  ;;  %v14696_v31 = vsub.f32 %v101_v6, %v14656_v47 }
 0x299   :  { %10757 = vmatpush3.bf16.msra.mxu1 %v14574_v44  ;;  %v6195_v44 = vsub.f32 %v14599_v60, %v16569_v45  ;;  %v6202_v22 = vsub.f32 %v14605_v52, %v16570_v24  ;;  %v10764_v61 = vpack.c.bf16 %v6063_v36, %v6056_v20  ;;  %v10766_v9 = vpack.c.bf16 %v6189_v55, %v6182_v0 }
 0x29a   :  { %16568 = vst [vmem:[#allocation30_spill] sm:$0xff] %v14685_v23  ;;  %10733 = vmatpush3.bf16.msra.mxu0 %v14529_v63  ;;  %10759 = vmatprep.subr.bf16.mxu1 %v14595_v11  ;;  %v15887_v54 = vand.u32 4294901760, %v14662_v16  ;;  %v8606_v11 = vpop.f32.mrb[44].mxu0  ;;  %v6070_v43 = vand.u32 4294901760, %v6069_v7  ;;  %v16571_v45 = vand.u32 4294901760, %v14621_v25  ;;  %v16572_v24 = vand.u32 4294901760, %v14625_v57 }
 0x29b   :  { %10735 = vmatprep.subr.bf16.mxu0 %v14544_v18  ;;  %v8607_v52 = vpop.f32.mrb[45].mxu0  ;;  %v6077_v20 = vand.u32 4294901760, %v6076_v10  ;;  %v14709_v0 = vsub.f32 %v100_v53, %v14685_v23  ;;  %v15888_v55 = vand.u32 4294901760, %v14677_v26  ;;  %v15889_v36 = vand.u32 4294901760, %v14680_v4 }
 0x29c   :  { %v6083_v60 = vsub.f32 %v14621_v25, %v16571_v45  ;;  %v6090_v6 = vsub.f32 %v14625_v57, %v16572_v24  ;;  %v8608_v7 = vadd.f32 %v8607_v52, %v8606_v11  ;;  %v6196_v46 = vand.u32 4294901760, %v6195_v44  ;;  %v8609_v44 = vpop.f32.mrb[46].mxu0 }
 0x29d   :  { %10761 = vmatpush3.bf16.msra.mxu1 %v10760_v19  ;;  %v6203_v45 = vand.u32 4294901760, %v6202_v22  ;;  %v16573_v19 = vand.u32 4294901760, %v14613_v1  ;;  %v14720_v53 = vpack.c.bf16 %v5914_v33, %v5911_v59  ;;  %v6209_v24 = vsub.f32 %v14662_v16, %v15887_v54 }
 0x29e   :  { %10737 = vmatpush3.bf16.msra.mxu0 %v14582_v8  ;;  %10763 = vmatprep.subr.bf16.mxu1 %v10762_v28  ;;  %v16575_v52 = vand.u32 4294901760, %v14665_v35  ;;  %v3911_v22 = vadd.f32 %v8608_v7, %v14552_v49  ;;  %v16576_v11 = vand.u32 4294901760, %v14671_v13  ;;  %v6084_v1 = vand.u32 4294901760, %v6083_v60 }
 0x29f   :  { %10739 = vmatprep.subr.bf16.mxu0 %v14603_v40  ;;  %v14718_v10 = vpack.c.bf16 %v5962_v62, %v16573_v19  ;;  %v6091_v62 = vand.u32 4294901760, %v6090_v6  ;;  %v8610_v19 = vpop.f32.mrb[47].mxu0  ;;  %v10768_v59 = vpack.c.bf16 %v6077_v20, %v6070_v43  ;;  %v6097_v54 = vsub.f32 %v14677_v26, %v15888_v55 }
 0x2a0   :  { %v6216_v28 = vsub.f32 %v14665_v35, %v16575_v52  ;;  %v5973_v63 = vsub.f32 %v14671_v13, %v16576_v11  ;;  %v6104_v49 = vsub.f32 %v14680_v4, %v15889_v36  ;;  %v8611_v7 = vadd.f32 %v8610_v19, %v8609_v44  ;;  %v8644_v43 = vpop.f32.mrb[44].mxu1 }
 0x2a1   :  { %16574 = vst [vmem:[#allocation31_spill] sm:$0xff] %v14718_v10  ;;  %10765 = vmatpush3.bf16.msra.mxu1 %v10764_v61  ;;  %v10770_v52 = vpack.c.bf16 %v6203_v45, %v6196_v46  ;;  %v16577_v60 = vand.u32 4294901760, %v14696_v31  ;;  %v10778_v6 = vpack.c.bf16 %v14298_v34, %v14293_v41  ;;  %v6210_v20 = vand.u32 4294901760, %v6209_v24  ;;  %v8645_v36 = vpop.f32.mrb[45].mxu1 }
 0x2a2   :  { %10741 = vmatpush3.bf16.msra.mxu0 %v14619_v48  ;;  %10767 = vmatprep.subr.bf16.mxu1 %v10766_v9  ;;  %v6217_v11 = vand.u32 4294901760, %v6216_v28  ;;  %v3918_v55 = vadd.f32 %v8611_v7, %v14576_v2  ;;  %v5974_v44 = vand.u32 4294901760, %v5973_v63  ;;  %v10772_v19 = vpack.c.bf16 %v6091_v62, %v6084_v1  ;;  %v16580_v7 = vld [vmem:[#allocation13_spill] sm:$0xff] }
 0x2a3   :  { %v5982_v61 = vsub.f32 %v14696_v31, %v16577_v60  ;;  %10743 = vmatprep.subr.bf16.mxu0 %v14718_v10  ;;  %v8646_v33 = vadd.f32 %v8645_v36, %v8644_v43  ;;  %v16578_v46 = vand.u32 4294901760, %v14709_v0  ;;  %v6098_v45 = vand.u32 4294901760, %v6097_v54  ;;  %v16579_v36 = vld [vmem:[#allocation16_spill] sm:$0xff] }
 0x2a4   :  { %v6105_v60 = vand.u32 4294901760, %v6104_v49  ;;  %v10780_v24 = vpack.c.bf16 %v14310_v42, %v14305_v27  ;;  %v8647_v2 = vpop.f32.mrb[46].mxu1  ;;  %v10774_v63 = vpack.c.bf16 %v6217_v11, %v6210_v20  ;;  %v10782_v1 = vpack.c.bf16 %v16579_v36, %v14394_v39  ;;  %v16585_v11 = vld [vmem:[#allocation20_spill] sm:$0xff] }
 0x2a5   :  { %10769 = vmatpush3.bf16.msra.mxu1 %v10768_v59  ;;  %v5988_v9 = vsub.f32 %v14709_v0, %v16578_v46  ;;  %v5983_v28 = vand.u32 4294901760, %v5982_v61  ;;  %v4022_v10 = vadd.f32 %v8646_v33, %v3911_v22  ;;  %v8648_v62 = vpop.f32.mrb[47].mxu1  ;;  %v16582_v22 = vld [vmem:[#allocation15_spill] sm:$0xff]  ;;  %v16583_v33 = vld [vmem:[#allocation26_spill] sm:$0xff]  ;;  %v10790_v20 = vpack.c.bf16 %v14477_v5, %v14475_v21 }
 0x2a6   :  { %10745 = vmatpush3.bf16.msra.mxu0 %v14720_v53  ;;  %10771 = vmatprep.subr.bf16.mxu1 %v10770_v52  ;;  %v8649_v59 = vadd.f32 %v8648_v62, %v8647_v2  ;;  %v10776_v49 = vpack.c.bf16 %v6105_v60, %v6098_v45  ;;  %v16581_v52 = vld [vmem:[#allocation14_spill] sm:$0xff]  ;;  %v10786_v61 = vpack.c.bf16 %v16583_v33, %v16582_v22  ;;  %v16588_v60 = vld [vmem:[#allocation12_spill] sm:$0xff] }
 0x2a7   :  { %10779 = vmatprep.subr.bf16.mxu0 %v10778_v6  ;;  %v5989_v54 = vand.u32 4294901760, %v5988_v9  ;;  %v10784_v43 = vpack.c.bf16 %v16581_v52, %v16580_v7  ;;  %v10788_v6 = vpack.c.bf16 %v14448_v37, %v14446_v58  ;;  %v16587_v9 = vld [vmem:[#allocation11_spill] sm:$0xff]  ;;  %v10798_v2 = vpack.c.bf16 %v14560_v32, %v14555_v38 }
 0x2a8   :  { %v4029_v46 = vadd.f32 %v8649_v59, %v3918_v55  ;;  %v16584_v55 = vld [vmem:[#allocation29_spill] sm:$0xff]  ;;  %v10794_v45 = vpack.c.bf16 %v14527_v29, %v16587_v9 }
 0x2a9   :  { %5975 = vmatmul.mubr.f32.vlgmr.msra.gmra.mrb[72].mxu0 %v5974_v44  ;;  %10773 = vmatpush3.bf16.msra.mxu1 %v10772_v19  ;;  %v16586_v44 = vld [vmem:[#allocation27_spill] sm:$0xff]  ;;  %v16593_v59 = vld [vmem:[#allocation25_spill] sm:$0xff] }
 0x2aa   :  { %10781 = vmatpush3.bf16.msra.mxu0 %v10780_v24  ;;  %5984 = vmatprep.mubr.f32.mxu0 %v5983_v28  ;;  %v10792_v19 = vpack.c.bf16 %v16586_v44, %v16585_v11  ;;  %v16589_v24 = vand.u32 4294901760, %v14505_v12  ;;  %v10796_v28 = vpack.c.bf16 %v14537_v17, %v14535_v14 }
 0x2ab   :  { %10775 = vmatprep.subr.bf16.mxu1 %v10774_v63  ;;  %10783 = vmatprep.subr.bf16.mxu0 %v10782_v1  ;;  %v16590_v63 = vld [vmem:[#allocation28_spill] sm:$0xff]  ;;  %v16591_v1 = vld [vmem:[#allocation18_spill] sm:$0xff] }
 0x2ac   :  { %v10800_v62 = vpack.c.bf16 %v16591_v1, %v14580_v30 }
 0x2ad   :  { %5990 = vmatmul.mubr.f32.gmra.mrb[74].mxu0 %v5989_v54  ;;  %10777 = vmatpush3.bf16.msra.mxu1 %v10776_v49 }
 0x2ae   :  { %10785 = vmatpush3.bf16.msra.mxu0 %v10784_v43  ;;  %10811 = vmatprep.subr.bf16.mxu1 %v14392_v3 }
 0x2af   :  { %10787 = vmatprep.subr.bf16.mxu0 %v10786_v61  ;;  %6364 = vmatprep.mubr.f32.mxu0 %v14505_v12  ;;  %v16592_v12 = vld [vmem:[#allocation34_spill] sm:$0xff]  ;;  %v16594_v61 = vld [vmem:[#allocation23_spill] sm:$0xff] }
 0x2b0   :  { %6222 = vmatmul.mubr.f32.vlgmr.msra.gmra.mrb[72].mxu1 %v14645_v15  ;;  %v10802_v54 = vpack.c.bf16 %v16593_v59, %v16592_v12  ;;  %v14797_v15 = vld [vmem:[#allocation5 + $0x788] sm:$0xff] }
 0x2b1   :  { %10813 = vmatpush3.bf16.msra.mxu1 %v14418_v56  ;;  %6227 = vmatprep.mubr.f32.mxu1 %v14656_v47  ;;  %v14795_v47 = vld [vmem:[#allocation5 + $0x780] sm:$0xff] }
 0x2b2   :  { %10789 = vmatpush3.bf16.msra.mxu0 %v10788_v6  ;;  %10815 = vmatprep.subr.bf16.mxu1 %v16584_v55 }
 0x2b3   :  { %10791 = vmatprep.subr.bf16.mxu0 %v10790_v20  ;;  %v16595_v20 = vld [vmem:[#allocation32_spill] sm:$0xff] }
 0x2b4   :  { %6229 = vmatmul.mubr.f32.gmra.mrb[74].mxu1 %v14685_v23  ;;  %v16596_v23 = vld [vmem:[#allocation21_spill] sm:$0xff] }
 0x2b5   :  { %10817 = vmatpush3.bf16.msra.mxu1 %v16588_v60  ;;  %6480 = vmatprep.mubr.f32.mxu1 %v16589_v24 }
 0x2b6   :  { %10793 = vmatpush3.bf16.msra.mxu0 %v10792_v19  ;;  %10819 = vmatprep.subr.bf16.mxu1 %v14428_v50  ;;  %v10804_v19 = vpack.c.bf16 %v14625_v57, %v14621_v25 }
 0x2b7   :  { %10795 = vmatprep.subr.bf16.mxu0 %v10794_v45  ;;  %v10806_v45 = vpack.c.bf16 %v14665_v35, %v14662_v16 }
 0x2b9   :  { %10821 = vmatpush3.bf16.msra.mxu1 %v14442_v51  ;;  %v8682_v49 = vpop.f32.mrb[48].mxu0  ;;  %v16603_v51 = vand.u32 4294901760, %v16580_v7 }
 0x2ba   :  { %10797 = vmatpush3.bf16.msra.mxu0 %v10796_v28  ;;  %10823 = vmatprep.subr.bf16.mxu1 %v16590_v63  ;;  %v8683_v43 = vpop.f32.mrb[49].mxu0 }
 0x2bb   :  { %10799 = vmatprep.subr.bf16.mxu0 %v10798_v2  ;;  %v8684_v6 = vadd.f32 %v8683_v43, %v8682_v49  ;;  %v14804_v43 = vld [vmem:[#allocation5 + $0x708] sm:$0xff] }
 0x2bd   :  { %10825 = vmatpush3.bf16.msra.mxu1 %v16594_v61  ;;  %v4141_v24 = vadd.f32 %v8684_v6, %v4022_v10  ;;  %v8685_v28 = vpop.f32.mrb[50].mxu0  ;;  %v16597_v6 = vand.u32 4294901760, %v14293_v41  ;;  %v16599_v41 = vand.u32 4294901760, %v14305_v27  ;;  %v16605_v27 = vand.u32 4294901760, %v16582_v22 }
 0x2be   :  { %10801 = vmatpush3.bf16.msra.mxu0 %v10800_v62  ;;  %10827 = vmatprep.subr.bf16.mxu1 %v16595_v20  ;;  %v8686_v2 = vpop.f32.mrb[51].mxu0  ;;  %v10808_v62 = vpack.c.bf16 %v14680_v4, %v14677_v26 }
 0x2bf   :  { %10803 = vmatprep.subr.bf16.mxu0 %v10802_v54  ;;  %v8687_v49 = vadd.f32 %v8686_v2, %v8685_v28  ;;  %v14802_v54 = vld [vmem:[#allocation5 + $0x700] sm:$0xff]  ;;  %v6838_v28 = vand.u32 4294901760, %v14797_v15 }
 0x2c0   :  { %v8720_v10 = vpop.f32.mrb[48].mxu1 }
 0x2c1   :  { %10829 = vmatpush3.bf16.msra.mxu1 %v16596_v23  ;;  %v16598_v23 = vand.u32 4294901760, %v14298_v34  ;;  %v4156_v61 = vadd.f32 %v8687_v49, %v4029_v46  ;;  %v8721_v63 = vpop.f32.mrb[49].mxu1  ;;  %v16600_v34 = vand.u32 4294901760, %v14310_v42  ;;  %v16602_v49 = vand.u32 4294901760, %v16579_v36 }
 0x2c2   :  { %10805 = vmatpush3.bf16.msra.mxu0 %v10804_v19  ;;  %10831 = vmatprep.subr.bf16.mxu1 %v14544_v18  ;;  %v6835_v19 = vand.u32 4294901760, %v14795_v47  ;;  %v8722_v2 = vadd.f32 %v8721_v63, %v8720_v10  ;;  %v16601_v63 = vand.u32 4294901760, %v14394_v39  ;;  %v16606_v42 = vand.u32 4294901760, %v16583_v33  ;;  %v346_v33 = vld [vmem:[#allocation5 + $0x790] sm:$0xff] }
 0x2c3   :  { %10807 = vmatprep.subr.bf16.mxu0 %v10806_v45  ;;  %v10842_v20 = vpack.c.bf16 %v16598_v23, %v16597_v6  ;;  %v10844_v23 = vpack.c.bf16 %v16600_v34, %v16599_v41  ;;  %v14842_v39 = vsub.f32 %v14797_v15, %v6838_v28  ;;  %v16610_v34 = vand.u32 4294901760, %v14448_v37 }
 0x2c4   :  { %v14820_v46 = vadd.f32 %v8722_v2, %v4141_v24  ;;  %v8723_v45 = vpop.f32.mrb[50].mxu1  ;;  %v10846_v10 = vpack.c.bf16 %v16602_v49, %v16601_v63  ;;  %v10850_v41 = vpack.c.bf16 %v16606_v42, %v16605_v27  ;;  %v347_v24 = vld [vmem:[#allocation5 + $0x798] sm:$0xff]  ;;  %v16609_v2 = vand.u32 4294901760, %v14446_v58 }
 0x2c5   :  { %10833 = vmatpush3.bf16.msra.mxu1 %v14582_v8  ;;  %v8724_v6 = vpop.f32.mrb[51].mxu1  ;;  %v16611_v63 = vand.u32 4294901760, %v14475_v21  ;;  %v16612_v49 = vand.u32 4294901760, %v14477_v5  ;;  %v16614_v27 = vand.u32 4294901760, %v16586_v44  ;;  %v16616_v58 = vand.u32 4294901760, %v16587_v9  ;;  %v330_v44 = vld [vmem:[#allocation5 + $0x710] sm:$0xff] }
 0x2c6   :  { %10809 = vmatpush3.bf16.msra.mxu0 %v10808_v62  ;;  %10835 = vmatprep.subr.bf16.mxu1 %v14603_v40  ;;  %v16604_v62 = vand.u32 4294901760, %v16581_v52  ;;  %v8725_v36 = vadd.f32 %v8724_v6, %v8723_v45  ;;  %v16608_v52 = vand.u32 4294901760, %v14804_v43  ;;  %v10852_v45 = vpack.c.bf16 %v16610_v34, %v16609_v2  ;;  %v331_v9 = vld [vmem:[#allocation5 + $0x718] sm:$0xff] }
 0x2c7   :  { %10843 = vmatprep.subr.bf16.mxu0 %v10842_v20  ;;  %v14837_v20 = vsub.f32 %v14795_v47, %v6835_v19  ;;  %v10854_v6 = vpack.c.bf16 %v16612_v49, %v16611_v63  ;;  %v16617_v37 = vand.u32 4294901760, %v14527_v29  ;;  %v16618_v21 = vand.u32 4294901760, %v14535_v14  ;;  %v348_v63 = vld [vmem:[#allocation5 + $0x7a0] sm:$0xff]  ;;  %v349_v29 = vld [vmem:[#allocation5 + $0x7a8] sm:$0xff] }
 0x2c8   :  { %v10848_v18 = vpack.c.bf16 %v16604_v62, %v16603_v51  ;;  %v16607_v51 = vand.u32 4294901760, %v14802_v54  ;;  %v14854_v22 = vsub.f32 %v14804_v43, %v16608_v52  ;;  %v16613_v62 = vand.u32 4294901760, %v16585_v11 }
 0x2c9   :  { %6367 = vmatmul.mubr.f32.vlgmr.msra.gmra.mrb[76].mxu0 %v14671_v13  ;;  %10837 = vmatpush3.bf16.msra.mxu1 %v14619_v48  ;;  %v14878_v52 = vpack.c.bf16 %v16617_v37, %v16616_v58  ;;  %v16619_v5 = vand.u32 4294901760, %v14537_v17  ;;  %v16620_v2 = vand.u32 4294901760, %v14555_v38  ;;  %v6844_v34 = vand.u32 4294901760, %v347_v24 }
 0x2ca   :  { %v14849_v7 = vsub.f32 %v14802_v54, %v16607_v51  ;;  %10845 = vmatpush3.bf16.msra.mxu0 %v10844_v23  ;;  %6373 = vmatprep.mubr.f32.mxu0 %v14696_v31  ;;  %v14869_v42 = vpack.c.bf16 %v16614_v27, %v16613_v62  ;;  %v14871_v51 = vadd.f32 %v8725_v36, %v4156_v61  ;;  %v16615_v23 = vld [vmem:[#allocation31_spill] sm:$0xff]  ;;  %v16621_v61 = vand.u32 4294901760, %v14560_v32 }
 0x2cb   :  { %10839 = vmatprep.subr.bf16.mxu1 %v16615_v23  ;;  %10847 = vmatprep.subr.bf16.mxu0 %v10846_v10  ;;  %v14884_v11 = vpack.c.bf16 %v16619_v5, %v16618_v21  ;;  %v6841_v10 = vand.u32 4294901760, %v346_v33  ;;  %v15908_v49 = vand.u32 4294901760, %v14837_v20  ;;  %v16622_v14 = vand.u32 4294901760, %v14580_v30 }
 0x2cc   :  { %v14890_v36 = vpack.c.bf16 %v16621_v61, %v16620_v2  ;;  %v16623_v17 = vand.u32 4294901760, %v16591_v1  ;;  %v15906_v32 = vand.u32 4294901760, %v14842_v39  ;;  %v15905_v62 = vand.u32 4294901760, %v14849_v7 }
 0x2cd   :  { %6376 = vmatmul.mubr.f32.gmra.mrb[78].mxu0 %v14709_v0  ;;  %10841 = vmatpush3.bf16.msra.mxu1 %v14720_v53  ;;  %v15902_v27 = vand.u32 4294901760, %v14854_v22  ;;  %v16624_v58 = vand.u32 4294901760, %v16592_v12  ;;  %v16625_v37 = vand.u32 4294901760, %v16593_v59  ;;  %v16626_v30 = vand.u32 4294901760, %v14621_v25 }
 0x2ce   :  { %v14899_v38 = vpack.c.bf16 %v16623_v17, %v16622_v14  ;;  %10849 = vmatpush3.bf16.msra.mxu0 %v10848_v18  ;;  %10875 = vmatprep.subr.bf16.mxu1 %v14392_v3  ;;  %v16627_v1 = vand.u32 4294901760, %v14625_v57  ;;  %v16628_v2 = vand.u32 4294901760, %v14662_v16  ;;  %v16629_v61 = vand.u32 4294901760, %v14665_v35  ;;  %v16632_v17 = vld [vmem:[#allocation22_spill] sm:$0xff] }
 0x2cf   :  { %v14909_v21 = vpack.c.bf16 %v16625_v37, %v16624_v58  ;;  %v6793_v18 = vand.u32 4294901760, %v330_v44  ;;  %10851 = vmatprep.subr.bf16.mxu0 %v10850_v41  ;;  %v16630_v3 = vand.u32 4294901760, %v14677_v26  ;;  %v16631_v12 = vand.u32 4294901760, %v14680_v4  ;;  %6661 = vmatprep.mubr.f32.mxu0 %v16632_v17  ;;  %v332_v37 = vld [vmem:[#allocation5 + $0x720] sm:$0xff] }
 0x2d0   :  { %v14915_v5 = vpack.c.bf16 %v16627_v1, %v16626_v30  ;;  %v14921_v14 = vpack.c.bf16 %v16629_v61, %v16628_v2  ;;  %v6796_v25 = vand.u32 4294901760, %v331_v9  ;;  %v6847_v57 = vand.u32 4294901760, %v348_v63  ;;  %v333_v30 = vld [vmem:[#allocation5 + $0x728] sm:$0xff] }
 0x2d1   :  { %v14927_v59 = vpack.c.bf16 %v16631_v12, %v16630_v3  ;;  %v6850_v58 = vand.u32 4294901760, %v349_v29  ;;  %v16633_v16 = vand.u32 4294901760, %v14671_v13  ;;  %v14936_v35 = vpack.c.bf16 %v6838_v28, %v6835_v19  ;;  %v351_v12 = vld [vmem:[#allocation5 + $0x7b8] sm:$0xff] }
 0x2d2   :  { %v14938_v26 = vsub.f32 %v346_v33, %v6841_v10  ;;  %v14940_v4 = vsub.f32 %v347_v24, %v6844_v34  ;;  %v7029_v41 = vsub.f32 %v14837_v20, %v15908_v49  ;;  %v16635_v1 = vand.u32 4294901760, %v14696_v31  ;;  %10853 = vmatpush3.bf16.msra.mxu0 %v10852_v45 }
 0x2d3   :  { %6484 = vmatmul.mubr.f32.vlgmr.msra.gmra.mrb[76].mxu1 %v16633_v16  ;;  %v7036_v13 = vsub.f32 %v14842_v39, %v15906_v32  ;;  %v6917_v15 = vsub.f32 %v14849_v7, %v15905_v62  ;;  %v6924_v47 = vsub.f32 %v14854_v22, %v15902_v27  ;;  %v16637_v31 = vand.u32 4294901760, %v14804_v43  ;;  %10855 = vmatprep.subr.bf16.mxu0 %v10854_v6 }
 0x2d4   :  { %16634 = vst [vmem:[#allocation16_spill] sm:$0xff] %v14940_v4  ;;  %10877 = vmatpush3.bf16.msra.mxu1 %v14418_v56  ;;  %6491 = vmatprep.mubr.f32.mxu1 %v16635_v1  ;;  %v16636_v56 = vand.u32 4294901760, %v14802_v54  ;;  %v14964_v28 = vsub.f32 %v330_v44, %v6793_v18  ;;  %v6799_v33 = vand.u32 4294901760, %v332_v37  ;;  %v6802_v24 = vand.u32 4294901760, %v333_v30  ;;  %v334_v1 = vld [vmem:[#allocation5 + $0x730] sm:$0xff] }
 0x2d5   :  { %10879 = vmatprep.subr.bf16.mxu1 %v16584_v55  ;;  %v14966_v2 = vpack.c.bf16 %v6844_v34, %v6841_v10  ;;  %v14968_v61 = vpack.c.bf16 %v6796_v25, %v6793_v18  ;;  %v14970_v3 = vsub.f32 %v331_v9, %v6796_v25  ;;  %v14972_v45 = vpack.c.bf16 %v6850_v58, %v6847_v57  ;;  %v350_v55 = vld [vmem:[#allocation5 + $0x7b0] sm:$0xff]  ;;  %v55_v10 = vld [vmem:[#allocation2 + $0x78] sm:$0xff] }
 0x2d6   :  { %v14962_v19 = vpack.c.bf16 %v16637_v31, %v16636_v56  ;;  %16638 = vst [vmem:[#allocation13_spill] sm:$0xff] %v14964_v28  ;;  %v16642_v54 = vand.u32 4294901760, %v14709_v0  ;;  %v14976_v43 = vsub.f32 %v348_v63, %v6847_v57  ;;  %v14978_v44 = vsub.f32 %v349_v29, %v6850_v58  ;;  %10857 = vmatpush3.bf16.msra.mxu0 %v14869_v42  ;;  %v335_v57 = vld [vmem:[#allocation5 + $0x738] sm:$0xff] }
 0x2d7   :  { %16639 = vst [vmem:[#allocation14_spill] sm:$0xff] %v14966_v2  ;;  %16640 = vst [vmem:[#allocation15_spill] sm:$0xff] %v14968_v61  ;;  %v7030_v16 = vand.u32 4294901760, %v7029_v41  ;;  %v15900_v6 = vand.u32 4294901760, %v14938_v26  ;;  %v7037_v34 = vand.u32 4294901760, %v7036_v13  ;;  %v6918_v9 = vand.u32 4294901760, %v6917_v15  ;;  %10859 = vmatprep.subr.bf16.mxu0 %v14878_v52 }
 0x2d8   :  { %16641 = vst [vmem:[#allocation26_spill] sm:$0xff] %v14970_v3  ;;  %6495 = vmatmul.mubr.f32.gmra.mrb[78].mxu1 %v16642_v54  ;;  %16643 = vst [vmem:[#allocation29_spill] sm:$0xff] %v14976_v43  ;;  %v6925_v18 = vand.u32 4294901760, %v6924_v47  ;;  %v15901_v25 = vand.u32 4294901760, %v14940_v4  ;;  %v14986_v0 = vpack.c.bf16 %v6802_v24, %v6799_v33  ;;  %v6853_v63 = vand.u32 4294901760, %v350_v55  ;;  %v352_v13 = vld [vmem:[#allocation5 + $0x7c0] sm:$0xff] }
 0x2d9   :  { %16644 = vst [vmem:[#allocation20_spill] sm:$0xff] %v14978_v44  ;;  %10881 = vmatpush3.bf16.msra.mxu1 %v16588_v60  ;;  %6772 = vmatprep.mubr.f32.mxu1 %v16632_v17  ;;  %v6856_v29 = vand.u32 4294901760, %v351_v12  ;;  %v15903_v58 = vand.u32 4294901760, %v14964_v28  ;;  %v14990_v60 = vsub.f32 %v332_v37, %v6799_v33  ;;  %v14992_v17 = vsub.f32 %v333_v30, %v6802_v24  ;;  %v14995_v15 = vld [vmem:[#allocation5 + $0x7c8] sm:$0xff]  ;;  %v16645_v52 = vld [vmem:[#allocation17_spill] sm:$0xff]  ;;  %v16646_v54 = vld [vmem:[#allocation28_spill] sm:$0xff] }
 0x2da   :  { %10883 = vmatprep.subr.bf16.mxu1 %v14428_v50  ;;  %v15904_v41 = vand.u32 4294901760, %v14970_v3  ;;  %v87_v42 = vmul.f32 %v55_v10, %v55_v10  ;;  %v7043_v50 = vsub.f32 %v14938_v26, %v15900_v6  ;;  %v6805_v47 = vand.u32 4294901760, %v334_v1  ;;  %10861 = vmatpush3.bf16.msra.mxu0 %v14884_v11 }
 0x2db   :  { %v15907_v56 = vand.u32 4294901760, %v14976_v43  ;;  %v15909_v31 = vand.u32 4294901760, %v14978_v44  ;;  %v15003_v37 = vpack.c.bf16 %v7037_v34, %v7030_v16  ;;  %v15005_v30 = vpack.c.bf16 %v6925_v18, %v6918_v9  ;;  %10863 = vmatprep.subr.bf16.mxu0 %v14890_v36 }
 0x2dc   :  { %v7050_v33 = vsub.f32 %v14940_v4, %v15901_v25  ;;  %v6808_v24 = vand.u32 4294901760, %v335_v57  ;;  %v15012_v10 = vpack.c.bf16 %v6856_v29, %v6853_v63  ;;  %v6931_v6 = vsub.f32 %v14964_v28, %v15903_v58 }
 0x2dd   :  { %10885 = vmatpush3.bf16.msra.mxu1 %v16645_v52  ;;  %v6859_v52 = vand.u32 4294901760, %v352_v13  ;;  %v6862_v16 = vand.u32 4294901760, %v14995_v15  ;;  %v15019_v34 = vsub.f32 %v350_v55, %v6853_v63  ;;  %v15021_v9 = vsub.f32 %v351_v12, %v6856_v29  ;;  %v336_v55 = vld [vmem:[#allocation5 + $0x740] sm:$0xff]  ;;  %v337_v12 = vld [vmem:[#allocation5 + $0x748] sm:$0xff]  ;;  %v16650_v29 = vld [vmem:[#allocation23_spill] sm:$0xff] }
 0x2de   :  { %10887 = vmatprep.subr.bf16.mxu1 %v16646_v54  ;;  %16647 = vst [vmem:[#allocation27_spill] sm:$0xff] %v15012_v10  ;;  %v6938_v11 = vsub.f32 %v14970_v3, %v15904_v41  ;;  %v15026_v18 = vand.u32 4294901760, %v87_v42  ;;  %v8758_v54 = vpop.f32.mrb[52].mxu0  ;;  %v7044_v25 = vand.u32 4294901760, %v7043_v50  ;;  %v15028_v27 = vsub.f32 %v334_v1, %v6805_v47  ;;  %10865 = vmatpush3.bf16.msra.mxu0 %v14899_v38  ;;  %v355_v3 = vld [vmem:[#allocation5 + $0x7d8] sm:$0xff] }
 0x2df   :  { %v7057_v58 = vsub.f32 %v14976_v43, %v15907_v56  ;;  %v7064_v36 = vsub.f32 %v14978_v44, %v15909_v31  ;;  %v8759_v63 = vpop.f32.mrb[53].mxu0  ;;  %v7051_v41 = vand.u32 4294901760, %v7050_v33  ;;  %v15037_v62 = vpack.c.bf16 %v6808_v24, %v6805_v47  ;;  %v16652_v56 = vld [vmem:[#allocation32_spill] sm:$0xff]  ;;  %v354_v43 = vld [vmem:[#allocation5 + $0x7d0] sm:$0xff]  ;;  %10867 = vmatprep.subr.bf16.mxu0 %v14909_v21 }
 0x2e0   :  { %16648 = vst [vmem:[#allocation11_spill] sm:$0xff] %v15026_v18  ;;  %16649 = vst [vmem:[#allocation12_spill] sm:$0xff] %v15028_v27  ;;  %v8760_v32 = vadd.f32 %v8759_v63, %v8758_v54  ;;  %v15043_v49 = vsub.f32 %v335_v57, %v6808_v24  ;;  %v6932_v31 = vand.u32 4294901760, %v6931_v6  ;;  %v15045_v44 = vpack.c.bf16 %v6862_v16, %v6859_v52  ;;  %v8761_v38 = vpop.f32.mrb[54].mxu0  ;;  %v16656_v24 = vld [vmem:[#allocation21_spill] sm:$0xff] }
 0x2e1   :  { %10889 = vmatpush3.bf16.msra.mxu1 %v16650_v29  ;;  %16651 = vst [vmem:[#allocation18_spill] sm:$0xff] %v15037_v62  ;;  %v6939_v33 = vand.u32 4294901760, %v6938_v11  ;;  %v6811_v47 = vand.u32 4294901760, %v336_v55  ;;  %v6814_v29 = vand.u32 4294901760, %v337_v12  ;;  %v15049_v50 = vsub.f32 %v87_v42, %v15026_v18  ;;  %v8762_v6 = vpop.f32.mrb[55].mxu0 }
 0x2e2   :  { %10891 = vmatprep.subr.bf16.mxu1 %v16652_v56  ;;  %16653 = vst [vmem:[#allocation34_spill] sm:$0xff] %v15043_v49  ;;  %16654 = vst [vmem:[#allocation25_spill] sm:$0xff] %v15045_v44  ;;  %v4533_v54 = vadd.f32 %v8760_v32, %v14820_v46  ;;  %v15052_v63 = vsub.f32 %v352_v13, %v6859_v52  ;;  %v7058_v57 = vand.u32 4294901760, %v7057_v58  ;;  %v7065_v56 = vand.u32 4294901760, %v7064_v36  ;;  %v16659_v32 = vld [vmem:[#allocation33_spill] sm:$0xff] }
 0x2e3   :  { %v15055_v1 = vpack.c.bf16 %v7051_v41, %v7044_v25  ;;  %v16657_v21 = vand.u32 4294901760, %v14990_v60  ;;  %v16658_v28 = vand.u32 4294901760, %v14992_v17  ;;  %v6865_v4 = vand.u32 4294901760, %v354_v43  ;;  %10869 = vmatpush3.bf16.msra.mxu0 %v14915_v5  ;;  %v8796_v41 = vpop.f32.mrb[52].mxu1  ;;  %v338_v25 = vld [vmem:[#allocation5 + $0x750] sm:$0xff] }
 0x2e4   :  { %16655 = vst [vmem:[#allocation31_spill] sm:$0xff] %v15052_v63  ;;  %v8763_v46 = vadd.f32 %v8762_v6, %v8761_v38  ;;  %v6868_v58 = vand.u32 4294901760, %v355_v3  ;;  %v15920_v13 = vand.u32 4294901760, %v15019_v34  ;;  %10871 = vmatprep.subr.bf16.mxu0 %v14921_v14  ;;  %v15068_v52 = vpack.c.bf16 %v6939_v33, %v6932_v31  ;;  %v8797_v6 = vpop.f32.mrb[53].mxu1 }
 0x2e5   :  { %10893 = vmatpush3.bf16.msra.mxu1 %v16656_v24  ;;  %v6945_v11 = vsub.f32 %v14990_v60, %v16657_v21  ;;  %v6952_v42 = vsub.f32 %v14992_v17, %v16658_v28  ;;  %v15071_v36 = vsub.f32 %v14995_v15, %v6862_v16  ;;  %v15073_v28 = vpack.c.bf16 %v6814_v29, %v6811_v47  ;;  %v339_v15 = vld [vmem:[#allocation5 + $0x758] sm:$0xff] }
 0x2e6   :  { %10895 = vmatprep.subr.bf16.mxu1 %v16659_v32  ;;  %v15921_v38 = vand.u32 4294901760, %v15049_v50  ;;  %v4542_v5 = vadd.f32 %v8763_v46, %v14871_v51  ;;  %v15077_v24 = vpack.c.bf16 %v7065_v56, %v7058_v57  ;;  %v15079_v21 = vsub.f32 %v336_v55, %v6811_v47 }
 0x2e7   :  { %16660 = vst [vmem:[#allocation22_spill] sm:$0xff] %v15073_v28  ;;  %v15081_v32 = vsub.f32 %v337_v12, %v6814_v29  ;;  %v8798_v14 = vadd.f32 %v8797_v6, %v8796_v41  ;;  %v6946_v31 = vand.u32 4294901760, %v6945_v11  ;;  %v15922_v16 = vand.u32 4294901760, %v15028_v27  ;;  %10873 = vmatpush3.bf16.msra.mxu0 %v14927_v59  ;;  %v8799_v29 = vpop.f32.mrb[54].mxu1  ;;  %v357_v6 = vld [vmem:[#allocation5 + $0x7e8] sm:$0xff] }
 0x2e8   :  { %v15923_v33 = vand.u32 4294901760, %v15043_v49  ;;  %v6953_v51 = vand.u32 4294901760, %v6952_v42  ;;  %v15088_v57 = vpack.c.bf16 %v6868_v58, %v6865_v4  ;;  %v7071_v55 = vsub.f32 %v15019_v34, %v15920_v13  ;;  %10907 = vmatprep.subr.bf16.mxu0 %v14936_v35  ;;  %v8800_v42 = vpop.f32.mrb[55].mxu1  ;;  %v16662_v13 = vld [vmem:[#allocation19_spill] sm:$0xff] }
 0x2e9   :  { %10897 = vmatpush3.bf16.msra.mxu1 %v14582_v8  ;;  %v16661_v12 = vand.u32 4294901760, %v15021_v9  ;;  %v15096_v47 = vadd.f32 %v8798_v14, %v4533_v54  ;;  %v15099_v56 = vsub.f32 %v354_v43, %v6865_v4  ;;  %v6817_v59 = vand.u32 4294901760, %v338_v25  ;;  %v16663_v43 = vld [vmem:[#allocation24_spill] sm:$0xff]  ;;  %v340_v54 = vld [vmem:[#allocation5 + $0x760] sm:$0xff] }
 0x2ea   :  { %10899 = vmatprep.subr.bf16.mxu1 %v14603_v40  ;;  %v356_v40 = vld [vmem:[#allocation5 + $0x7e0] sm:$0xff]  ;;  %v6885_v11 = vsub.f32 %v15049_v50, %v15921_v38  ;;  %v15104_v46 = vsub.f32 %v355_v3, %v6868_v58  ;;  %v6820_v41 = vand.u32 4294901760, %v339_v15  ;;  %v8801_v14 = vadd.f32 %v8800_v42, %v8799_v29  ;;  %6663 = vmatmul.mubr.f32.vlgmr.msra.gmra.mrb[80].mxu0 %v16662_v13 }
 0x2eb   :  { %v7078_v8 = vsub.f32 %v15021_v9, %v16661_v12  ;;  %v6959_v4 = vsub.f32 %v15028_v27, %v15922_v16  ;;  %v6966_v3 = vsub.f32 %v15043_v49, %v15923_v33  ;;  %10909 = vmatpush3.bf16.msra.mxu0 %v14962_v19  ;;  %6668 = vmatprep.mubr.f32.mxu0 %v16663_v43  ;;  %v7072_v38 = vand.u32 4294901760, %v7071_v55  ;;  %v341_v12 = vld [vmem:[#allocation5 + $0x768] sm:$0xff] }
 0x2ec   :  { %v15118_v58 = vpack.c.bf16 %v6953_v51, %v6946_v31  ;;  %v6871_v42 = vand.u32 4294901760, %v356_v40  ;;  %10911 = vmatprep.subr.bf16.mxu0 %v14966_v2  ;;  %v15124_v16 = vsub.f32 %v338_v25, %v6817_v59  ;;  %v6874_v33 = vand.u32 4294901760, %v357_v6 }
 0x2ed   :  { %10901 = vmatpush3.bf16.msra.mxu1 %v14619_v48  ;;  %v7079_v29 = vand.u32 4294901760, %v7078_v8  ;;  %v15120_v48 = vadd.f32 %v8801_v14, %v4542_v5  ;;  %v6886_v49 = vand.u32 4294901760, %v6885_v11  ;;  %v15126_v27 = vpack.c.bf16 %v6820_v41, %v6817_v59  ;;  %v16666_v14 = vld [vmem:[#allocation30_spill] sm:$0xff]  ;;  %v54_v59 = vld [vmem:[#allocation2 + $0x70] sm:$0xff] }
 0x2ee   :  { %10903 = vmatprep.subr.bf16.mxu1 %v16615_v23  ;;  %v16664_v31 = vand.u32 4294901760, %v15052_v63  ;;  %v16665_v55 = vand.u32 4294901760, %v15071_v36  ;;  %6670 = vmatmul.mubr.f32.gmra.mrb[82].mxu0 %v16666_v14  ;;  %v6960_v23 = vand.u32 4294901760, %v6959_v4  ;;  %v6967_v25 = vand.u32 4294901760, %v6966_v3 }
 0x2ef   :  { %v6823_v2 = vand.u32 4294901760, %v340_v54  ;;  %v6826_v11 = vand.u32 4294901760, %v341_v12  ;;  %10913 = vmatpush3.bf16.msra.mxu0 %v14968_v61  ;;  %v15934_v5 = vand.u32 4294901760, %v15081_v32  ;;  %v15149_v4 = vsub.f32 %v357_v6, %v6874_v33  ;;  %6887 = vmatprep.mubr.f32.mxu0 %v6886_v49 }
 0x2f0   :  { %v7085_v51 = vsub.f32 %v15052_v63, %v16664_v31  ;;  %v7092_v8 = vsub.f32 %v15071_v36, %v16665_v55  ;;  %v15139_v31 = vpack.c.bf16 %v7079_v29, %v7072_v38  ;;  %v15141_v63 = vsub.f32 %v339_v15, %v6820_v41  ;;  %10915 = vmatprep.subr.bf16.mxu0 %v14972_v45  ;;  %v15157_v29 = vld [vmem:[#allocation5 + $0x7f0] sm:$0xff] }
 0x2f1   :  { %10905 = vmatpush3.bf16.msra.mxu1 %v14720_v53  ;;  %v15143_v55 = vsub.f32 %v356_v40, %v6871_v42  ;;  %v15147_v53 = vpack.c.bf16 %v6874_v33, %v6871_v42  ;;  %16669 = vst [vmem:[#allocation23_spill] sm:$0xff] %v15149_v4  ;;  %v15935_v3 = vand.u32 4294901760, %v15099_v56  ;;  %v16670_v40 = vand.u32 4294901760, %v15079_v21  ;;  %v15159_v42 = vld [vmem:[#allocation5 + $0x7f8] sm:$0xff] }
 0x2f2   :  { %10939 = vmatprep.subr.bf16.mxu1 %v15003_v37  ;;  %16667 = vst [vmem:[#allocation17_spill] sm:$0xff] %v15141_v63  ;;  %v71_v37 = vld [vmem:[#allocation2 + $0xf8] sm:$0xff]  ;;  %v7086_v38 = vand.u32 4294901760, %v7085_v51  ;;  %v7093_v15 = vand.u32 4294901760, %v7092_v8  ;;  %v86_v33 = vmul.f32 %v54_v59, %v54_v59  ;;  %v10952_v6 = vpack.c.bf16 %v6967_v25, %v6960_v23  ;;  %v15174_v8 = vld [vmem:[#allocation5 + $0x770] sm:$0xff] }
 0x2f3   :  { %16668 = vst [vmem:[#allocation28_spill] sm:$0xff] %v15143_v55  ;;  %v6973_v41 = vsub.f32 %v15079_v21, %v16670_v40  ;;  %v15163_v49 = vpack.c.bf16 %v6826_v11, %v6823_v2  ;;  %v15165_v61 = vsub.f32 %v340_v54, %v6823_v2  ;;  %10917 = vmatpush3.bf16.msra.mxu0 %v14986_v0  ;;  %v70_v23 = vld [vmem:[#allocation2 + $0xf0] sm:$0xff]  ;;  %v6880_v54 = vand.u32 4294901760, %v15159_v42 }
 0x2f4   :  { %6774 = vmatmul.mubr.f32.vlgmr.msra.gmra.mrb[80].mxu1 %v16662_v13  ;;  %v15169_v13 = vsub.f32 %v341_v12, %v6826_v11  ;;  %v6980_v51 = vsub.f32 %v15081_v32, %v15934_v5  ;;  %10919 = vmatprep.subr.bf16.mxu0 %v15012_v10  ;;  %v16671_v12 = vand.u32 4294901760, %v15104_v46  ;;  %v10954_v11 = vpack.c.bf16 %v7093_v15, %v7086_v38 }
 0x2f5   :  { %10941 = vmatpush3.bf16.msra.mxu1 %v15005_v30  ;;  %6779 = vmatprep.mubr.f32.mxu1 %v16663_v43  ;;  %v15176_v30 = vld [vmem:[#allocation5 + $0x778] sm:$0xff]  ;;  %v103_v43 = vmul.f32 %v71_v37, %v71_v37  ;;  %v6974_v59 = vand.u32 4294901760, %v6973_v41  ;;  %v15189_v40 = vand.u32 4294901760, %v86_v33  ;;  %v6829_v5 = vand.u32 4294901760, %v15174_v8 }
 0x2f6   :  { %10943 = vmatprep.subr.bf16.mxu1 %v15055_v1  ;;  %v7099_v1 = vsub.f32 %v15099_v56, %v15935_v3  ;;  %v7106_v25 = vsub.f32 %v15104_v46, %v16671_v12  ;;  %v6832_v2 = vand.u32 4294901760, %v15176_v30  ;;  %v102_v10 = vmul.f32 %v70_v23, %v70_v23 }
 0x2f7   :  { %16672 = vst [vmem:[#allocation32_spill] sm:$0xff] %v15189_v40  ;;  %10921 = vmatpush3.bf16.msra.mxu0 %v15037_v62  ;;  %v15200_v41 = vand.u32 4294901760, %v103_v43  ;;  %v15209_v23 = vsub.f32 %v15159_v42, %v6880_v54  ;;  %v15215_v15 = vsub.f32 %v86_v33, %v15189_v40  ;;  %v16680_v33 = vand.u32 4294901760, %v15143_v55 }
 0x2f8   :  { %6781 = vmatmul.mubr.f32.gmra.mrb[82].mxu1 %v16666_v14  ;;  %v6981_v14 = vand.u32 4294901760, %v6980_v51  ;;  %10923 = vmatprep.subr.bf16.mxu0 %v15045_v44  ;;  %v7100_v3 = vand.u32 4294901760, %v7099_v1  ;;  %v7107_v37 = vand.u32 4294901760, %v7106_v25  ;;  %v15224_v42 = vsub.f32 %v15176_v30, %v6832_v2 }
 0x2f9   :  { %10945 = vmatpush3.bf16.msra.mxu1 %v15068_v52  ;;  %7138 = vmatprep.mubr.f32.mxu1 %v15026_v18  ;;  %16673 = vst [vmem:[#allocation21_spill] sm:$0xff] %v15200_v41  ;;  %v16674_v52 = vand.u32 4294901760, %v15157_v29  ;;  %16675 = vst [vmem:[#allocation33_spill] sm:$0xff] %v15209_v23  ;;  %v16678_v1 = vand.u32 4294901760, %v15141_v63  ;;  %v15240_v30 = vsub.f32 %v103_v43, %v15200_v41 }
 0x2fa   :  { %10947 = vmatprep.subr.bf16.mxu1 %v15077_v24  ;;  %v16676_v24 = vand.u32 4294901760, %v15124_v16  ;;  %16677 = vst [vmem:[#allocation19_spill] sm:$0xff] %v15224_v42  ;;  %v10958_v38 = vpack.c.bf16 %v7107_v37, %v7100_v3 }
 0x2fb   :  { %v15206_v12 = vsub.f32 %v15157_v29, %v16674_v52  ;;  %v15221_v52 = vsub.f32 %v15174_v8, %v6829_v5  ;;  %v6994_v25 = vsub.f32 %v15141_v63, %v16678_v1  ;;  %10925 = vmatpush3.bf16.msra.mxu0 %v15073_v28  ;;  %v16681_v8 = vand.u32 4294901760, %v15149_v4 }
 0x2fc   :  { %v6987_v51 = vsub.f32 %v15124_v16, %v16676_v24  ;;  %v15229_v24 = vand.u32 4294901760, %v102_v10  ;;  %10927 = vmatprep.subr.bf16.mxu0 %v15088_v57  ;;  %v10956_v1 = vpack.c.bf16 %v6981_v14, %v6974_v59  ;;  %v15954_v14 = vand.u32 4294901760, %v15224_v42 }
 0x2fd   :  { %10949 = vmatpush3.bf16.msra.mxu1 %v15118_v58  ;;  %v7113_v58 = vsub.f32 %v15143_v55, %v16680_v33  ;;  %v7120_v18 = vsub.f32 %v15149_v4, %v16681_v8  ;;  %v15952_v44 = vand.u32 4294901760, %v15206_v12  ;;  %v16682_v33 = vand.u32 4294901760, %v15165_v61 }
 0x2fe   :  { %16679 = vst [vmem:[#allocation24_spill] sm:$0xff] %v15229_v24  ;;  %10951 = vmatprep.subr.bf16.mxu1 %v15139_v31  ;;  %v8834_v31 = vpop.f32.mrb[56].mxu0  ;;  %v6988_v62 = vand.u32 4294901760, %v6987_v51  ;;  %v16683_v8 = vand.u32 4294901760, %v15169_v13  ;;  %v6995_v59 = vand.u32 4294901760, %v6994_v25  ;;  %v15253_v3 = vsub.f32 %v102_v10, %v15229_v24 }
 0x2ff   :  { %v7001_v55 = vsub.f32 %v15165_v61, %v16682_v33  ;;  %v8835_v4 = vpop.f32.mrb[57].mxu0  ;;  %v15953_v37 = vand.u32 4294901760, %v15221_v52  ;;  %10929 = vmatpush3.bf16.msra.mxu0 %v15126_v27  ;;  %v7114_v63 = vand.u32 4294901760, %v7113_v58  ;;  %v7121_v33 = vand.u32 4294901760, %v7120_v18 }
 0x300   :  { %v7008_v43 = vsub.f32 %v15169_v13, %v16683_v8  ;;  %v8836_v51 = vadd.f32 %v8835_v4, %v8834_v31  ;;  %10931 = vmatprep.subr.bf16.mxu0 %v15147_v53  ;;  %v15264_v10 = vpack.c.bf16 %v6832_v2, %v6829_v5  ;;  %v7127_v8 = vsub.f32 %v15206_v12, %v15952_v44  ;;  %v8837_v58 = vpop.f32.mrb[58].mxu0 }
 0x301   :  { %10953 = vmatpush3.bf16.msra.mxu1 %v10952_v6  ;;  %v16684_v6 = vand.u32 4294901760, %v15157_v29  ;;  %v16686_v4 = vand.u32 4294901760, %v15209_v23  ;;  %v16687_v31 = vand.u32 4294901760, %v15215_v15  ;;  %v7002_v29 = vand.u32 4294901760, %v7001_v55 }
 0x302   :  { %10955 = vmatprep.subr.bf16.mxu1 %v10954_v11  ;;  %v4829_v18 = vadd.f32 %v8836_v51, %v15096_v47  ;;  %v10960_v5 = vpack.c.bf16 %v6995_v59, %v6988_v62  ;;  %v7015_v44 = vsub.f32 %v15221_v52, %v15953_v37  ;;  %v7022_v47 = vsub.f32 %v15224_v42, %v15954_v14  ;;  %v8872_v62 = vpop.f32.mrb[56].mxu1 }
 0x303   :  { %v15262_v25 = vpack.c.bf16 %v6880_v54, %v16684_v6  ;;  %v7134_v11 = vsub.f32 %v15209_v23, %v16686_v4  ;;  %v6891_v28 = vsub.f32 %v15215_v15, %v16687_v31  ;;  %v7009_v54 = vand.u32 4294901760, %v7008_v43  ;;  %v8838_v6 = vpop.f32.mrb[59].mxu0  ;;  %10933 = vmatpush3.bf16.msra.mxu0 %v15163_v49  ;;  %v8873_v14 = vpop.f32.mrb[57].mxu1 }
 0x304   :  { %v8839_v51 = vadd.f32 %v8838_v6, %v8837_v58  ;;  %v10962_v4 = vpack.c.bf16 %v7121_v33, %v7114_v63  ;;  %v16688_v55 = vand.u32 4294901760, %v15240_v30  ;;  %v10970_v43 = vpack.c.bf16 %v14842_v39, %v14837_v20 }
 0x305   :  { %16685 = vst [vmem:[#allocation30_spill] sm:$0xff] %v15262_v25  ;;  %10957 = vmatpush3.bf16.msra.mxu1 %v10956_v1  ;;  %10935 = vmatprep.subr.bf16.mxu0 %v15262_v25  ;;  %v7128_v59 = vand.u32 4294901760, %v7127_v8  ;;  %v7135_v31 = vand.u32 4294901760, %v7134_v11  ;;  %v6892_v58 = vand.u32 4294901760, %v6891_v28  ;;  %v10964_v6 = vpack.c.bf16 %v7009_v54, %v7002_v29 }
 0x306   :  { %10959 = vmatprep.subr.bf16.mxu1 %v10958_v38  ;;  %v6900_v1 = vsub.f32 %v15240_v30, %v16688_v55  ;;  %v4836_v37 = vadd.f32 %v8839_v51, %v15120_v48  ;;  %v8874_v2 = vadd.f32 %v8873_v14, %v8872_v62  ;;  %v16689_v63 = vand.u32 4294901760, %v15253_v3  ;;  %v8875_v48 = vpop.f32.mrb[58].mxu1  ;;  %v16690_v14 = vld [vmem:[#allocation16_spill] sm:$0xff]  ;;  %v16691_v51 = vld [vmem:[#allocation13_spill] sm:$0xff] }
 0x307   :  { %v7016_v33 = vand.u32 4294901760, %v7015_v44  ;;  %v7023_v55 = vand.u32 4294901760, %v7022_v47  ;;  %10937 = vmatpush3.bf16.msra.mxu0 %v15264_v10  ;;  %v10972_v8 = vpack.c.bf16 %v14854_v22, %v14849_v7  ;;  %v10966_v28 = vpack.c.bf16 %v7135_v31, %v7128_v59  ;;  %v8876_v54 = vpop.f32.mrb[59].mxu1  ;;  %v16696_v31 = vld [vmem:[#allocation12_spill] sm:$0xff] }
 0x308   :  { %v6906_v38 = vsub.f32 %v15253_v3, %v16689_v63  ;;  %v6901_v11 = vand.u32 4294901760, %v6900_v1  ;;  %v4940_v25 = vadd.f32 %v8874_v2, %v4829_v18  ;;  %10971 = vmatprep.subr.bf16.mxu0 %v10970_v43  ;;  %v10974_v29 = vpack.c.bf16 %v16690_v14, %v14938_v26  ;;  %v16693_v18 = vld [vmem:[#allocation29_spill] sm:$0xff]  ;;  %v16694_v2 = vld [vmem:[#allocation20_spill] sm:$0xff] }
 0x309   :  { %10961 = vmatpush3.bf16.msra.mxu1 %v10960_v5  ;;  %v8877_v5 = vadd.f32 %v8876_v54, %v8875_v48  ;;  %v10968_v47 = vpack.c.bf16 %v7023_v55, %v7016_v33  ;;  %v10978_v1 = vpack.c.bf16 %v16694_v2, %v16693_v18  ;;  %v10980_v43 = vpack.c.bf16 %v14992_v17, %v14990_v60  ;;  %v16699_v55 = vld [vmem:[#allocation15_spill] sm:$0xff] }
 0x30a   :  { %10963 = vmatprep.subr.bf16.mxu1 %v10962_v4  ;;  %6893 = vmatmul.mubr.f32.vlgmr.msra.gmra.mrb[84].mxu0 %v6892_v58  ;;  %v6907_v44 = vand.u32 4294901760, %v6906_v38  ;;  %v16692_v4 = vld [vmem:[#allocation26_spill] sm:$0xff]  ;;  %v10982_v59 = vpack.c.bf16 %v15021_v9, %v15019_v34  ;;  %v16698_v38 = vld [vmem:[#allocation31_spill] sm:$0xff]  ;;  %v10990_v48 = vpack.c.bf16 %v15104_v46, %v15099_v56 }
 0x30b   :  { %10973 = vmatpush3.bf16.msra.mxu0 %v10972_v8  ;;  %6902 = vmatprep.mubr.f32.mxu0 %v6901_v11  ;;  %v10976_v62 = vpack.c.bf16 %v16692_v4, %v16691_v51  ;;  %v4947_v63 = vadd.f32 %v8877_v5, %v4836_v37  ;;  %v16695_v37 = vld [vmem:[#allocation14_spill] sm:$0xff]  ;;  %v10986_v33 = vpack.c.bf16 %v15071_v36, %v16698_v38  ;;  %v16700_v8 = vand.u32 4294901760, %v15049_v50  ;;  %v16704_v5 = vld [vmem:[#allocation23_spill] sm:$0xff] }
 0x30c   :  { %10975 = vmatprep.subr.bf16.mxu0 %v10974_v29  ;;  %v16697_v58 = vld [vmem:[#allocation34_spill] sm:$0xff]  ;;  %v10988_v11 = vpack.c.bf16 %v15081_v32, %v15079_v21  ;;  %v16702_v29 = vld [vmem:[#allocation17_spill] sm:$0xff] }
 0x30d   :  { %10965 = vmatpush3.bf16.msra.mxu1 %v10964_v6  ;;  %v10984_v6 = vpack.c.bf16 %v16697_v58, %v16696_v31  ;;  %v10992_v54 = vpack.c.bf16 %v16702_v29, %v15124_v16 }
 0x30e   :  { %10967 = vmatprep.subr.bf16.mxu1 %v10966_v28  ;;  %6908 = vmatmul.mubr.f32.gmra.mrb[86].mxu0 %v6907_v44  ;;  %v16701_v28 = vld [vmem:[#allocation27_spill] sm:$0xff] }
 0x30f   :  { %10977 = vmatpush3.bf16.msra.mxu0 %v10976_v62  ;;  %7282 = vmatprep.mubr.f32.mxu0 %v15049_v50  ;;  %v16703_v50 = vld [vmem:[#allocation28_spill] sm:$0xff] }
 0x310   :  { %10979 = vmatprep.subr.bf16.mxu0 %v10978_v1  ;;  %v10994_v44 = vpack.c.bf16 %v16704_v5, %v16703_v50  ;;  %v16705_v1 = vld [vmem:[#allocation18_spill] sm:$0xff] }
 0x311   :  { %10969 = vmatpush3.bf16.msra.mxu1 %v10968_v47 }
 0x312   :  { %11003 = vmatprep.subr.bf16.mxu1 %v14936_v35 }
 0x313   :  { %10981 = vmatpush3.bf16.msra.mxu0 %v10980_v43 }
 0x314   :  { %7140 = vmatmul.mubr.f32.vlgmr.msra.gmra.mrb[84].mxu1 %v15189_v40  ;;  %10983 = vmatprep.subr.bf16.mxu0 %v10982_v59  ;;  %v16706_v59 = vld [vmem:[#allocation25_spill] sm:$0xff] }
 0x315   :  { %11005 = vmatpush3.bf16.msra.mxu1 %v14962_v19  ;;  %7145 = vmatprep.mubr.f32.mxu1 %v15200_v41 }
 0x316   :  { %11007 = vmatprep.subr.bf16.mxu1 %v16695_v37 }
 0x317   :  { %10985 = vmatpush3.bf16.msra.mxu0 %v10984_v6  ;;  %v10996_v6 = vpack.c.bf16 %v15169_v13, %v15165_v61 }
 0x318   :  { %7147 = vmatmul.mubr.f32.gmra.mrb[86].mxu1 %v15229_v24  ;;  %10987 = vmatprep.subr.bf16.mxu0 %v10986_v33  ;;  %v10998_v33 = vpack.c.bf16 %v15209_v23, %v15206_v12  ;;  %v16707_v24 = vld [vmem:[#allocation22_spill] sm:$0xff] }
 0x319   :  { %11009 = vmatpush3.bf16.msra.mxu1 %v16699_v55  ;;  %7398 = vmatprep.mubr.f32.mxu1 %v16700_v8 }
 0x31a   :  { %11011 = vmatprep.subr.bf16.mxu1 %v14972_v45  ;;  %v8910_v47 = vpop.f32.mrb[60].mxu0 }
 0x31b   :  { %10989 = vmatpush3.bf16.msra.mxu0 %v10988_v11  ;;  %v8911_v62 = vpop.f32.mrb[61].mxu0 }
 0x31c   :  { %10991 = vmatprep.subr.bf16.mxu0 %v10990_v48  ;;  %v8912_v43 = vadd.f32 %v8911_v62, %v8910_v47  ;;  %v16708_v62 = vand.u32 4294901760, %v14837_v20  ;;  %v16712_v20 = vand.u32 4294901760, %v14938_v26  ;;  %v16717_v26 = vand.u32 4294901760, %v16693_v18 }
 0x31d   :  { %11013 = vmatpush3.bf16.msra.mxu1 %v14986_v0  ;;  %v16722_v18 = vand.u32 4294901760, %v15021_v9  ;;  %v16728_v9 = vand.u32 4294901760, %v16698_v38 }
 0x31e   :  { %11015 = vmatprep.subr.bf16.mxu1 %v16701_v28  ;;  %v5059_v8 = vadd.f32 %v8912_v43, %v4940_v25  ;;  %v8913_v11 = vpop.f32.mrb[62].mxu0 }
 0x31f   :  { %10993 = vmatpush3.bf16.msra.mxu0 %v10992_v54  ;;  %v8914_v48 = vpop.f32.mrb[63].mxu0  ;;  %v11000_v54 = vpack.c.bf16 %v15224_v42, %v15221_v52 }
 0x320   :  { %10995 = vmatprep.subr.bf16.mxu0 %v10994_v44  ;;  %v8915_v41 = vadd.f32 %v8914_v48, %v8913_v11  ;;  %v16709_v44 = vand.u32 4294901760, %v14842_v39  ;;  %v16711_v11 = vand.u32 4294901760, %v14854_v22  ;;  %v16713_v39 = vand.u32 4294901760, %v16690_v14 }
 0x321   :  { %11017 = vmatpush3.bf16.msra.mxu1 %v16705_v1  ;;  %v8948_v47 = vpop.f32.mrb[60].mxu1  ;;  %v16715_v22 = vand.u32 4294901760, %v16692_v4  ;;  %v16718_v14 = vand.u32 4294901760, %v16694_v2  ;;  %v16720_v4 = vand.u32 4294901760, %v14992_v17  ;;  %v16723_v2 = vld [vmem:[#allocation11_spill] sm:$0xff]  ;;  %v16727_v17 = vand.u32 4294901760, %v16697_v58 }
 0x322   :  { %11019 = vmatprep.subr.bf16.mxu1 %v16706_v59  ;;  %v11034_v40 = vpack.c.bf16 %v16709_v44, %v16708_v62  ;;  %v5074_v23 = vadd.f32 %v8915_v41, %v4947_v63  ;;  %v8949_v25 = vpop.f32.mrb[61].mxu1  ;;  %v11038_v41 = vpack.c.bf16 %v16713_v39, %v16712_v20  ;;  %v16721_v44 = vand.u32 4294901760, %v15019_v34 }
 0x323   :  { %10997 = vmatpush3.bf16.msra.mxu0 %v10996_v6  ;;  %v8950_v43 = vadd.f32 %v8949_v25, %v8948_v47  ;;  %v16710_v6 = vand.u32 4294901760, %v14849_v7  ;;  %v16714_v7 = vand.u32 4294901760, %v16691_v51  ;;  %v11042_v62 = vpack.c.bf16 %v16718_v14, %v16717_v26  ;;  %v16749_v14 = vld [vmem:[#allocation24_spill] sm:$0xff] }
 0x324   :  { %10999 = vmatprep.subr.bf16.mxu0 %v10998_v33  ;;  %v16719_v51 = vand.u32 4294901760, %v14990_v60  ;;  %v11046_v25 = vpack.c.bf16 %v16722_v18, %v16721_v44  ;;  %v16726_v60 = vand.u32 4294901760, %v16696_v31  ;;  %v16733_v31 = vand.u32 4294901760, %v15099_v56 }
 0x325   :  { %11021 = vmatpush3.bf16.msra.mxu1 %v16707_v24  ;;  %v11036_v48 = vpack.c.bf16 %v16711_v11, %v16710_v6  ;;  %v5306_v42 = vadd.f32 %v8950_v43, %v5059_v8  ;;  %v8951_v33 = vpop.f32.mrb[62].mxu1  ;;  %v11040_v8 = vpack.c.bf16 %v16715_v22, %v16714_v7  ;;  %v16724_v43 = vand.u32 4294901760, %v15215_v15 }
 0x326   :  { %11023 = vmatprep.subr.bf16.mxu1 %v15088_v57  ;;  %v8952_v63 = vpop.f32.mrb[63].mxu1  ;;  %v11048_v34 = vpack.c.bf16 %v16727_v17, %v16726_v60  ;;  %v16729_v6 = vand.u32 4294901760, %v15071_v36  ;;  %v16730_v11 = vand.u32 4294901760, %v15253_v3  ;;  %v16734_v36 = vand.u32 4294901760, %v15104_v46 }
 0x327   :  { %11001 = vmatpush3.bf16.msra.mxu0 %v11000_v54  ;;  %v8953_v47 = vadd.f32 %v8952_v63, %v8951_v33  ;;  %v16716_v54 = vld [vmem:[#allocation30_spill] sm:$0xff] }
 0x328   :  { %11035 = vmatprep.subr.bf16.mxu0 %v11034_v40  ;;  %v11054_v58 = vpack.c.bf16 %v16734_v36, %v16733_v31 }
 0x329   :  { %11025 = vmatpush3.bf16.msra.mxu1 %v15126_v27  ;;  %v5313_v40 = vadd.f32 %v8953_v47, %v5074_v23  ;;  %v11044_v23 = vpack.c.bf16 %v16720_v4, %v16719_v51 }
 0x32a   :  { %11027 = vmatprep.subr.bf16.mxu1 %v15147_v53  ;;  %7285 = vmatmul.mubr.f32.vlgmr.msra.gmra.mrb[88].mxu0 %v15215_v15  ;;  %v11050_v15 = vpack.c.bf16 %v16729_v6, %v16728_v9 }
 0x32b   :  { %11037 = vmatpush3.bf16.msra.mxu0 %v11036_v48  ;;  %7291 = vmatprep.mubr.f32.mxu0 %v15240_v30 }
 0x32c   :  { %11039 = vmatprep.subr.bf16.mxu0 %v11038_v41 }
 0x32d   :  { %11029 = vmatpush3.bf16.msra.mxu1 %v15163_v49 }
 0x32e   :  { %11031 = vmatprep.subr.bf16.mxu1 %v16716_v54  ;;  %7294 = vmatmul.mubr.f32.gmra.mrb[90].mxu0 %v15253_v3  ;;  %v16735_v3 = vand.u32 4294901760, %v15124_v16  ;;  %v16740_v16 = vand.u32 4294901760, %v15169_v13 }
 0x32f   :  { %11041 = vmatpush3.bf16.msra.mxu0 %v11040_v8  ;;  %7579 = vmatprep.mubr.f32.mxu0 %v16723_v2 }
 0x330   :  { %11043 = vmatprep.subr.bf16.mxu0 %v11042_v62 }
 0x331   :  { %11033 = vmatpush3.bf16.msra.mxu1 %v15264_v10 }
 0x332   :  { %11067 = vmatprep.subr.bf16.mxu1 %v14936_v35  ;;  %v16725_v35 = vand.u32 4294901760, %v15240_v30  ;;  %v16732_v30 = vand.u32 4294901760, %v15081_v32  ;;  %v16738_v32 = vand.u32 4294901760, %v16704_v5 }
 0x333   :  { %11045 = vmatpush3.bf16.msra.mxu0 %v11044_v23 }
 0x334   :  { %7402 = vmatmul.mubr.f32.vlgmr.msra.gmra.mrb[88].mxu1 %v16724_v43  ;;  %11047 = vmatprep.subr.bf16.mxu0 %v11046_v25 }
 0x335   :  { %11069 = vmatpush3.bf16.msra.mxu1 %v14962_v19  ;;  %7409 = vmatprep.mubr.f32.mxu1 %v16725_v35  ;;  %v16731_v19 = vand.u32 4294901760, %v15079_v21  ;;  %v16737_v21 = vand.u32 4294901760, %v16703_v50  ;;  %v16742_v50 = vld [vmem:[#allocation33_spill] sm:$0xff] }
 0x336   :  { %11071 = vmatprep.subr.bf16.mxu1 %v16695_v37  ;;  %v16743_v33 = vand.u32 4294901760, %v16742_v50 }
 0x337   :  { %11049 = vmatpush3.bf16.msra.mxu0 %v11048_v34  ;;  %v11052_v37 = vpack.c.bf16 %v16732_v30, %v16731_v19 }
 0x338   :  { %7413 = vmatmul.mubr.f32.gmra.mrb[90].mxu1 %v16730_v11  ;;  %11051 = vmatprep.subr.bf16.mxu0 %v11050_v15 }
 0x339   :  { %11073 = vmatpush3.bf16.msra.mxu1 %v16699_v55  ;;  %7690 = vmatprep.mubr.f32.mxu1 %v16723_v2  ;;  %v11058_v55 = vpack.c.bf16 %v16738_v32, %v16737_v21 }
 0x33a   :  { %11075 = vmatprep.subr.bf16.mxu1 %v14972_v45  ;;  %v16736_v45 = vand.u32 4294901760, %v16702_v29  ;;  %v8986_v56 = vpop.f32.mrb[64].mxu0  ;;  %v16741_v29 = vand.u32 4294901760, %v15206_v12 }
 0x33b   :  { %11053 = vmatpush3.bf16.msra.mxu0 %v11052_v37  ;;  %v8987_v48 = vpop.f32.mrb[65].mxu0 }
 0x33c   :  { %v11056_v38 = vpack.c.bf16 %v16736_v45, %v16735_v3  ;;  %11055 = vmatprep.subr.bf16.mxu0 %v11054_v58  ;;  %v8988_v46 = vadd.f32 %v8987_v48, %v8986_v56  ;;  %v11062_v5 = vpack.c.bf16 %v16743_v33, %v16741_v29 }
 0x33d   :  { %11077 = vmatpush3.bf16.msra.mxu1 %v14986_v0  ;;  %v16739_v0 = vand.u32 4294901760, %v15165_v61  ;;  %v16744_v61 = vand.u32 4294901760, %v15221_v52  ;;  %v16748_v52 = vld [vmem:[#allocation21_spill] sm:$0xff] }
 0x33e   :  { %11079 = vmatprep.subr.bf16.mxu1 %v16701_v28  ;;  %v5451_v20 = vadd.f32 %v8988_v46, %v5306_v42  ;;  %v8989_v39 = vpop.f32.mrb[66].mxu0 }
 0x33f   :  { %11057 = vmatpush3.bf16.msra.mxu0 %v11056_v38  ;;  %v11060_v28 = vpack.c.bf16 %v16740_v16, %v16739_v0  ;;  %v8990_v41 = vpop.f32.mrb[67].mxu0 }
 0x340   :  { %11059 = vmatprep.subr.bf16.mxu0 %v11058_v55 }
 0x341   :  { %11081 = vmatpush3.bf16.msra.mxu1 %v16705_v1  ;;  %v8991_v1 = vadd.f32 %v8990_v41, %v8989_v39 }
 0x342   :  { %11083 = vmatprep.subr.bf16.mxu1 %v16706_v59  ;;  %v16745_v59 = vld [vmem:[#allocation19_spill] sm:$0xff] }
 0x343   :  { %11061 = vmatpush3.bf16.msra.mxu0 %v11060_v28  ;;  %v16746_v13 = vand.u32 4294901760, %v16745_v59  ;;  %v9024_v47 = vpop.f32.mrb[64].mxu1  ;;  %v5460_v12 = vadd.f32 %v8991_v1, %v5313_v40 }
 0x344   :  { %11063 = vmatprep.subr.bf16.mxu0 %v11062_v5  ;;  %v9025_v7 = vpop.f32.mrb[65].mxu1 }
 0x345   :  { %11085 = vmatpush3.bf16.msra.mxu1 %v16707_v24  ;;  %v11064_v63 = vpack.c.bf16 %v16746_v13, %v16744_v61  ;;  %v9026_v22 = vadd.f32 %v9025_v7, %v9024_v47 }
 0x346   :  { %11087 = vmatprep.subr.bf16.mxu1 %v15088_v57  ;;  %v16747_v57 = vld [vmem:[#allocation32_spill] sm:$0xff] }
 0x347   :  { %11065 = vmatpush3.bf16.msra.mxu0 %v11064_v63  ;;  %v5568_v42 = vadd.f32 %v9026_v22, %v5451_v20  ;;  %v9027_v24 = vpop.f32.mrb[66].mxu1 }
 0x348   :  { %v9028_v8 = vpop.f32.mrb[67].mxu1 }
 0x349   :  { %11089 = vmatpush3.bf16.msra.mxu1 %v15126_v27  ;;  %v9029_v26 = vadd.f32 %v9028_v8, %v9027_v24 }
 0x34a   :  { %11091 = vmatprep.subr.bf16.mxu1 %v15147_v53  ;;  %7581 = vmatmul.mubr.f32.vlgmr.msra.gmra.mrb[92].mxu0 %v16747_v57 }
 0x34b   :  { %7586 = vmatprep.mubr.f32.mxu0 %v16748_v52  ;;  %v5579_v40 = vadd.f32 %v9029_v26, %v5460_v12 }
 0x34d   :  { %11093 = vmatpush3.bf16.msra.mxu1 %v15163_v49 }
 0x34e   :  { %11095 = vmatprep.subr.bf16.mxu1 %v16716_v54  ;;  %7588 = vmatmul.mubr.f32.gmra.mrb[94].mxu0 %v16749_v14 }
 0x351   :  { %11097 = vmatpush3.bf16.msra.mxu1 %v15264_v10 }
 0x354   :  { %7692 = vmatmul.mubr.f32.vlgmr.msra.gmra.mrb[92].mxu1 %v16747_v57 }
 0x355   :  { %7697 = vmatprep.mubr.f32.mxu1 %v16748_v52 }
 0x358   :  { %7699 = vmatmul.mubr.f32.gmra.mrb[94].mxu1 %v16749_v14 }
 0x35a   :  { %v9062_v27 = vpop.f32.mrb[68].mxu0 }
 0x35b   :  { %v9063_v53 = vpop.f32.mrb[69].mxu0 }
 0x35c   :  { %v9064_v62 = vadd.f32 %v9063_v53, %v9062_v27 }
 0x35e   :  { %v5747_v51 = vadd.f32 %v9064_v62, %v5568_v42  ;;  %v9065_v49 = vpop.f32.mrb[70].mxu0 }
 0x35f   :  { %v9066_v4 = vpop.f32.mrb[71].mxu0 }
 0x360   :  { %v9067_v23 = vadd.f32 %v9066_v4, %v9065_v49 }
 0x362   :  { %v5754_v54 = vadd.f32 %v9067_v23, %v5579_v40 }
 0x363   :  { %v9100_v44 = vpop.f32.mrb[68].mxu1 }
 0x364   :  { %v9101_v18 = vpop.f32.mrb[69].mxu1 }
 0x365   :  { %v9102_v25 = vadd.f32 %v9101_v18, %v9100_v44 }
 0x367   :  { %v5858_v2 = vadd.f32 %v9102_v25, %v5747_v51  ;;  %v9103_v43 = vpop.f32.mrb[70].mxu1 }
 0x368   :  { %v9104_v10 = vpop.f32.mrb[71].mxu1 }
 0x369   :  { %v9105_v35 = vadd.f32 %v9104_v10, %v9103_v43 }
 0x36b   :  { %v5865_v60 = vadd.f32 %v9105_v35, %v5754_v54 }
 0x37c   :  { %v9138_v17 = vpop.f32.mrb[72].mxu0 }
 0x37d   :  { %v9139_v34 = vpop.f32.mrb[73].mxu0 }
 0x37e   :  { %v9140_v9 = vadd.f32 %v9139_v34, %v9138_v17 }
 0x380   :  { %v5977_v6 = vadd.f32 %v9140_v9, %v5858_v2  ;;  %v9141_v15 = vpop.f32.mrb[74].mxu0 }
 0x381   :  { %v9142_v11 = vpop.f32.mrb[75].mxu0 }
 0x382   :  { %v9143_v19 = vadd.f32 %v9142_v11, %v9141_v15 }
 0x383   :  { %v9176_v30 = vpop.f32.mrb[72].mxu1 }
 0x384   :  { %v5992_v37 = vadd.f32 %v9143_v19, %v5865_v60  ;;  %v9177_v31 = vpop.f32.mrb[73].mxu1 }
 0x385   :  { %v9178_v36 = vadd.f32 %v9177_v31, %v9176_v30 }
 0x387   :  { %v6224_v58 = vadd.f32 %v9178_v36, %v5977_v6  ;;  %v9179_v3 = vpop.f32.mrb[74].mxu1 }
 0x388   :  { %v9180_v45 = vpop.f32.mrb[75].mxu1 }
 0x389   :  { %v9181_v38 = vadd.f32 %v9180_v45, %v9179_v3 }
 0x38b   :  { %v6231_v21 = vadd.f32 %v9181_v38, %v5992_v37 }
 0x39c   :  { %v9214_v32 = vpop.f32.mrb[76].mxu0 }
 0x39d   :  { %v9215_v55 = vpop.f32.mrb[77].mxu0 }
 0x39e   :  { %v9216_v56 = vadd.f32 %v9215_v55, %v9214_v32 }
 0x3a0   :  { %v6369_v48 = vadd.f32 %v9216_v56, %v6224_v58  ;;  %v9217_v46 = vpop.f32.mrb[78].mxu0 }
 0x3a1   :  { %v9218_v0 = vpop.f32.mrb[79].mxu0 }
 0x3a2   :  { %v9219_v16 = vadd.f32 %v9218_v0, %v9217_v46 }
 0x3a4   :  { %v6378_v29 = vadd.f32 %v9219_v16, %v6231_v21 }
 0x3a6   :  { %v9252_v28 = vpop.f32.mrb[76].mxu1 }
 0x3a7   :  { %v9253_v50 = vpop.f32.mrb[77].mxu1 }
 0x3a8   :  { %v9254_v33 = vadd.f32 %v9253_v50, %v9252_v28 }
 0x3aa   :  { %v6486_v5 = vadd.f32 %v9254_v33, %v6369_v48 }
 0x3ab   :  { %v9255_v20 = vpop.f32.mrb[78].mxu1 }
 0x3ac   :  { %v9256_v39 = vpop.f32.mrb[79].mxu1 }
 0x3ad   :  { %v9257_v41 = vadd.f32 %v9256_v39, %v9255_v20 }
 0x3af   :  { %v6497_v1 = vadd.f32 %v9257_v41, %v6378_v29 }
 0x3bd   :  { %v9290_v61 = vpop.f32.mrb[80].mxu0 }
 0x3be   :  { %v9291_v59 = vpop.f32.mrb[81].mxu0 }
 0x3bf   :  { %v9292_v13 = vadd.f32 %v9291_v59, %v9290_v61 }
 0x3c1   :  { %v6665_v63 = vadd.f32 %v9292_v13, %v6486_v5  ;;  %v9293_v47 = vpop.f32.mrb[82].mxu0 }
 0x3c2   :  { %v9294_v12 = vpop.f32.mrb[83].mxu0 }
 0x3c3   :  { %v9295_v7 = vadd.f32 %v9294_v12, %v9293_v47 }
 0x3c5   :  { %v6672_v42 = vadd.f32 %v9295_v7, %v6497_v1 }
 0x3c7   :  { %v9328_v22 = vpop.f32.mrb[80].mxu1 }
 0x3c8   :  { %v9329_v24 = vpop.f32.mrb[81].mxu1 }
 0x3c9   :  { %v9330_v8 = vadd.f32 %v9329_v24, %v9328_v22 }
 0x3cb   :  { %v6776_v26 = vadd.f32 %v9330_v8, %v6665_v63  ;;  %v9331_v57 = vpop.f32.mrb[82].mxu1 }
 0x3cc   :  { %v9332_v52 = vpop.f32.mrb[83].mxu1 }
 0x3cd   :  { %v9333_v40 = vadd.f32 %v9332_v52, %v9331_v57 }
 0x3cf   :  { %v6783_v14 = vadd.f32 %v9333_v40, %v6672_v42 }
 0x3dd   :  { %v9366_v27 = vpop.f32.mrb[84].mxu0 }
 0x3de   :  { %v9367_v53 = vpop.f32.mrb[85].mxu0 }
 0x3df   :  { %v9368_v62 = vadd.f32 %v9367_v53, %v9366_v27 }
 0x3e1   :  { %v6895_v51 = vadd.f32 %v9368_v62, %v6776_v26  ;;  %v9369_v49 = vpop.f32.mrb[86].mxu0 }
 0x3e2   :  { %v9370_v4 = vpop.f32.mrb[87].mxu0 }
 0x3e3   :  { %v9371_v23 = vadd.f32 %v9370_v4, %v9369_v49 }
 0x3e5   :  { %v6910_v54 = vadd.f32 %v9371_v23, %v6783_v14 }
 0x3e7   :  { %v9404_v44 = vpop.f32.mrb[84].mxu1 }
 0x3e8   :  { %v9405_v18 = vpop.f32.mrb[85].mxu1 }
 0x3e9   :  { %v9406_v25 = vadd.f32 %v9405_v18, %v9404_v44 }
 0x3eb   :  { %v7142_v2 = vadd.f32 %v9406_v25, %v6895_v51  ;;  %v9407_v43 = vpop.f32.mrb[86].mxu1 }
 0x3ec   :  { %v9408_v10 = vpop.f32.mrb[87].mxu1 }
 0x3ed   :  { %v9409_v35 = vadd.f32 %v9408_v10, %v9407_v43 }
 0x3ef   :  { %v7149_v60 = vadd.f32 %v9409_v35, %v6910_v54 }
 0x3fd   :  { %v9442_v17 = vpop.f32.mrb[88].mxu0 }
 0x3fe   :  { %v9443_v34 = vpop.f32.mrb[89].mxu0 }
 0x3ff   :  { %v9444_v9 = vadd.f32 %v9443_v34, %v9442_v17 }
 0x401   :  { %v7287_v6 = vadd.f32 %v9444_v9, %v7142_v2  ;;  %v9445_v15 = vpop.f32.mrb[90].mxu0 }
 0x402   :  { %v9446_v11 = vpop.f32.mrb[91].mxu0 }
 0x403   :  { %v9447_v19 = vadd.f32 %v9446_v11, %v9445_v15 }
 0x405   :  { %v7296_v37 = vadd.f32 %v9447_v19, %v7149_v60 }
 0x407   :  { %v9480_v30 = vpop.f32.mrb[88].mxu1 }
 0x408   :  { %v9481_v31 = vpop.f32.mrb[89].mxu1 }
 0x409   :  { %v9482_v36 = vadd.f32 %v9481_v31, %v9480_v30 }
 0x40b   :  { %v7404_v58 = vadd.f32 %v9482_v36, %v7287_v6  ;;  %v9483_v3 = vpop.f32.mrb[90].mxu1 }
 0x40c   :  { %v9484_v45 = vpop.f32.mrb[91].mxu1 }
 0x40d   :  { %v9485_v38 = vadd.f32 %v9484_v45, %v9483_v3 }
 0x40f   :  { %v7415_v21 = vadd.f32 %v9485_v38, %v7296_v37 }
 0x41d   :  { %v9518_v32 = vpop.f32.mrb[92].mxu0 }
 0x41e   :  { %v9519_v55 = vpop.f32.mrb[93].mxu0 }
 0x41f   :  { %v9520_v56 = vadd.f32 %v9519_v55, %v9518_v32 }
 0x421   :  { %v7583_v48 = vadd.f32 %v9520_v56, %v7404_v58  ;;  %v9521_v46 = vpop.f32.mrb[94].mxu0 }
 0x422   :  { %v9522_v0 = vpop.f32.mrb[95].mxu0 }
 0x423   :  { %v9523_v16 = vadd.f32 %v9522_v0, %v9521_v46 }
 0x425   :  { %v7590_v29 = vadd.f32 %v9523_v16, %v7415_v21 }
 0x427   :  { %v9556_v28 = vpop.f32.mrb[92].mxu1 }
 0x428   :  { %v9557_v50 = vpop.f32.mrb[93].mxu1 }
 0x429   :  { %v9558_v33 = vadd.f32 %v9557_v50, %v9556_v28 }
 0x42b   :  { %v7694_v5 = vadd.f32 %v9558_v33, %v7583_v48  ;;  %v9559_v20 = vpop.f32.mrb[94].mxu1 }
 0x42c   :  { %v9560_v39 = vpop.f32.mrb[95].mxu1 }
 0x42d   :  { %11104 = vrsqrt.f32 %v7694_v5  ;;  %v9561_v41 = vadd.f32 %v9560_v39, %v9559_v20  ;;  %vm7706_vm0 = vcmp.eq.f32.partialorder %v7694_v5, inf  ;;  %v7709_v13 = vand.u32 2147483648, %v7694_v5 }
 0x42e   :  { %vm7708_vm1 = vcmp.eq.f32.partialorder %v7694_v5, 0.0 }
 0x42f   :  { %v7701_v1 = vadd.f32 %v9561_v41, %v7590_v29 }
 0x431   :  { %11106 = vrsqrt.f32 %v7701_v1  ;;  %vm7713_vm2 = vcmp.eq.f32.partialorder %v7701_v1, inf  ;;  %v7716_v22 = vand.u32 2147483648, %v7701_v1  ;;  %vm7715_vm3 = vcmp.eq.f32.partialorder %v7701_v1, 0.0 }
 0x437   :  { %v11105_v61 = vpop.eup %11104 }
 0x438   :  { %v7705_v59 = vmul.f32 %v11105_v61, %v7694_v5 }
 0x43a   :  { %v7707_v63 = vsel %vm7706_vm0, %v7694_v5, %v7705_v59 }
 0x43b   :  { %v11107_v47 = vpop.eup %11106  ;;  %v7710_v12 = vsel %vm7708_vm1, %v7709_v13, %v7707_v63 }
 0x43c   :  { %v7712_v7 = vmul.f32 %v11107_v47, %v7701_v1  ;;  %7718 = vst [vmem:[#allocation7] sm:$0xff] %v7710_v12 }
 0x43e   :  { %v7714_v42 = vsel %vm7713_vm2, %v7701_v1, %v7712_v7 }
 0x43f   :  { %v7717_v24 = vsel %vm7715_vm3, %v7716_v22, %v7714_v42 }
 0x440   :  { %7719 = vst [vmem:[#allocation7 + $0x8] sm:$0xff] %v7717_v24 }
 0x441   :  { %11163 = shalt.err (!%p11160_p6)
}
 0x442   :  { %s11164_s11 = scalar_lea.hbm %s15461_s2, 256 }
 0x443   :  { %p11165_p7 = scmp.ne.s32.totalorder %s15461_s2, %s11164_s11  ;;  %p11168_p8 = scmp.lt.u32.totalorder %s11164_s11, %s15461_s2 }
 0x445   :  { %p11170_p9 = pnand %p11168_p8, %p11165_p7 }
 0x447   :  { %11173 = shalt.err (!%p11170_p9)
}
 0x448   :  { %7731 = dma.vmem_to_hbm [thread:$0]  %s7726_s7, 256, %s15461_s2, [#allocation4], %s11182_s20, %s11182_s20, %s11184_s0  }
 0x449   :  { %11178 = dma.done.wait [#allocation4], 256  }
 0x44a   :  { %11179 = vsyncadd [#allocation4], 4294967040 }
 0x44b   :  { %7735 = vsyncpa [#allocation3], 1 }
 0x44c   :  { %7736 = vsyncpa [#allocation6], 1 }
 0x44d   :  { %7737 = vsyncpa [#allocation4], 1 }

</bundles_post_ra>
